<compile_context>
chip_gen: v5e
topology: v5e:2x2
jax: 0.10.0
libtpu: 0.0.40
codegen_flags: <defaults>
</compile_context>

<pallas_src>
import math

import jax
import jax.numpy as jnp
from jax.experimental import pallas as pl
from jax.experimental.pallas import tpu as pltpu


# ----------------------------- configuration -----------------------------
B = 2                         # batch
C_IN = 3                      # input channels
IMG = 16                      # image height / width
PATCH = 8                     # patch size
EMBED = 64                    # embedding dim
HEADS = 4                     # attention heads
HEAD_DIM = EMBED // HEADS
LAYERS = 2                    # encoder blocks
MLP_HIDDEN = int(EMBED * 4.0)
NUM_CLASSES = 16
NUM_CLASSES_PAD = 128         # lane-dense output store
NUM_PATCHES = (IMG // PATCH) ** 2
SEQ = NUM_PATCHES + 1         # +1 cls token
BS = B * SEQ                  # batch folded into rows
CPP = C_IN * PATCH * PATCH
LN_EPS = 1e-5
_INV_SQRT2 = 1.0 / math.sqrt(2.0)      # python float -> literal (not captured)
_ATTN_SCALE = HEAD_DIM ** (-0.5)       # python float -> literal (not captured)

# -------------------- packed-parameter buffer layout --------------------
# Weight slab: (W_ROWS, WPAD) f32, every matrix stored row-contiguous,
# zero-padded to WPAD lanes.  All row offsets are multiples of 8.
WPAD = 256
LW_ROWS = 3 * EMBED + MLP_HIDDEN          # wqkv(64) + wproj(64) + w1(64) + w2(256)


def w_offsets(l):
    base = l * LW_ROWS
    return {"wqkv": base,
            "wproj": base + EMBED,
            "w1": base + 2 * EMBED,
            "w2": base + 3 * EMBED}


PATCHW_OFF = LAYERS * LW_ROWS             # patch-embed weight (CPP, D)
HEADW_OFF = PATCHW_OFF + CPP              # head weight (D, 128)
W_ROWS = HEADW_OFF + EMBED

# Vector slab: (V_ROWS, VPAD) f32.  Rows 0..BS-1 hold the additive
# (cls | pos | conv-bias) fold; the rest are one bias / LN vector per row.
VPAD = 256
ADD_OFF = 0
VL_ROWS = 8
_VNAMES = ["ln1_w", "ln1_b", "bqkv", "bproj", "ln2_w", "ln2_b", "b1", "b2"]


def v_offsets(l):
    base = BS + l * VL_ROWS
    return {n: base + i for i, n in enumerate(_VNAMES)}


FLN_W_OFF = BS + LAYERS * VL_ROWS
FLN_B_OFF = FLN_W_OFF + 1
HEADB_OFF = FLN_W_OFF + 2
V_ROWS = FLN_W_OFF + 3


# ----------------------------- kernel helpers -----------------------------
def _layernorm(x, w, b):
    # x: (N, D); w, b: (1, D).  Matches torch.nn.LayerNorm (biased variance).
    mu = jnp.mean(x, axis=-1, keepdims=True)
    var = jnp.mean((x - mu) ** 2, axis=-1, keepdims=True)
    return (x - mu) * jax.lax.rsqrt(var + LN_EPS) * w + b


def _gelu_exact(x):
    # torch.nn.GELU default = exact (erf) formulation.
    return 0.5 * x * (1.0 + jax.lax.erf(x * _INV_SQRT2))


# ----------------------------- fused ViT kernel -----------------------------
def vit_kernel(tok_ref, w_ref, v_ref, out_ref):

    def vrow(r, width):                 # one bias / LN vector -> (1, width)
        return v_ref[r:r + 1, 0:width]

    def wmat(r, rows, cols):            # one weight matrix -> (rows, cols)
        return w_ref[r:r + rows, 0:cols]

    # ---- patch embedding (cls rows of tok are zero) + additive fold ----
    x = jnp.dot(tok_ref[...], wmat(PATCHW_OFF, CPP, EMBED),
                preferred_element_type=jnp.float32)
    x = x + v_ref[ADD_OFF:ADD_OFF + BS, 0:EMBED]          # (BS, D)

    for l in range(LAYERS):
        wo = w_offsets(l)
        vo = v_offsets(l)

        # ---- multi-head self-attention ----
        h = _layernorm(x, vrow(vo["ln1_w"], EMBED), vrow(vo["ln1_b"], EMBED))
        # ONE dense QKV matmul over the whole (BS, D) slab.
        qkv = jnp.dot(h, wmat(wo["wqkv"], EMBED, 3 * EMBED),
                      preferred_element_type=jnp.float32)
        qkv = qkv + vrow(vo["bqkv"], 3 * EMBED)            # (BS, 3D)

        # Gather per-(image, head) slices into a single leading batch dim.
        def heads(col0):
            return jnp.stack(
                [qkv[b * SEQ:(b + 1) * SEQ,
                     col0 + hh * HEAD_DIM: col0 + (hh + 1) * HEAD_DIM]
                 for b in range(B) for hh in range(HEADS)], axis=0)

        qg = heads(0)                                      # (B*H, SEQ, hd)
        kg = heads(EMBED)
        vg = heads(2 * EMBED)

        s = jnp.einsum("gqe,gke->gqk", qg, kg,
                       preferred_element_type=jnp.float32) * _ATTN_SCALE
        s = s - jnp.max(s, axis=-1, keepdims=True)
        p = jnp.exp(s)
        p = p * pl.reciprocal(jnp.sum(p, axis=-1, keepdims=True), approx=True)
        o = jnp.einsum("gqk,gke->gqe", p, vg,
                       preferred_element_type=jnp.float32)  # (B*H, SEQ, hd)

        # (B*H, SEQ, hd) -> (BS, D): lane-concat heads, row-concat images.
        o2 = jnp.concatenate(
            [jnp.concatenate([o[b * HEADS + hh] for hh in range(HEADS)], axis=1)
             for b in range(B)], axis=0)

        # ONE K=64 output-projection matmul (== concat + matmul).
        attn = jnp.dot(o2, wmat(wo["wproj"], EMBED, EMBED),
                       preferred_element_type=jnp.float32)
        x = x + attn + vrow(vo["bproj"], EMBED)

        # ---- MLP ----
        h2 = _layernorm(x, vrow(vo["ln2_w"], EMBED), vrow(vo["ln2_b"], EMBED))
        m = jnp.dot(h2, wmat(wo["w1"], EMBED, MLP_HIDDEN),
                    preferred_element_type=jnp.float32) + vrow(vo["b1"], MLP_HIDDEN)
        m = _gelu_exact(m)
        m = jnp.dot(m, wmat(wo["w2"], MLP_HIDDEN, EMBED),
                    preferred_element_type=jnp.float32) + vrow(vo["b2"], EMBED)
        x = x + m

    # ---- final LayerNorm + classification head on the cls rows ----
    cls = jnp.concatenate([x[b * SEQ:b * SEQ + 1, :] for b in range(B)], axis=0)
    hc = _layernorm(cls, vrow(FLN_W_OFF, EMBED), vrow(FLN_B_OFF, EMBED))
    logits = jnp.dot(hc, wmat(HEADW_OFF, EMBED, NUM_CLASSES_PAD),
                     preferred_element_type=jnp.float32)
    out_ref[...] = logits + vrow(HEADB_OFF, NUM_CLASSES_PAD)   # one (B,128) store


# ----------------------------- pallas wrapper -----------------------------
def _vmem_spec(shape):
    nd = len(shape)
    return pl.BlockSpec(shape, lambda *_: (0,) * nd)


@jax.jit
def vit_forward(x_nchw, params):
    # x_nchw: (B, C, H, W) float32
    b, c, hgt, wdt = x_nchw.shape
    hp, wp = hgt // PATCH, wdt // PATCH

    # patch extraction + zero "cls" rows, batch folded into rows (layout glue)
    patches = x_nchw.reshape(b, c, hp, PATCH, wp, PATCH)
    patches = patches.transpose(0, 2, 4, 1, 3, 5)
    patches = patches.reshape(b, hp * wp, c * PATCH * PATCH)
    tok = jnp.concatenate(
        [jnp.zeros((b, 1, patches.shape[-1]), jnp.float32), patches], axis=1)
    tok = tok.reshape(b * SEQ, CPP)                          # (BS, CPP)

    args = (tok, params["wbuf"], params["vbuf"])             # 3 entry DMAs

    logits_pad = pl.pallas_call(
        vit_kernel,
        out_shape=jax.ShapeDtypeStruct((b, NUM_CLASSES_PAD), jnp.float32),
        in_specs=[_vmem_spec(a.shape) for a in args],
        out_specs=_vmem_spec((b, NUM_CLASSES_PAD)),
        compiler_params=pltpu.CompilerParams(vmem_limit_bytes=32 * 1024 * 1024),
    )(*args)
    return logits_pad[:, :NUM_CLASSES]


# ----------------------------- parameters -----------------------------
def init_params(key):
    ks = iter(jax.random.split(key, 64))

    def rnd(shape, std=0.02):
        return jax.random.normal(next(ks), shape, jnp.float32) * std

    def put(buf, r, mat):
        rows, cols = mat.shape
        return buf.at[r:r + rows, 0:cols].set(mat)

    # patch embedding: conv weight (D, C, P, P) -> matmul weight (C*P*P, D)
    conv_w = rnd((EMBED, C_IN, PATCH, PATCH))
    conv_b = rnd((EMBED,), std=0.01)
    patch_w = conv_w.reshape(EMBED, CPP).T                    # (CPP, D)

    cls_token = rnd((1, 1, EMBED))
    pos_enc = rnd((1, SEQ, EMBED))
    # exact fold: row 0 = pos[0] + cls (zero input row, no conv bias);
    #             rows 1.. = pos[i] + conv bias.  Tiled over the batch.
    add_seq = jnp.concatenate(
        [pos_enc[0, :1] + cls_token[0],
         pos_enc[0, 1:] + conv_b[None, :]], axis=0)           # (SEQ, D)
    add_bs = jnp.tile(add_seq, (B, 1))                        # (BS, D)

    # per-layer weights (torch layouts transposed for x @ W.T convention)
    layers = []
    for _ in range(LAYERS):
        wqkv_t = rnd((3 * EMBED, EMBED))                      # torch (3D, D)
        bqkv_t = rnd((3 * EMBED,), std=0.01)
        wproj_t = rnd((EMBED, EMBED))                         # torch (D, D)
        bproj_t = rnd((EMBED,), std=0.01)
        w1_t = rnd((MLP_HIDDEN, EMBED))
        b1_t = rnd((MLP_HIDDEN,), std=0.01)
        w2_t = rnd((EMBED, MLP_HIDDEN))
        b2_t = rnd((EMBED,), std=0.01)
        layers.append(dict(
            ln1_w=jnp.ones((EMBED,), jnp.float32),
            ln1_b=jnp.zeros((EMBED,), jnp.float32),
            wqkv=wqkv_t.T, bqkv=bqkv_t,                       # (D, 3D), (3D,)
            wproj=wproj_t.T, bproj=bproj_t,                   # (D, D), (D,)
            ln2_w=jnp.ones((EMBED,), jnp.float32),
            ln2_b=jnp.zeros((EMBED,), jnp.float32),
            w1=w1_t.T, b1=b1_t,                               # (D, HID), (HID,)
            w2=w2_t.T, b2=b2_t))                              # (HID, D), (D,)

    final_ln_w = jnp.ones((EMBED,), jnp.float32)
    final_ln_b = jnp.zeros((EMBED,), jnp.float32)
    head_w = rnd((NUM_CLASSES, EMBED)).T                      # (D, NC)
    head_b = jnp.zeros((NUM_CLASSES,), jnp.float32)
    pad = NUM_CLASSES_PAD - NUM_CLASSES
    head_w_pad = jnp.pad(head_w, ((0, 0), (0, pad)))          # (D, 128)
    head_b_pad = jnp.pad(head_b, (0, pad))                    # (128,)

    # ---- pack the weight slab ----
    wbuf = jnp.zeros((W_ROWS, WPAD), jnp.float32)
    for l, L in enumerate(layers):
        wo = w_offsets(l)
        wbuf = put(wbuf, wo["wqkv"], L["wqkv"])
        wbuf = put(wbuf, wo["wproj"], L["wproj"])
        wbuf = put(wbuf, wo["w1"], L["w1"])
        wbuf = put(wbuf, wo["w2"], L["w2"])
    wbuf = put(wbuf, PATCHW_OFF, patch_w)
    wbuf = put(wbuf, HEADW_OFF, head_w_pad)

    # ---- pack the bias / LN-vector slab ----
    vbuf = jnp.zeros((V_ROWS, VPAD), jnp.float32)
    vbuf = put(vbuf, ADD_OFF, add_bs)
    for l, L in enumerate(layers):
        vo = v_offsets(l)
        for name in _VNAMES:
            vbuf = put(vbuf, vo[name], L[name][None, :])
    vbuf = put(vbuf, FLN_W_OFF, final_ln_w[None, :])
    vbuf = put(vbuf, FLN_B_OFF, final_ln_b[None, :])
    vbuf = put(vbuf, HEADB_OFF, head_b_pad[None, :])

    return {"wbuf": wbuf, "vbuf": vbuf}


# ----------------------------- main -----------------------------
if __name__ == "__main__":
    key = jax.random.PRNGKey(0)
    pkey, xkey = jax.random.split(key)
    params = init_params(pkey)
    x = jax.random.normal(xkey, (B, C_IN, IMG, IMG), jnp.float32)

    logits = vit_forward(x, params)
    jax.block_until_ready(logits)
    assert logits.shape == (B, NUM_CLASSES)
    assert bool(jnp.all(jnp.isfinite(logits)))
    print("KERNEL_OK")
</pallas_src>

<mosaic_0001>
module attributes {stable_mosaic.version = 11 : i64} {
  func.func @vit_kernel(%arg0: memref<10x192xf32, #tpu.memory_space<vmem>>, %arg1: memref<1152x256xf32, #tpu.memory_space<vmem>>, %arg2: memref<29x256xf32, #tpu.memory_space<vmem>>, %arg3: memref<2x128xf32, #tpu.memory_space<vmem>>) attributes {dimension_semantics = [], scalar_prefetch = 0 : i64, scratch_operands = 0 : i64, tpu.core_type = #tpu.core_type<tc>} {
    %c0 = arith.constant 0 : index
    %c0_0 = arith.constant 0 : index
    %0 = vector.load %arg0[%c0, %c0_0] : memref<10x192xf32, #tpu.memory_space<vmem>>, vector<10x192xf32>
    %c896 = arith.constant 896 : index
    %c0_1 = arith.constant 0 : index
    %1 = vector.load %arg1[%c896, %c0_1] : memref<1152x256xf32, #tpu.memory_space<vmem>>, vector<192x64xf32>
    %cst = arith.constant dense<0.000000e+00> : vector<10x64xf32>
    %2 = tpu.matmul %0, %1, %cst {dimension_numbers = #tpu.dot_dimension_numbers<[1], [0], [0], [1], [0, 0, 1, 1], [], []>} : vector<10x192xf32>, vector<192x64xf32>, vector<10x64xf32> -> vector<10x64xf32>
    %c0_2 = arith.constant 0 : index
    %c0_3 = arith.constant 0 : index
    %3 = vector.load %arg2[%c0_2, %c0_3] : memref<29x256xf32, #tpu.memory_space<vmem>>, vector<10x64xf32>
    %4 = arith.addf %2, %3 : vector<10x64xf32>
    %c10 = arith.constant 10 : index
    %c0_4 = arith.constant 0 : index
    %5 = vector.load %arg2[%c10, %c0_4] : memref<29x256xf32, #tpu.memory_space<vmem>>, vector<1x64xf32>
    %c11 = arith.constant 11 : index
    %c0_5 = arith.constant 0 : index
    %6 = vector.load %arg2[%c11, %c0_5] : memref<29x256xf32, #tpu.memory_space<vmem>>, vector<1x64xf32>
    %cst_6 = arith.constant dense<0.000000e+00> : vector<10xf32>
    %7 = vector.multi_reduction <add>, %4, %cst_6 [1] : vector<10x64xf32> to vector<10xf32>
    %8 = vector.shape_cast %7 : vector<10xf32> to vector<10x1xf32>
    %cst_7 = arith.constant 6.400000e+01 : f32
    %9 = vector.broadcast %cst_7 : f32 to vector<10x1xf32>
    %10 = arith.divf %8, %9 : vector<10x1xf32>
    %11 = vector.broadcast %10 : vector<10x1xf32> to vector<10x64xf32>
    %12 = arith.subf %4, %11 : vector<10x64xf32>
    %13 = arith.mulf %12, %12 : vector<10x64xf32>
    %cst_8 = arith.constant dense<0.000000e+00> : vector<10xf32>
    %14 = vector.multi_reduction <add>, %13, %cst_8 [1] : vector<10x64xf32> to vector<10xf32>
    %15 = vector.shape_cast %14 : vector<10xf32> to vector<10x1xf32>
    %cst_9 = arith.constant 6.400000e+01 : f32
    %16 = vector.broadcast %cst_9 : f32 to vector<10x1xf32>
    %17 = arith.divf %15, %16 : vector<10x1xf32>
    %18 = vector.broadcast %10 : vector<10x1xf32> to vector<10x64xf32>
    %19 = arith.subf %4, %18 : vector<10x64xf32>
    %cst_10 = arith.constant 9.99999974E-6 : f32
    %20 = vector.broadcast %cst_10 : f32 to vector<10x1xf32>
    %21 = arith.addf %17, %20 : vector<10x1xf32>
    %22 = math.rsqrt %21 : vector<10x1xf32>
    %23 = vector.broadcast %22 : vector<10x1xf32> to vector<10x64xf32>
    %24 = arith.mulf %19, %23 : vector<10x64xf32>
    %25 = vector.broadcast %5 : vector<1x64xf32> to vector<10x64xf32>
    %26 = arith.mulf %24, %25 : vector<10x64xf32>
    %27 = vector.broadcast %6 : vector<1x64xf32> to vector<10x64xf32>
    %28 = arith.addf %26, %27 : vector<10x64xf32>
    %c0_11 = arith.constant 0 : index
    %c0_12 = arith.constant 0 : index
    %29 = vector.load %arg1[%c0_11, %c0_12] : memref<1152x256xf32, #tpu.memory_space<vmem>>, vector<64x192xf32>
    %cst_13 = arith.constant dense<0.000000e+00> : vector<10x192xf32>
    %30 = tpu.matmul %28, %29, %cst_13 {dimension_numbers = #tpu.dot_dimension_numbers<[1], [0], [0], [1], [0, 0, 1, 1], [], []>} : vector<10x64xf32>, vector<64x192xf32>, vector<10x192xf32> -> vector<10x192xf32>
    %c12 = arith.constant 12 : index
    %c0_14 = arith.constant 0 : index
    %31 = vector.load %arg2[%c12, %c0_14] : memref<29x256xf32, #tpu.memory_space<vmem>>, vector<1x192xf32>
    %32 = vector.broadcast %31 : vector<1x192xf32> to vector<10x192xf32>
    %33 = arith.addf %30, %32 : vector<10x192xf32>
    %34 = vector.extract_strided_slice %33 {offsets = [0, 0], sizes = [5, 16], strides = [1, 1]} : vector<10x192xf32> to vector<5x16xf32>
    %35 = vector.extract_strided_slice %33 {offsets = [0, 16], sizes = [5, 16], strides = [1, 1]} : vector<10x192xf32> to vector<5x16xf32>
    %36 = vector.extract_strided_slice %33 {offsets = [0, 32], sizes = [5, 16], strides = [1, 1]} : vector<10x192xf32> to vector<5x16xf32>
    %37 = vector.extract_strided_slice %33 {offsets = [0, 48], sizes = [5, 16], strides = [1, 1]} : vector<10x192xf32> to vector<5x16xf32>
    %38 = vector.extract_strided_slice %33 {offsets = [5, 0], sizes = [5, 16], strides = [1, 1]} : vector<10x192xf32> to vector<5x16xf32>
    %39 = vector.extract_strided_slice %33 {offsets = [5, 16], sizes = [5, 16], strides = [1, 1]} : vector<10x192xf32> to vector<5x16xf32>
    %40 = vector.extract_strided_slice %33 {offsets = [5, 32], sizes = [5, 16], strides = [1, 1]} : vector<10x192xf32> to vector<5x16xf32>
    %41 = vector.extract_strided_slice %33 {offsets = [5, 48], sizes = [5, 16], strides = [1, 1]} : vector<10x192xf32> to vector<5x16xf32>
    %42 = vector.shape_cast %34 : vector<5x16xf32> to vector<1x5x16xf32>
    %43 = vector.shape_cast %35 : vector<5x16xf32> to vector<1x5x16xf32>
    %44 = vector.shape_cast %36 : vector<5x16xf32> to vector<1x5x16xf32>
    %45 = vector.shape_cast %37 : vector<5x16xf32> to vector<1x5x16xf32>
    %46 = vector.shape_cast %38 : vector<5x16xf32> to vector<1x5x16xf32>
    %47 = vector.shape_cast %39 : vector<5x16xf32> to vector<1x5x16xf32>
    %48 = vector.shape_cast %40 : vector<5x16xf32> to vector<1x5x16xf32>
    %49 = vector.shape_cast %41 : vector<5x16xf32> to vector<1x5x16xf32>
    %50 = tpu.concatenate %42, %43, %44, %45, %46, %47, %48, %49 in 0 : vector<1x5x16xf32>, vector<1x5x16xf32>, vector<1x5x16xf32>, vector<1x5x16xf32>, vector<1x5x16xf32>, vector<1x5x16xf32>, vector<1x5x16xf32>, vector<1x5x16xf32> -> vector<8x5x16xf32>
    %51 = vector.extract_strided_slice %33 {offsets = [0, 64], sizes = [5, 16], strides = [1, 1]} : vector<10x192xf32> to vector<5x16xf32>
    %52 = vector.extract_strided_slice %33 {offsets = [0, 80], sizes = [5, 16], strides = [1, 1]} : vector<10x192xf32> to vector<5x16xf32>
    %53 = vector.extract_strided_slice %33 {offsets = [0, 96], sizes = [5, 16], strides = [1, 1]} : vector<10x192xf32> to vector<5x16xf32>
    %54 = vector.extract_strided_slice %33 {offsets = [0, 112], sizes = [5, 16], strides = [1, 1]} : vector<10x192xf32> to vector<5x16xf32>
    %55 = vector.extract_strided_slice %33 {offsets = [5, 64], sizes = [5, 16], strides = [1, 1]} : vector<10x192xf32> to vector<5x16xf32>
    %56 = vector.extract_strided_slice %33 {offsets = [5, 80], sizes = [5, 16], strides = [1, 1]} : vector<10x192xf32> to vector<5x16xf32>
    %57 = vector.extract_strided_slice %33 {offsets = [5, 96], sizes = [5, 16], strides = [1, 1]} : vector<10x192xf32> to vector<5x16xf32>
    %58 = vector.extract_strided_slice %33 {offsets = [5, 112], sizes = [5, 16], strides = [1, 1]} : vector<10x192xf32> to vector<5x16xf32>
    %59 = vector.shape_cast %51 : vector<5x16xf32> to vector<1x5x16xf32>
    %60 = vector.shape_cast %52 : vector<5x16xf32> to vector<1x5x16xf32>
    %61 = vector.shape_cast %53 : vector<5x16xf32> to vector<1x5x16xf32>
    %62 = vector.shape_cast %54 : vector<5x16xf32> to vector<1x5x16xf32>
    %63 = vector.shape_cast %55 : vector<5x16xf32> to vector<1x5x16xf32>
    %64 = vector.shape_cast %56 : vector<5x16xf32> to vector<1x5x16xf32>
    %65 = vector.shape_cast %57 : vector<5x16xf32> to vector<1x5x16xf32>
    %66 = vector.shape_cast %58 : vector<5x16xf32> to vector<1x5x16xf32>
    %67 = tpu.concatenate %59, %60, %61, %62, %63, %64, %65, %66 in 0 : vector<1x5x16xf32>, vector<1x5x16xf32>, vector<1x5x16xf32>, vector<1x5x16xf32>, vector<1x5x16xf32>, vector<1x5x16xf32>, vector<1x5x16xf32>, vector<1x5x16xf32> -> vector<8x5x16xf32>
    %68 = vector.extract_strided_slice %33 {offsets = [0, 128], sizes = [5, 16], strides = [1, 1]} : vector<10x192xf32> to vector<5x16xf32>
    %69 = vector.extract_strided_slice %33 {offsets = [0, 144], sizes = [5, 16], strides = [1, 1]} : vector<10x192xf32> to vector<5x16xf32>
    %70 = vector.extract_strided_slice %33 {offsets = [0, 160], sizes = [5, 16], strides = [1, 1]} : vector<10x192xf32> to vector<5x16xf32>
    %71 = vector.extract_strided_slice %33 {offsets = [0, 176], sizes = [5, 16], strides = [1, 1]} : vector<10x192xf32> to vector<5x16xf32>
    %72 = vector.extract_strided_slice %33 {offsets = [5, 128], sizes = [5, 16], strides = [1, 1]} : vector<10x192xf32> to vector<5x16xf32>
    %73 = vector.extract_strided_slice %33 {offsets = [5, 144], sizes = [5, 16], strides = [1, 1]} : vector<10x192xf32> to vector<5x16xf32>
    %74 = vector.extract_strided_slice %33 {offsets = [5, 160], sizes = [5, 16], strides = [1, 1]} : vector<10x192xf32> to vector<5x16xf32>
    %75 = vector.extract_strided_slice %33 {offsets = [5, 176], sizes = [5, 16], strides = [1, 1]} : vector<10x192xf32> to vector<5x16xf32>
    %76 = vector.shape_cast %68 : vector<5x16xf32> to vector<1x5x16xf32>
    %77 = vector.shape_cast %69 : vector<5x16xf32> to vector<1x5x16xf32>
    %78 = vector.shape_cast %70 : vector<5x16xf32> to vector<1x5x16xf32>
    %79 = vector.shape_cast %71 : vector<5x16xf32> to vector<1x5x16xf32>
    %80 = vector.shape_cast %72 : vector<5x16xf32> to vector<1x5x16xf32>
    %81 = vector.shape_cast %73 : vector<5x16xf32> to vector<1x5x16xf32>
    %82 = vector.shape_cast %74 : vector<5x16xf32> to vector<1x5x16xf32>
    %83 = vector.shape_cast %75 : vector<5x16xf32> to vector<1x5x16xf32>
    %84 = tpu.concatenate %76, %77, %78, %79, %80, %81, %82, %83 in 0 : vector<1x5x16xf32>, vector<1x5x16xf32>, vector<1x5x16xf32>, vector<1x5x16xf32>, vector<1x5x16xf32>, vector<1x5x16xf32>, vector<1x5x16xf32>, vector<1x5x16xf32> -> vector<8x5x16xf32>
    "tpu.trace_start"() <{level = 10 : i32, message = "gqe,gke->gqk"}> : () -> ()
    %cst_15 = arith.constant dense<0.000000e+00> : vector<8x5x5xf32>
    %85 = tpu.matmul %50, %67, %cst_15 {dimension_numbers = #tpu.dot_dimension_numbers<[2], [2], [1], [1], [0, 0, 0, 1, 1, 1], [0], [0]>} : vector<8x5x16xf32>, vector<8x5x16xf32>, vector<8x5x5xf32> -> vector<8x5x5xf32>
    "tpu.trace_stop"() : () -> ()
    %cst_16 = arith.constant 2.500000e-01 : f32
    %86 = vector.broadcast %cst_16 : f32 to vector<8x5x5xf32>
    %87 = arith.mulf %85, %86 : vector<8x5x5xf32>
    %cst_17 = arith.constant dense<0xFF800000> : vector<8x5xf32>
    %88 = vector.multi_reduction <maximumf>, %87, %cst_17 [2] : vector<8x5x5xf32> to vector<8x5xf32>
    %89 = vector.shape_cast %88 : vector<8x5xf32> to vector<8x5x1xf32>
    %90 = vector.broadcast %89 : vector<8x5x1xf32> to vector<8x5x5xf32>
    %91 = arith.subf %87, %90 : vector<8x5x5xf32>
    %92 = math.exp %91 : vector<8x5x5xf32>
    %cst_18 = arith.constant dense<0.000000e+00> : vector<8x5xf32>
    %93 = vector.multi_reduction <add>, %92, %cst_18 [2] : vector<8x5x5xf32> to vector<8x5xf32>
    %94 = vector.shape_cast %93 : vector<8x5xf32> to vector<8x5x1xf32>
    %95 = tpu.reciprocal %94 {approx = true} : vector<8x5x1xf32> -> vector<8x5x1xf32>
    %96 = vector.broadcast %95 : vector<8x5x1xf32> to vector<8x5x5xf32>
    %97 = arith.mulf %92, %96 : vector<8x5x5xf32>
    "tpu.trace_start"() <{level = 10 : i32, message = "gqk,gke->gqe"}> : () -> ()
    %cst_19 = arith.constant dense<0.000000e+00> : vector<8x5x16xf32>
    %98 = tpu.matmul %97, %84, %cst_19 {dimension_numbers = #tpu.dot_dimension_numbers<[2], [1], [1], [2], [0, 0, 0, 1, 1, 2], [0], [0]>} : vector<8x5x5xf32>, vector<8x5x16xf32>, vector<8x5x16xf32> -> vector<8x5x16xf32>
    "tpu.trace_stop"() : () -> ()
    %99 = vector.extract_strided_slice %98 {offsets = [0, 0, 0], sizes = [1, 5, 16], strides = [1, 1, 1]} : vector<8x5x16xf32> to vector<1x5x16xf32>
    %100 = vector.shape_cast %99 : vector<1x5x16xf32> to vector<5x16xf32>
    %101 = vector.extract_strided_slice %98 {offsets = [1, 0, 0], sizes = [1, 5, 16], strides = [1, 1, 1]} : vector<8x5x16xf32> to vector<1x5x16xf32>
    %102 = vector.shape_cast %101 : vector<1x5x16xf32> to vector<5x16xf32>
    %103 = vector.extract_strided_slice %98 {offsets = [2, 0, 0], sizes = [1, 5, 16], strides = [1, 1, 1]} : vector<8x5x16xf32> to vector<1x5x16xf32>
    %104 = vector.shape_cast %103 : vector<1x5x16xf32> to vector<5x16xf32>
    %105 = vector.extract_strided_slice %98 {offsets = [3, 0, 0], sizes = [1, 5, 16], strides = [1, 1, 1]} : vector<8x5x16xf32> to vector<1x5x16xf32>
    %106 = vector.shape_cast %105 : vector<1x5x16xf32> to vector<5x16xf32>
    %107 = tpu.concatenate %100, %102, %104, %106 in 1 : vector<5x16xf32>, vector<5x16xf32>, vector<5x16xf32>, vector<5x16xf32> -> vector<5x64xf32>
    %108 = vector.extract_strided_slice %98 {offsets = [4, 0, 0], sizes = [1, 5, 16], strides = [1, 1, 1]} : vector<8x5x16xf32> to vector<1x5x16xf32>
    %109 = vector.shape_cast %108 : vector<1x5x16xf32> to vector<5x16xf32>
    %110 = vector.extract_strided_slice %98 {offsets = [5, 0, 0], sizes = [1, 5, 16], strides = [1, 1, 1]} : vector<8x5x16xf32> to vector<1x5x16xf32>
    %111 = vector.shape_cast %110 : vector<1x5x16xf32> to vector<5x16xf32>
    %112 = vector.extract_strided_slice %98 {offsets = [6, 0, 0], sizes = [1, 5, 16], strides = [1, 1, 1]} : vector<8x5x16xf32> to vector<1x5x16xf32>
    %113 = vector.shape_cast %112 : vector<1x5x16xf32> to vector<5x16xf32>
    %114 = vector.extract_strided_slice %98 {offsets = [7, 0, 0], sizes = [1, 5, 16], strides = [1, 1, 1]} : vector<8x5x16xf32> to vector<1x5x16xf32>
    %115 = vector.shape_cast %114 : vector<1x5x16xf32> to vector<5x16xf32>
    %116 = tpu.concatenate %109, %111, %113, %115 in 1 : vector<5x16xf32>, vector<5x16xf32>, vector<5x16xf32>, vector<5x16xf32> -> vector<5x64xf32>
    %117 = tpu.concatenate %107, %116 in 0 : vector<5x64xf32>, vector<5x64xf32> -> vector<10x64xf32>
    %c64 = arith.constant 64 : index
    %c0_20 = arith.constant 0 : index
    %118 = vector.load %arg1[%c64, %c0_20] : memref<1152x256xf32, #tpu.memory_space<vmem>>, vector<64x64xf32>
    %cst_21 = arith.constant dense<0.000000e+00> : vector<10x64xf32>
    %119 = tpu.matmul %117, %118, %cst_21 {dimension_numbers = #tpu.dot_dimension_numbers<[1], [0], [0], [1], [0, 0, 1, 1], [], []>} : vector<10x64xf32>, vector<64x64xf32>, vector<10x64xf32> -> vector<10x64xf32>
    %120 = arith.addf %4, %119 : vector<10x64xf32>
    %c13 = arith.constant 13 : index
    %c0_22 = arith.constant 0 : index
    %121 = vector.load %arg2[%c13, %c0_22] : memref<29x256xf32, #tpu.memory_space<vmem>>, vector<1x64xf32>
    %122 = vector.broadcast %121 : vector<1x64xf32> to vector<10x64xf32>
    %123 = arith.addf %120, %122 : vector<10x64xf32>
    %c14 = arith.constant 14 : index
    %c0_23 = arith.constant 0 : index
    %124 = vector.load %arg2[%c14, %c0_23] : memref<29x256xf32, #tpu.memory_space<vmem>>, vector<1x64xf32>
    %c15 = arith.constant 15 : index
    %c0_24 = arith.constant 0 : index
    %125 = vector.load %arg2[%c15, %c0_24] : memref<29x256xf32, #tpu.memory_space<vmem>>, vector<1x64xf32>
    %cst_25 = arith.constant dense<0.000000e+00> : vector<10xf32>
    %126 = vector.multi_reduction <add>, %123, %cst_25 [1] : vector<10x64xf32> to vector<10xf32>
    %127 = vector.shape_cast %126 : vector<10xf32> to vector<10x1xf32>
    %cst_26 = arith.constant 6.400000e+01 : f32
    %128 = vector.broadcast %cst_26 : f32 to vector<10x1xf32>
    %129 = arith.divf %127, %128 : vector<10x1xf32>
    %130 = vector.broadcast %129 : vector<10x1xf32> to vector<10x64xf32>
    %131 = arith.subf %123, %130 : vector<10x64xf32>
    %132 = arith.mulf %131, %131 : vector<10x64xf32>
    %cst_27 = arith.constant dense<0.000000e+00> : vector<10xf32>
    %133 = vector.multi_reduction <add>, %132, %cst_27 [1] : vector<10x64xf32> to vector<10xf32>
    %134 = vector.shape_cast %133 : vector<10xf32> to vector<10x1xf32>
    %cst_28 = arith.constant 6.400000e+01 : f32
    %135 = vector.broadcast %cst_28 : f32 to vector<10x1xf32>
    %136 = arith.divf %134, %135 : vector<10x1xf32>
    %137 = vector.broadcast %129 : vector<10x1xf32> to vector<10x64xf32>
    %138 = arith.subf %123, %137 : vector<10x64xf32>
    %cst_29 = arith.constant 9.99999974E-6 : f32
    %139 = vector.broadcast %cst_29 : f32 to vector<10x1xf32>
    %140 = arith.addf %136, %139 : vector<10x1xf32>
    %141 = math.rsqrt %140 : vector<10x1xf32>
    %142 = vector.broadcast %141 : vector<10x1xf32> to vector<10x64xf32>
    %143 = arith.mulf %138, %142 : vector<10x64xf32>
    %144 = vector.broadcast %124 : vector<1x64xf32> to vector<10x64xf32>
    %145 = arith.mulf %143, %144 : vector<10x64xf32>
    %146 = vector.broadcast %125 : vector<1x64xf32> to vector<10x64xf32>
    %147 = arith.addf %145, %146 : vector<10x64xf32>
    %c128 = arith.constant 128 : index
    %c0_30 = arith.constant 0 : index
    %148 = vector.load %arg1[%c128, %c0_30] : memref<1152x256xf32, #tpu.memory_space<vmem>>, vector<64x256xf32>
    %cst_31 = arith.constant dense<0.000000e+00> : vector<10x256xf32>
    %149 = tpu.matmul %147, %148, %cst_31 {dimension_numbers = #tpu.dot_dimension_numbers<[1], [0], [0], [1], [0, 0, 1, 1], [], []>} : vector<10x64xf32>, vector<64x256xf32>, vector<10x256xf32> -> vector<10x256xf32>
    %c16 = arith.constant 16 : index
    %c0_32 = arith.constant 0 : index
    %150 = vector.load %arg2[%c16, %c0_32] : memref<29x256xf32, #tpu.memory_space<vmem>>, vector<1x256xf32>
    %151 = vector.broadcast %150 : vector<1x256xf32> to vector<10x256xf32>
    %152 = arith.addf %149, %151 : vector<10x256xf32>
    %cst_33 = arith.constant 5.000000e-01 : f32
    %153 = vector.broadcast %cst_33 : f32 to vector<10x256xf32>
    %154 = arith.mulf %153, %152 : vector<10x256xf32>
    %cst_34 = arith.constant 0.707106769 : f32
    %155 = vector.broadcast %cst_34 : f32 to vector<10x256xf32>
    %156 = arith.mulf %152, %155 : vector<10x256xf32>
    %157 = math.erf %156 : vector<10x256xf32>
    %cst_35 = arith.constant 1.000000e+00 : f32
    %158 = vector.broadcast %cst_35 : f32 to vector<10x256xf32>
    %159 = arith.addf %158, %157 : vector<10x256xf32>
    %160 = arith.mulf %154, %159 : vector<10x256xf32>
    %c192 = arith.constant 192 : index
    %c0_36 = arith.constant 0 : index
    %161 = vector.load %arg1[%c192, %c0_36] : memref<1152x256xf32, #tpu.memory_space<vmem>>, vector<256x64xf32>
    %cst_37 = arith.constant dense<0.000000e+00> : vector<10x64xf32>
    %162 = tpu.matmul %160, %161, %cst_37 {dimension_numbers = #tpu.dot_dimension_numbers<[1], [0], [0], [1], [0, 0, 1, 1], [], []>} : vector<10x256xf32>, vector<256x64xf32>, vector<10x64xf32> -> vector<10x64xf32>
    %c17 = arith.constant 17 : index
    %c0_38 = arith.constant 0 : index
    %163 = vector.load %arg2[%c17, %c0_38] : memref<29x256xf32, #tpu.memory_space<vmem>>, vector<1x64xf32>
    %164 = vector.broadcast %163 : vector<1x64xf32> to vector<10x64xf32>
    %165 = arith.addf %162, %164 : vector<10x64xf32>
    %166 = arith.addf %123, %165 : vector<10x64xf32>
    %c18 = arith.constant 18 : index
    %c0_39 = arith.constant 0 : index
    %167 = vector.load %arg2[%c18, %c0_39] : memref<29x256xf32, #tpu.memory_space<vmem>>, vector<1x64xf32>
    %c19 = arith.constant 19 : index
    %c0_40 = arith.constant 0 : index
    %168 = vector.load %arg2[%c19, %c0_40] : memref<29x256xf32, #tpu.memory_space<vmem>>, vector<1x64xf32>
    %cst_41 = arith.constant dense<0.000000e+00> : vector<10xf32>
    %169 = vector.multi_reduction <add>, %166, %cst_41 [1] : vector<10x64xf32> to vector<10xf32>
    %170 = vector.shape_cast %169 : vector<10xf32> to vector<10x1xf32>
    %cst_42 = arith.constant 6.400000e+01 : f32
    %171 = vector.broadcast %cst_42 : f32 to vector<10x1xf32>
    %172 = arith.divf %170, %171 : vector<10x1xf32>
    %173 = vector.broadcast %172 : vector<10x1xf32> to vector<10x64xf32>
    %174 = arith.subf %166, %173 : vector<10x64xf32>
    %175 = arith.mulf %174, %174 : vector<10x64xf32>
    %cst_43 = arith.constant dense<0.000000e+00> : vector<10xf32>
    %176 = vector.multi_reduction <add>, %175, %cst_43 [1] : vector<10x64xf32> to vector<10xf32>
    %177 = vector.shape_cast %176 : vector<10xf32> to vector<10x1xf32>
    %cst_44 = arith.constant 6.400000e+01 : f32
    %178 = vector.broadcast %cst_44 : f32 to vector<10x1xf32>
    %179 = arith.divf %177, %178 : vector<10x1xf32>
    %180 = vector.broadcast %172 : vector<10x1xf32> to vector<10x64xf32>
    %181 = arith.subf %166, %180 : vector<10x64xf32>
    %cst_45 = arith.constant 9.99999974E-6 : f32
    %182 = vector.broadcast %cst_45 : f32 to vector<10x1xf32>
    %183 = arith.addf %179, %182 : vector<10x1xf32>
    %184 = math.rsqrt %183 : vector<10x1xf32>
    %185 = vector.broadcast %184 : vector<10x1xf32> to vector<10x64xf32>
    %186 = arith.mulf %181, %185 : vector<10x64xf32>
    %187 = vector.broadcast %167 : vector<1x64xf32> to vector<10x64xf32>
    %188 = arith.mulf %186, %187 : vector<10x64xf32>
    %189 = vector.broadcast %168 : vector<1x64xf32> to vector<10x64xf32>
    %190 = arith.addf %188, %189 : vector<10x64xf32>
    %c448 = arith.constant 448 : index
    %c0_46 = arith.constant 0 : index
    %191 = vector.load %arg1[%c448, %c0_46] : memref<1152x256xf32, #tpu.memory_space<vmem>>, vector<64x192xf32>
    %cst_47 = arith.constant dense<0.000000e+00> : vector<10x192xf32>
    %192 = tpu.matmul %190, %191, %cst_47 {dimension_numbers = #tpu.dot_dimension_numbers<[1], [0], [0], [1], [0, 0, 1, 1], [], []>} : vector<10x64xf32>, vector<64x192xf32>, vector<10x192xf32> -> vector<10x192xf32>
    %c20 = arith.constant 20 : index
    %c0_48 = arith.constant 0 : index
    %193 = vector.load %arg2[%c20, %c0_48] : memref<29x256xf32, #tpu.memory_space<vmem>>, vector<1x192xf32>
    %194 = vector.broadcast %193 : vector<1x192xf32> to vector<10x192xf32>
    %195 = arith.addf %192, %194 : vector<10x192xf32>
    %196 = vector.extract_strided_slice %195 {offsets = [0, 0], sizes = [5, 16], strides = [1, 1]} : vector<10x192xf32> to vector<5x16xf32>
    %197 = vector.extract_strided_slice %195 {offsets = [0, 16], sizes = [5, 16], strides = [1, 1]} : vector<10x192xf32> to vector<5x16xf32>
    %198 = vector.extract_strided_slice %195 {offsets = [0, 32], sizes = [5, 16], strides = [1, 1]} : vector<10x192xf32> to vector<5x16xf32>
    %199 = vector.extract_strided_slice %195 {offsets = [0, 48], sizes = [5, 16], strides = [1, 1]} : vector<10x192xf32> to vector<5x16xf32>
    %200 = vector.extract_strided_slice %195 {offsets = [5, 0], sizes = [5, 16], strides = [1, 1]} : vector<10x192xf32> to vector<5x16xf32>
    %201 = vector.extract_strided_slice %195 {offsets = [5, 16], sizes = [5, 16], strides = [1, 1]} : vector<10x192xf32> to vector<5x16xf32>
    %202 = vector.extract_strided_slice %195 {offsets = [5, 32], sizes = [5, 16], strides = [1, 1]} : vector<10x192xf32> to vector<5x16xf32>
    %203 = vector.extract_strided_slice %195 {offsets = [5, 48], sizes = [5, 16], strides = [1, 1]} : vector<10x192xf32> to vector<5x16xf32>
    %204 = vector.shape_cast %196 : vector<5x16xf32> to vector<1x5x16xf32>
    %205 = vector.shape_cast %197 : vector<5x16xf32> to vector<1x5x16xf32>
    %206 = vector.shape_cast %198 : vector<5x16xf32> to vector<1x5x16xf32>
    %207 = vector.shape_cast %199 : vector<5x16xf32> to vector<1x5x16xf32>
    %208 = vector.shape_cast %200 : vector<5x16xf32> to vector<1x5x16xf32>
    %209 = vector.shape_cast %201 : vector<5x16xf32> to vector<1x5x16xf32>
    %210 = vector.shape_cast %202 : vector<5x16xf32> to vector<1x5x16xf32>
    %211 = vector.shape_cast %203 : vector<5x16xf32> to vector<1x5x16xf32>
    %212 = tpu.concatenate %204, %205, %206, %207, %208, %209, %210, %211 in 0 : vector<1x5x16xf32>, vector<1x5x16xf32>, vector<1x5x16xf32>, vector<1x5x16xf32>, vector<1x5x16xf32>, vector<1x5x16xf32>, vector<1x5x16xf32>, vector<1x5x16xf32> -> vector<8x5x16xf32>
    %213 = vector.extract_strided_slice %195 {offsets = [0, 64], sizes = [5, 16], strides = [1, 1]} : vector<10x192xf32> to vector<5x16xf32>
    %214 = vector.extract_strided_slice %195 {offsets = [0, 80], sizes = [5, 16], strides = [1, 1]} : vector<10x192xf32> to vector<5x16xf32>
    %215 = vector.extract_strided_slice %195 {offsets = [0, 96], sizes = [5, 16], strides = [1, 1]} : vector<10x192xf32> to vector<5x16xf32>
    %216 = vector.extract_strided_slice %195 {offsets = [0, 112], sizes = [5, 16], strides = [1, 1]} : vector<10x192xf32> to vector<5x16xf32>
    %217 = vector.extract_strided_slice %195 {offsets = [5, 64], sizes = [5, 16], strides = [1, 1]} : vector<10x192xf32> to vector<5x16xf32>
    %218 = vector.extract_strided_slice %195 {offsets = [5, 80], sizes = [5, 16], strides = [1, 1]} : vector<10x192xf32> to vector<5x16xf32>
    %219 = vector.extract_strided_slice %195 {offsets = [5, 96], sizes = [5, 16], strides = [1, 1]} : vector<10x192xf32> to vector<5x16xf32>
    %220 = vector.extract_strided_slice %195 {offsets = [5, 112], sizes = [5, 16], strides = [1, 1]} : vector<10x192xf32> to vector<5x16xf32>
    %221 = vector.shape_cast %213 : vector<5x16xf32> to vector<1x5x16xf32>
    %222 = vector.shape_cast %214 : vector<5x16xf32> to vector<1x5x16xf32>
    %223 = vector.shape_cast %215 : vector<5x16xf32> to vector<1x5x16xf32>
    %224 = vector.shape_cast %216 : vector<5x16xf32> to vector<1x5x16xf32>
    %225 = vector.shape_cast %217 : vector<5x16xf32> to vector<1x5x16xf32>
    %226 = vector.shape_cast %218 : vector<5x16xf32> to vector<1x5x16xf32>
    %227 = vector.shape_cast %219 : vector<5x16xf32> to vector<1x5x16xf32>
    %228 = vector.shape_cast %220 : vector<5x16xf32> to vector<1x5x16xf32>
    %229 = tpu.concatenate %221, %222, %223, %224, %225, %226, %227, %228 in 0 : vector<1x5x16xf32>, vector<1x5x16xf32>, vector<1x5x16xf32>, vector<1x5x16xf32>, vector<1x5x16xf32>, vector<1x5x16xf32>, vector<1x5x16xf32>, vector<1x5x16xf32> -> vector<8x5x16xf32>
    %230 = vector.extract_strided_slice %195 {offsets = [0, 128], sizes = [5, 16], strides = [1, 1]} : vector<10x192xf32> to vector<5x16xf32>
    %231 = vector.extract_strided_slice %195 {offsets = [0, 144], sizes = [5, 16], strides = [1, 1]} : vector<10x192xf32> to vector<5x16xf32>
    %232 = vector.extract_strided_slice %195 {offsets = [0, 160], sizes = [5, 16], strides = [1, 1]} : vector<10x192xf32> to vector<5x16xf32>
    %233 = vector.extract_strided_slice %195 {offsets = [0, 176], sizes = [5, 16], strides = [1, 1]} : vector<10x192xf32> to vector<5x16xf32>
    %234 = vector.extract_strided_slice %195 {offsets = [5, 128], sizes = [5, 16], strides = [1, 1]} : vector<10x192xf32> to vector<5x16xf32>
    %235 = vector.extract_strided_slice %195 {offsets = [5, 144], sizes = [5, 16], strides = [1, 1]} : vector<10x192xf32> to vector<5x16xf32>
    %236 = vector.extract_strided_slice %195 {offsets = [5, 160], sizes = [5, 16], strides = [1, 1]} : vector<10x192xf32> to vector<5x16xf32>
    %237 = vector.extract_strided_slice %195 {offsets = [5, 176], sizes = [5, 16], strides = [1, 1]} : vector<10x192xf32> to vector<5x16xf32>
    %238 = vector.shape_cast %230 : vector<5x16xf32> to vector<1x5x16xf32>
    %239 = vector.shape_cast %231 : vector<5x16xf32> to vector<1x5x16xf32>
    %240 = vector.shape_cast %232 : vector<5x16xf32> to vector<1x5x16xf32>
    %241 = vector.shape_cast %233 : vector<5x16xf32> to vector<1x5x16xf32>
    %242 = vector.shape_cast %234 : vector<5x16xf32> to vector<1x5x16xf32>
    %243 = vector.shape_cast %235 : vector<5x16xf32> to vector<1x5x16xf32>
    %244 = vector.shape_cast %236 : vector<5x16xf32> to vector<1x5x16xf32>
    %245 = vector.shape_cast %237 : vector<5x16xf32> to vector<1x5x16xf32>
    %246 = tpu.concatenate %238, %239, %240, %241, %242, %243, %244, %245 in 0 : vector<1x5x16xf32>, vector<1x5x16xf32>, vector<1x5x16xf32>, vector<1x5x16xf32>, vector<1x5x16xf32>, vector<1x5x16xf32>, vector<1x5x16xf32>, vector<1x5x16xf32> -> vector<8x5x16xf32>
    "tpu.trace_start"() <{level = 10 : i32, message = "gqe,gke->gqk"}> : () -> ()
    %cst_49 = arith.constant dense<0.000000e+00> : vector<8x5x5xf32>
    %247 = tpu.matmul %212, %229, %cst_49 {dimension_numbers = #tpu.dot_dimension_numbers<[2], [2], [1], [1], [0, 0, 0, 1, 1, 1], [0], [0]>} : vector<8x5x16xf32>, vector<8x5x16xf32>, vector<8x5x5xf32> -> vector<8x5x5xf32>
    "tpu.trace_stop"() : () -> ()
    %cst_50 = arith.constant 2.500000e-01 : f32
    %248 = vector.broadcast %cst_50 : f32 to vector<8x5x5xf32>
    %249 = arith.mulf %247, %248 : vector<8x5x5xf32>
    %cst_51 = arith.constant dense<0xFF800000> : vector<8x5xf32>
    %250 = vector.multi_reduction <maximumf>, %249, %cst_51 [2] : vector<8x5x5xf32> to vector<8x5xf32>
    %251 = vector.shape_cast %250 : vector<8x5xf32> to vector<8x5x1xf32>
    %252 = vector.broadcast %251 : vector<8x5x1xf32> to vector<8x5x5xf32>
    %253 = arith.subf %249, %252 : vector<8x5x5xf32>
    %254 = math.exp %253 : vector<8x5x5xf32>
    %cst_52 = arith.constant dense<0.000000e+00> : vector<8x5xf32>
    %255 = vector.multi_reduction <add>, %254, %cst_52 [2] : vector<8x5x5xf32> to vector<8x5xf32>
    %256 = vector.shape_cast %255 : vector<8x5xf32> to vector<8x5x1xf32>
    %257 = tpu.reciprocal %256 {approx = true} : vector<8x5x1xf32> -> vector<8x5x1xf32>
    %258 = vector.broadcast %257 : vector<8x5x1xf32> to vector<8x5x5xf32>
    %259 = arith.mulf %254, %258 : vector<8x5x5xf32>
    "tpu.trace_start"() <{level = 10 : i32, message = "gqk,gke->gqe"}> : () -> ()
    %cst_53 = arith.constant dense<0.000000e+00> : vector<8x5x16xf32>
    %260 = tpu.matmul %259, %246, %cst_53 {dimension_numbers = #tpu.dot_dimension_numbers<[2], [1], [1], [2], [0, 0, 0, 1, 1, 2], [0], [0]>} : vector<8x5x5xf32>, vector<8x5x16xf32>, vector<8x5x16xf32> -> vector<8x5x16xf32>
    "tpu.trace_stop"() : () -> ()
    %261 = vector.extract_strided_slice %260 {offsets = [0, 0, 0], sizes = [1, 5, 16], strides = [1, 1, 1]} : vector<8x5x16xf32> to vector<1x5x16xf32>
    %262 = vector.shape_cast %261 : vector<1x5x16xf32> to vector<5x16xf32>
    %263 = vector.extract_strided_slice %260 {offsets = [1, 0, 0], sizes = [1, 5, 16], strides = [1, 1, 1]} : vector<8x5x16xf32> to vector<1x5x16xf32>
    %264 = vector.shape_cast %263 : vector<1x5x16xf32> to vector<5x16xf32>
    %265 = vector.extract_strided_slice %260 {offsets = [2, 0, 0], sizes = [1, 5, 16], strides = [1, 1, 1]} : vector<8x5x16xf32> to vector<1x5x16xf32>
    %266 = vector.shape_cast %265 : vector<1x5x16xf32> to vector<5x16xf32>
    %267 = vector.extract_strided_slice %260 {offsets = [3, 0, 0], sizes = [1, 5, 16], strides = [1, 1, 1]} : vector<8x5x16xf32> to vector<1x5x16xf32>
    %268 = vector.shape_cast %267 : vector<1x5x16xf32> to vector<5x16xf32>
    %269 = tpu.concatenate %262, %264, %266, %268 in 1 : vector<5x16xf32>, vector<5x16xf32>, vector<5x16xf32>, vector<5x16xf32> -> vector<5x64xf32>
    %270 = vector.extract_strided_slice %260 {offsets = [4, 0, 0], sizes = [1, 5, 16], strides = [1, 1, 1]} : vector<8x5x16xf32> to vector<1x5x16xf32>
    %271 = vector.shape_cast %270 : vector<1x5x16xf32> to vector<5x16xf32>
    %272 = vector.extract_strided_slice %260 {offsets = [5, 0, 0], sizes = [1, 5, 16], strides = [1, 1, 1]} : vector<8x5x16xf32> to vector<1x5x16xf32>
    %273 = vector.shape_cast %272 : vector<1x5x16xf32> to vector<5x16xf32>
    %274 = vector.extract_strided_slice %260 {offsets = [6, 0, 0], sizes = [1, 5, 16], strides = [1, 1, 1]} : vector<8x5x16xf32> to vector<1x5x16xf32>
    %275 = vector.shape_cast %274 : vector<1x5x16xf32> to vector<5x16xf32>
    %276 = vector.extract_strided_slice %260 {offsets = [7, 0, 0], sizes = [1, 5, 16], strides = [1, 1, 1]} : vector<8x5x16xf32> to vector<1x5x16xf32>
    %277 = vector.shape_cast %276 : vector<1x5x16xf32> to vector<5x16xf32>
    %278 = tpu.concatenate %271, %273, %275, %277 in 1 : vector<5x16xf32>, vector<5x16xf32>, vector<5x16xf32>, vector<5x16xf32> -> vector<5x64xf32>
    %279 = tpu.concatenate %269, %278 in 0 : vector<5x64xf32>, vector<5x64xf32> -> vector<10x64xf32>
    %c512 = arith.constant 512 : index
    %c0_54 = arith.constant 0 : index
    %280 = vector.load %arg1[%c512, %c0_54] : memref<1152x256xf32, #tpu.memory_space<vmem>>, vector<64x64xf32>
    %cst_55 = arith.constant dense<0.000000e+00> : vector<10x64xf32>
    %281 = tpu.matmul %279, %280, %cst_55 {dimension_numbers = #tpu.dot_dimension_numbers<[1], [0], [0], [1], [0, 0, 1, 1], [], []>} : vector<10x64xf32>, vector<64x64xf32>, vector<10x64xf32> -> vector<10x64xf32>
    %282 = arith.addf %166, %281 : vector<10x64xf32>
    %c21 = arith.constant 21 : index
    %c0_56 = arith.constant 0 : index
    %283 = vector.load %arg2[%c21, %c0_56] : memref<29x256xf32, #tpu.memory_space<vmem>>, vector<1x64xf32>
    %284 = vector.broadcast %283 : vector<1x64xf32> to vector<10x64xf32>
    %285 = arith.addf %282, %284 : vector<10x64xf32>
    %c22 = arith.constant 22 : index
    %c0_57 = arith.constant 0 : index
    %286 = vector.load %arg2[%c22, %c0_57] : memref<29x256xf32, #tpu.memory_space<vmem>>, vector<1x64xf32>
    %c23 = arith.constant 23 : index
    %c0_58 = arith.constant 0 : index
    %287 = vector.load %arg2[%c23, %c0_58] : memref<29x256xf32, #tpu.memory_space<vmem>>, vector<1x64xf32>
    %cst_59 = arith.constant dense<0.000000e+00> : vector<10xf32>
    %288 = vector.multi_reduction <add>, %285, %cst_59 [1] : vector<10x64xf32> to vector<10xf32>
    %289 = vector.shape_cast %288 : vector<10xf32> to vector<10x1xf32>
    %cst_60 = arith.constant 6.400000e+01 : f32
    %290 = vector.broadcast %cst_60 : f32 to vector<10x1xf32>
    %291 = arith.divf %289, %290 : vector<10x1xf32>
    %292 = vector.broadcast %291 : vector<10x1xf32> to vector<10x64xf32>
    %293 = arith.subf %285, %292 : vector<10x64xf32>
    %294 = arith.mulf %293, %293 : vector<10x64xf32>
    %cst_61 = arith.constant dense<0.000000e+00> : vector<10xf32>
    %295 = vector.multi_reduction <add>, %294, %cst_61 [1] : vector<10x64xf32> to vector<10xf32>
    %296 = vector.shape_cast %295 : vector<10xf32> to vector<10x1xf32>
    %cst_62 = arith.constant 6.400000e+01 : f32
    %297 = vector.broadcast %cst_62 : f32 to vector<10x1xf32>
    %298 = arith.divf %296, %297 : vector<10x1xf32>
    %299 = vector.broadcast %291 : vector<10x1xf32> to vector<10x64xf32>
    %300 = arith.subf %285, %299 : vector<10x64xf32>
    %cst_63 = arith.constant 9.99999974E-6 : f32
    %301 = vector.broadcast %cst_63 : f32 to vector<10x1xf32>
    %302 = arith.addf %298, %301 : vector<10x1xf32>
    %303 = math.rsqrt %302 : vector<10x1xf32>
    %304 = vector.broadcast %303 : vector<10x1xf32> to vector<10x64xf32>
    %305 = arith.mulf %300, %304 : vector<10x64xf32>
    %306 = vector.broadcast %286 : vector<1x64xf32> to vector<10x64xf32>
    %307 = arith.mulf %305, %306 : vector<10x64xf32>
    %308 = vector.broadcast %287 : vector<1x64xf32> to vector<10x64xf32>
    %309 = arith.addf %307, %308 : vector<10x64xf32>
    %c576 = arith.constant 576 : index
    %c0_64 = arith.constant 0 : index
    %310 = vector.load %arg1[%c576, %c0_64] : memref<1152x256xf32, #tpu.memory_space<vmem>>, vector<64x256xf32>
    %cst_65 = arith.constant dense<0.000000e+00> : vector<10x256xf32>
    %311 = tpu.matmul %309, %310, %cst_65 {dimension_numbers = #tpu.dot_dimension_numbers<[1], [0], [0], [1], [0, 0, 1, 1], [], []>} : vector<10x64xf32>, vector<64x256xf32>, vector<10x256xf32> -> vector<10x256xf32>
    %c24 = arith.constant 24 : index
    %c0_66 = arith.constant 0 : index
    %312 = vector.load %arg2[%c24, %c0_66] : memref<29x256xf32, #tpu.memory_space<vmem>>, vector<1x256xf32>
    %313 = vector.broadcast %312 : vector<1x256xf32> to vector<10x256xf32>
    %314 = arith.addf %311, %313 : vector<10x256xf32>
    %cst_67 = arith.constant 5.000000e-01 : f32
    %315 = vector.broadcast %cst_67 : f32 to vector<10x256xf32>
    %316 = arith.mulf %315, %314 : vector<10x256xf32>
    %cst_68 = arith.constant 0.707106769 : f32
    %317 = vector.broadcast %cst_68 : f32 to vector<10x256xf32>
    %318 = arith.mulf %314, %317 : vector<10x256xf32>
    %319 = math.erf %318 : vector<10x256xf32>
    %cst_69 = arith.constant 1.000000e+00 : f32
    %320 = vector.broadcast %cst_69 : f32 to vector<10x256xf32>
    %321 = arith.addf %320, %319 : vector<10x256xf32>
    %322 = arith.mulf %316, %321 : vector<10x256xf32>
    %c640 = arith.constant 640 : index
    %c0_70 = arith.constant 0 : index
    %323 = vector.load %arg1[%c640, %c0_70] : memref<1152x256xf32, #tpu.memory_space<vmem>>, vector<256x64xf32>
    %cst_71 = arith.constant dense<0.000000e+00> : vector<10x64xf32>
    %324 = tpu.matmul %322, %323, %cst_71 {dimension_numbers = #tpu.dot_dimension_numbers<[1], [0], [0], [1], [0, 0, 1, 1], [], []>} : vector<10x256xf32>, vector<256x64xf32>, vector<10x64xf32> -> vector<10x64xf32>
    %c25 = arith.constant 25 : index
    %c0_72 = arith.constant 0 : index
    %325 = vector.load %arg2[%c25, %c0_72] : memref<29x256xf32, #tpu.memory_space<vmem>>, vector<1x64xf32>
    %326 = vector.broadcast %325 : vector<1x64xf32> to vector<10x64xf32>
    %327 = arith.addf %324, %326 : vector<10x64xf32>
    %328 = arith.addf %285, %327 : vector<10x64xf32>
    %329 = vector.extract_strided_slice %328 {offsets = [0, 0], sizes = [1, 64], strides = [1, 1]} : vector<10x64xf32> to vector<1x64xf32>
    %330 = vector.extract_strided_slice %328 {offsets = [5, 0], sizes = [1, 64], strides = [1, 1]} : vector<10x64xf32> to vector<1x64xf32>
    %331 = tpu.concatenate %329, %330 in 0 : vector<1x64xf32>, vector<1x64xf32> -> vector<2x64xf32>
    %c26 = arith.constant 26 : index
    %c0_73 = arith.constant 0 : index
    %332 = vector.load %arg2[%c26, %c0_73] : memref<29x256xf32, #tpu.memory_space<vmem>>, vector<1x64xf32>
    %c27 = arith.constant 27 : index
    %c0_74 = arith.constant 0 : index
    %333 = vector.load %arg2[%c27, %c0_74] : memref<29x256xf32, #tpu.memory_space<vmem>>, vector<1x64xf32>
    %cst_75 = arith.constant dense<0.000000e+00> : vector<2xf32>
    %334 = vector.multi_reduction <add>, %331, %cst_75 [1] : vector<2x64xf32> to vector<2xf32>
    %335 = vector.shape_cast %334 : vector<2xf32> to vector<2x1xf32>
    %cst_76 = arith.constant 6.400000e+01 : f32
    %336 = vector.broadcast %cst_76 : f32 to vector<2x1xf32>
    %337 = arith.divf %335, %336 : vector<2x1xf32>
    %338 = vector.broadcast %337 : vector<2x1xf32> to vector<2x64xf32>
    %339 = arith.subf %331, %338 : vector<2x64xf32>
    %340 = arith.mulf %339, %339 : vector<2x64xf32>
    %cst_77 = arith.constant dense<0.000000e+00> : vector<2xf32>
    %341 = vector.multi_reduction <add>, %340, %cst_77 [1] : vector<2x64xf32> to vector<2xf32>
    %342 = vector.shape_cast %341 : vector<2xf32> to vector<2x1xf32>
    %cst_78 = arith.constant 6.400000e+01 : f32
    %343 = vector.broadcast %cst_78 : f32 to vector<2x1xf32>
    %344 = arith.divf %342, %343 : vector<2x1xf32>
    %345 = vector.broadcast %337 : vector<2x1xf32> to vector<2x64xf32>
    %346 = arith.subf %331, %345 : vector<2x64xf32>
    %cst_79 = arith.constant 9.99999974E-6 : f32
    %347 = vector.broadcast %cst_79 : f32 to vector<2x1xf32>
    %348 = arith.addf %344, %347 : vector<2x1xf32>
    %349 = math.rsqrt %348 : vector<2x1xf32>
    %350 = vector.broadcast %349 : vector<2x1xf32> to vector<2x64xf32>
    %351 = arith.mulf %346, %350 : vector<2x64xf32>
    %352 = vector.broadcast %332 : vector<1x64xf32> to vector<2x64xf32>
    %353 = arith.mulf %351, %352 : vector<2x64xf32>
    %354 = vector.broadcast %333 : vector<1x64xf32> to vector<2x64xf32>
    %355 = arith.addf %353, %354 : vector<2x64xf32>
    %c1088 = arith.constant 1088 : index
    %c0_80 = arith.constant 0 : index
    %356 = vector.load %arg1[%c1088, %c0_80] : memref<1152x256xf32, #tpu.memory_space<vmem>>, vector<64x128xf32>
    %cst_81 = arith.constant dense<0.000000e+00> : vector<2x128xf32>
    %357 = tpu.matmul %355, %356, %cst_81 {dimension_numbers = #tpu.dot_dimension_numbers<[1], [0], [0], [1], [0, 0, 1, 1], [], []>} : vector<2x64xf32>, vector<64x128xf32>, vector<2x128xf32> -> vector<2x128xf32>
    %c28 = arith.constant 28 : index
    %c0_82 = arith.constant 0 : index
    %358 = vector.load %arg2[%c28, %c0_82] : memref<29x256xf32, #tpu.memory_space<vmem>>, vector<1x128xf32>
    %359 = vector.broadcast %358 : vector<1x128xf32> to vector<2x128xf32>
    %360 = arith.addf %357, %359 : vector<2x128xf32>
    %c0_83 = arith.constant 0 : index
    %c0_84 = arith.constant 0 : index
    %361 = vector.load %arg3[%c0_83, %c0_84] : memref<2x128xf32, #tpu.memory_space<vmem>>, vector<2x128xf32>
    tpu.vector_store %arg3[%c0_83, %c0_84], %360 {strides = array<i32>} : memref<2x128xf32, #tpu.memory_space<vmem>>, vector<2x128xf32>,
    return
  }
}

</mosaic_0001>

<bundles_post_ra>
// kernel: vit_forward.1
= control target key start
LH: loop header
LB: loop body
LE: loop exit
PB: predicated region body
PF: predicated region fallthrough
CT: control target
= control target key end

     0   :  { %8 = vsyncpa [#allocation3], 0  ;;  %s3334_s0 = inlined_call_operand.vmem [shape: f32[10,192], index: 0, kind: input, shape index: {}]   ;;  %s3335_s1 = inlined_call_operand.hbm [shape: f32[1152,256], index: 1, kind: input, shape index: {}]   ;;  %s3336_s2 = inlined_call_operand.hbm [shape: f32[29,256], index: 2, kind: input, shape index: {}]   ;;  %s3337_s3 = inlined_call_operand.hbm [shape: f32[2,128], index: 3, kind: output, shape index: {}]  }
   0x1   :  { %9 = vsyncpa [#allocation6], 0 }
   0x2   :  { %10 = vsyncpa [#allocation4], 0  ;;  %s17_s14 = sshll.u32 %s3335_s1, 4  ;;  %s2749_s15 = smov [#allocation2]   ;;  %s18_s14 = int_to_ptr.hbm [resolvable:$true] %s17_s14 }
   0x3   :  { %s19_s16 = sshll.u32 %s2749_s15, 4  ;;  %s30_s19 = sshll.u32 %s3336_s2, 4  ;;  %s20_s16 = int_to_ptr.vmem [resolvable:$true] %s19_s16  ;;  %s31_s19 = int_to_ptr.hbm [resolvable:$true] %s30_s19 }
   0x4   :  { %s2750_s20 = smov 256   ;;  %s2751_s21 = smov 16  }
   0x5   :  { %25 = dma.hbm_to_vmem [thread:$0]  %s18_s14, 36864, %s20_s16, [#allocation3], %s2750_s20, %s2750_s20, %s2751_s21  }
   0x6   :  { %s2752_s22 = smov [#allocation5]  }
   0x7   :  { %s32_s23 = sshll.u32 %s2752_s22, 4  ;;  %s33_s23 = int_to_ptr.vmem [resolvable:$true] %s32_s23 }
   0x8   :  { %38 = dma.hbm_to_vmem [thread:$0]  %s31_s19, 1024, %s33_s23, [#allocation6], %s2750_s20, %s2750_s20, %s2751_s21  }
   0x9   :  { %2743 = dma.done.wait [#allocation3], 36864  }
   0xa   :  { %2744 = vsyncadd [#allocation3], 4294930432 }
   0xb   :  { %2745 = dma.done.wait [#allocation6], 1024  }
   0xc   :  { %2746 = vsyncadd [#allocation6], 4294966272  ;;  %v66_v0 = vld [vmem:[#allocation2 + $0x7f0] sm:$0xff]  ;;  %v65_v1 = vld [vmem:[#allocation2 + $0x7e0] sm:$0xff]  ;;  %vm77_vm0 = vcmask 523264   ;;  %vm135_vm1 = vcmask 517120  }
   0xd   :  { %84 = vmatpush.msra.mxu0 %v66_v0  ;;  %v64_v2 = vld [vmem:[#allocation2 + $0x7d0] sm:$0xff]  ;;  %v63_v4 = vld [vmem:[#allocation2 + $0x7c0] sm:$0xff]  ;;  %v48_v18 = vld [vmem:[%s3334_s0 + $0x8] sm:$0xff]  ;;  %v2753_v40 = vmov 64.0   ;;  %s2755_s30 = smov 80   ;;  %vm271_vm9 = vcmask 1042432  }
   0xe   :  { %v74_v3 = vld [vmem:[#allocation2 + $0x870] sm:$0xff]  ;;  %v73_v5 = vld [vmem:[#allocation2 + $0x860] sm:$0xff]  ;;  %v50_v23 = vld [vmem:[%s3334_s0 + $0x18] sm:$0x3]  ;;  %2571 = vrcp.f32 %v2753_v40  ;;  %s2756_s4 = smov 96   ;;  %s2757_s5 = smov 64  }
   0xf   :  { %85 = vmatpush.msra.mxu0 %v65_v1  ;;  %115 = vmatpush.msra.mxu1 %v74_v3  ;;  %v72_v6 = vld [vmem:[#allocation2 + $0x850] sm:$0xff]  ;;  %v71_v8 = vld [vmem:[#allocation2 + $0x840] sm:$0xff]  ;;  %v203_v58 = vld [vmem:[#allocation2 + $0x78] sm:$0xff]  ;;  %vm300_vm10 = vcmask 130048   ;;  %vm608_vm11 = vcmask 1044480   ;;  %vm515_vm12 = vcmask 36864  }
  0x10   :  { %v62_v7 = vld [vmem:[#allocation2 + $0x7b0] sm:$0xff]  ;;  %v61_v9 = vld [vmem:[#allocation2 + $0x7a0] sm:$0xff]  ;;  %248 = vmatpush.msra.mxu3 %v203_v58  ;;  %v201_v60 = vld [vmem:[#allocation2 + $0x68] sm:$0xff]  ;;  %vm604_vm13 = vcmask 39936   ;;  %s2758_s6 = smov 32   ;;  %s2759_s7 = smov 48  }
  0x11   :  { %86 = vmatpush.msra.mxu0 %v64_v2  ;;  %116 = vmatpush.msra.mxu1 %v73_v5  ;;  %v70_v10 = vld [vmem:[#allocation2 + $0x830] sm:$0xff]  ;;  %v69_v12 = vld [vmem:[#allocation2 + $0x820] sm:$0xff]  ;;  %v199_v62 = vld [vmem:[#allocation2 + $0x58] sm:$0xff]  ;;  %vm819_vm14 = vcmask 261120   ;;  %vm3338_vm15 = vcmask 392192   ;;  %s2760_s8 = smov [#allocation7]  }
  0x12   :  { %v60_v11 = vld [vmem:[#allocation2 + $0x790] sm:$0xff]  ;;  %v59_v13 = vld [vmem:[#allocation2 + $0x780] sm:$0xff]  ;;  %249 = vmatpush.msra.mxu3 %v201_v60  ;;  %v197_v0 = vld [vmem:[#allocation2 + $0x48] sm:$0xff]  ;;  %s2451_s9 = sshll.u32 %s2760_s8, 4  ;;  %s2453_s12 = sshll.u32 %s3337_s3, 4  ;;  %s2452_s9 = int_to_ptr.vmem [resolvable:$true] %s2451_s9  ;;  %s2454_s12 = int_to_ptr.hbm [resolvable:$true] %s2453_s12 }
  0x13   :  { %87 = vmatpush.msra.mxu0 %v63_v4  ;;  %117 = vmatpush.msra.mxu1 %v72_v6  ;;  %v68_v14 = vld [vmem:[#allocation2 + $0x810] sm:$0xff]  ;;  %v67_v16 = vld [vmem:[#allocation2 + $0x800] sm:$0xff]  ;;  %v195_v2 = vld [vmem:[#allocation2 + $0x38] sm:$0xff] }
  0x14   :  { %v58_v15 = vld [vmem:[#allocation2 + $0x770] sm:$0xff]  ;;  %v57_v17 = vld [vmem:[#allocation2 + $0x760] sm:$0xff]  ;;  %v2572_v41 = vpop.eup %2571  ;;  %250 = vmatpush.msra.mxu3 %v199_v62  ;;  %v193_v4 = vld [vmem:[#allocation2 + $0x28] sm:$0xff] }
  0x15   :  { %88 = vmatpush.msra.mxu0 %v62_v7  ;;  %118 = vmatpush.msra.mxu1 %v71_v8  ;;  %v56_v19 = vld [vmem:[#allocation2 + $0x750] sm:$0xff]  ;;  %v55_v20 = vld [vmem:[#allocation2 + $0x740] sm:$0xff]  ;;  %v140_v42 = vmul.f32 64.0, %v2572_v41  ;;  %vm144_vm2 = vweird.f32 %v2572_v41  ;;  %v191_v6 = vld [vmem:[#allocation2 + $0x18] sm:$0xff] }
  0x16   :  { %v54_v21 = vld [vmem:[#allocation2 + $0x730] sm:$0xff]  ;;  %v53_v22 = vld [vmem:[#allocation2 + $0x720] sm:$0xff]  ;;  %251 = vmatpush.msra.mxu3 %v197_v0  ;;  %v189_v8 = vld [vmem:[#allocation2 + $0x8] sm:$0xff] }
  0x17   :  { %89 = vmatpush.msra.mxu0 %v61_v9  ;;  %119 = vmatpush.msra.mxu1 %v70_v10  ;;  %v52_v24 = vld [vmem:[#allocation2 + $0x710] sm:$0xff]  ;;  %v51_v25 = vld [vmem:[#allocation2 + $0x700] sm:$0xff]  ;;  %v141_v43 = vsub.f32 1.0, %v140_v42 }
  0x18   :  { %v47_v26 = vld [vmem:[%s3334_s0] sm:$0xff]  ;;  %v49_v27 = vld [vmem:[%s3334_s0 + $0x10] sm:$0x3]  ;;  %252 = vmatpush.msra.mxu3 %v195_v2  ;;  %s2754_s0 = smov 112  }
  0x19   :  { %90 = vmatpush.msra.mxu0 %v60_v11  ;;  %120 = vmatpush.msra.mxu1 %v69_v12  ;;  %v75_v28 = vld [vmem:[#allocation5] sm:$0xff]  ;;  %v76_v34 = vld [vmem:[#allocation5 + $0x10] sm:$0x3]  ;;  %v142_v44 = vmul.f32 %v2572_v41, %v141_v43 }
  0x1a   :  { %v202_v57 = vld [vmem:[#allocation2 + $0x70] sm:$0xff]  ;;  %v200_v59 = vld [vmem:[#allocation2 + $0x60] sm:$0xff]  ;;  %253 = vmatpush.msra.mxu3 %v193_v4 }
  0x1b   :  { %91 = vmatpush.msra.mxu0 %v59_v13  ;;  %121 = vmatpush.msra.mxu1 %v68_v14  ;;  %v143_v45 = vadd.f32 %v2572_v41, %v142_v44  ;;  %v198_v61 = vld [vmem:[#allocation2 + $0x50] sm:$0xff]  ;;  %v196_v63 = vld [vmem:[#allocation2 + $0x40] sm:$0xff] }
  0x1c   :  { %225 = vmatpush.msra.mxu2 %v202_v57  ;;  %v194_v1 = vld [vmem:[#allocation2 + $0x30] sm:$0xff]  ;;  %v192_v3 = vld [vmem:[#allocation2 + $0x20] sm:$0xff]  ;;  %254 = vmatpush.msra.mxu3 %v191_v6 }
  0x1d   :  { %92 = vmatpush.msra.mxu0 %v58_v15  ;;  %122 = vmatpush.msra.mxu1 %v67_v16  ;;  %v2811_v46 = vsel %vm144_vm2, %v2572_v41, %v143_v45  ;;  %v190_v5 = vld [vmem:[#allocation2 + $0x10] sm:$0xff]  ;;  %v188_v7 = vld [vmem:[#allocation2] sm:$0xff] }
  0x1e   :  { %2464 = vmatmul.msk.f32.vlgmr.msra.gmra.mxu1 %vm77_vm0, %v48_v18  ;;  %226 = vmatpush.msra.mxu2 %v200_v59 }
  0x1f   :  { %93 = vmatpush.msra.mxu0 %v57_v17  ;;  %255 = vmatpush.msra.mxu3 %v189_v8 }
  0x20   :  { %227 = vmatpush.msra.mxu2 %v198_v61 }
  0x21   :  { %94 = vmatpush.msra.mxu0 %v56_v19 }
  0x22   :  { %228 = vmatpush.msra.mxu2 %v196_v63 }
  0x23   :  { %95 = vmatpush.msra.mxu0 %v55_v20 }
  0x24   :  { %229 = vmatpush.msra.mxu2 %v194_v1 }
  0x25   :  { %96 = vmatpush.msra.mxu0 %v54_v21 }
  0x26   :  { %2465 = vmatmul.msk.f32.gmra.mxu1 %vm77_vm0, %v50_v23  ;;  %230 = vmatpush.msra.mxu2 %v192_v3 }
  0x27   :  { %97 = vmatpush.msra.mxu0 %v53_v22 }
  0x28   :  { %231 = vmatpush.msra.mxu2 %v190_v5 }
  0x29   :  { %98 = vmatpush.msra.mxu0 %v52_v24 }
  0x2a   :  { %232 = vmatpush.msra.mxu2 %v188_v7 }
  0x2b   :  { %99 = vmatpush.msra.mxu0 %v51_v25  ;;  %v130_v25 = vld [vmem:[#allocation5 + $0x12] ss:$0 sm:$0xff] }
  0x2c   :  { %100 = vmatmul.f32.vlgmr.msra.gmra.mxu0 %v47_v26 }
  0x34   :  { %103 = vmatmul.f32.gmra.mxu0 %v49_v27 }
  0x9b   :  { %v124_v29 = vpop.f32.mrf.mxu1 }
  0xa3   :  { %v127_v36 = vpop.f32.mrf.mxu1 }
  0xa9   :  { %v101_v30 = vpop.f32.mrf.mxu0 }
  0xaa   :  { %v102_v31 = vadd.f32 %v101_v30, %v75_v28  ;;  %v131_v28 = vld [vmem:[#allocation5 + $0x13] ss:$0 sm:$0xff] }
  0xac   :  { %v2803_v32 = vadd.f32 %v124_v29, %v102_v31 }
  0xae   :  { %v132_v33 = vsel %vm77_vm0, %v2803_v32, 0.0 }
  0xaf   :  { %133 = vadd.xlane.f32.xlu0 %v132_v33 }
  0xb1   :  { %v104_v35 = vpop.f32.mrf.mxu0 }
  0xb2   :  { %v105_v37 = vadd.f32 %v104_v35, %v76_v34 }
  0xb4   :  { %v2807_v38 = vadd.f32 %v127_v36, %v105_v37 }
  0xb6   :  { %v136_v39 = vsel %vm135_vm1, %v2807_v38, 0.0 }
  0xb7   :  { %137 = vadd.xlane.f32.xlu0 %v136_v39  ;;  %v205_v39 = vld [vmem:[#allocation5 + $0x14] ss:$8 sm:$0x3] }
  0xb8   :  { %v207_v40 = vperm.slane %v205_v39, 0  ;;  %v208_v62 = vperm.slane %v205_v39, 1 }
 0x122   :  { %v134_v47 = vpop.xlane.xlu0 %133 }
 0x123   :  { %v146_v48 = vmul.f32 %v2811_v46, %v134_v47 }
 0x125   :  { %v2815_v49 = vsub.f32 %v2803_v32, %v146_v48 }
 0x127   :  { %v150_v50 = vmul.f32 %v2815_v49, %v2815_v49 }
 0x129   :  { %v152_v51 = vsel %vm77_vm0, %v150_v50, 0.0 }
 0x12a   :  { %153 = vadd.xlane.f32.xlu1 %v152_v51  ;;  %v138_v52 = vpop.xlane.xlu0 %137 }
 0x12b   :  { %v147_v53 = vmul.f32 %v2811_v46, %v138_v52 }
 0x12d   :  { %v2822_v54 = vsub.f32 %v2807_v38, %v147_v53 }
 0x12f   :  { %v151_v55 = vmul.f32 %v2822_v54, %v2822_v54 }
 0x131   :  { %v155_v56 = vsel %vm135_vm1, %v151_v55, 0.0 }
 0x132   :  { %156 = vadd.xlane.f32.xlu1 %v155_v56 }
 0x19d   :  { %v154_v9 = vpop.xlane.xlu1 %153 }
 0x19e   :  { %v158_v10 = vmul.f32 %v154_v9, %v2811_v46 }
 0x1a0   :  { %v160_v11 = vadd.f32 1e-05, %v158_v10 }
 0x1a2   :  { %2573 = vrsqrt.f32 %v160_v11  ;;  %vm168_vm4 = vweird.f32 %v160_v11 }
 0x1a5   :  { %v157_v12 = vpop.xlane.xlu1 %156 }
 0x1a6   :  { %v159_v13 = vmul.f32 %v157_v12, %v2811_v46 }
 0x1a8   :  { %v2574_v14 = vpop.eup %2573  ;;  %v161_v15 = vadd.f32 1e-05, %v159_v13 }
 0x1a9   :  { %v163_v16 = vmul.f32 %v2574_v14, %v160_v11  ;;  %vm169_vm3 = vweird.f32 %v2574_v14 }
 0x1aa   :  { %2575 = vrsqrt.f32 %v161_v15  ;;  %vm170_vm5 = vmor %vm168_vm4, %vm169_vm3  ;;  %vm178_vm7 = vweird.f32 %v161_v15 }
 0x1ab   :  { %v164_v17 = vmul.f32 %v2574_v14, %v163_v16 }
 0x1ad   :  { %v165_v18 = vmul.f32 0.5, %v164_v17 }
 0x1af   :  { %v166_v19 = vsub.f32 1.5, %v165_v18 }
 0x1b0   :  { %v2576_v20 = vpop.eup %2575 }
 0x1b1   :  { %v167_v21 = vmul.f32 %v2574_v14, %v166_v19  ;;  %v173_v22 = vmul.f32 %v2576_v20, %v161_v15  ;;  %vm179_vm6 = vweird.f32 %v2576_v20 }
 0x1b2   :  { %vm180_vm8 = vmor %vm178_vm7, %vm179_vm6 }
 0x1b3   :  { %v171_v23 = vsel %vm170_vm5, %v2574_v14, %v167_v21  ;;  %v174_v24 = vmul.f32 %v2576_v20, %v173_v22 }
 0x1b4   :  { %v182_v26 = vmul.f32 %v171_v23, %v2815_v49 }
 0x1b5   :  { %v175_v27 = vmul.f32 0.5, %v174_v24 }
 0x1b6   :  { %v184_v29 = vmul.f32 %v182_v26, %v130_v25 }
 0x1b7   :  { %v176_v30 = vsub.f32 1.5, %v175_v27 }
 0x1b8   :  { %v186_v31 = vadd.f32 %v184_v29, %v131_v28 }
 0x1b9   :  { %v177_v33 = vmul.f32 %v2576_v20, %v176_v30 }
 0x1ba   :  { %2466 = vmatmul.msk.f32.vlgmr.msra.gmra.mxu2 %vm77_vm0, %v186_v31  ;;  %2468 = vmatmul.msk.f32.vlgmr.msra.gmra.mxu3 %vm77_vm0, %v186_v31 }
 0x1bb   :  { %v181_v34 = vsel %vm180_vm8, %v2576_v20, %v177_v33 }
 0x1bc   :  { %v183_v35 = vmul.f32 %v181_v34, %v2822_v54 }
 0x1be   :  { %v185_v36 = vmul.f32 %v183_v35, %v130_v25 }
 0x1c0   :  { %v187_v37 = vadd.f32 %v185_v36, %v131_v28 }
 0x1c2   :  { %2467 = vmatmul.msk.f32.gmra.mxu2 %vm77_vm0, %v187_v37  ;;  %2469 = vmatmul.msk.f32.gmra.mxu3 %vm77_vm0, %v187_v37 }
 0x23d   :  { %v234_v41 = vpop.f32.mrf.mxu2  ;;  %v257_v59 = vpop.f32.mrf.mxu3 }
 0x23e   :  { %v235_v42 = vadd.f32 %v234_v41, %v207_v40  ;;  %v2860_v0 = vadd.f32 %v257_v59, %v208_v62 }
 0x240   :  { %264 = vrot.lane.b32.xlu2 %v235_v42, %s2754_s0  ;;  %268 = vrot.lane.b32.xlu1 %v235_v42, %s2755_s30  ;;  %v272_v45 = vrot.slane %v235_v42, 5  ;;  %v289_v3 = vrot.slane %v2860_v0, 5 }
 0x245   :  { %v237_v43 = vpop.f32.mrf.mxu2  ;;  %v260_v61 = vpop.f32.mrf.mxu3 }
 0x246   :  { %v238_v44 = vadd.f32 %v237_v43, %v207_v40  ;;  %v261_v63 = vadd.f32 %v260_v61, %v208_v62 }
 0x248   :  { %v273_v47 = vrot.slane %v238_v44, 5  ;;  %266 = vrot.lane.b32.xlu2 %v235_v42, %s2756_s4  ;;  %v290_v1 = vrot.slane %v261_v63, 5 }
 0x24a   :  { %v274_v48 = vsel %vm271_vm9, %v272_v45, %v273_v47  ;;  %v2867_v5 = vsel %vm271_vm9, %v289_v3, %v290_v1 }
 0x24b   :  { %275 = vrot.lane.b32.xlu0 %v274_v48, %s2754_s0 }
 0x250   :  { %277 = vrot.lane.b32.xlu2 %v274_v48, %s2756_s4 }
 0x258   :  { %279 = vrot.lane.b32.xlu2 %v274_v48, %s2755_s30 }
 0x29a   :  { %v265_v49 = vpop.permute.xlu2 %264 }
 0x29b   :  { %325 = vrot.lane.b32.xlu2 %v265_v49, %s2757_s5 }
 0x2a2   :  { %v267_v50 = vpop.permute.xlu2 %266 }
 0x2a3   :  { %298 = vrot.lane.b32.xlu2 %v235_v42, %s2757_s5  ;;  %351 = vrot.lane.b32.xlu0 %v267_v50, %s2757_s5 }
 0x2aa   :  { %v278_v51 = vpop.permute.xlu2 %277 }
 0x2ab   :  { %455 = vrot.lane.b32.xlu2 %v278_v51, %s2757_s5 }
 0x2b2   :  { %v269_v52 = vpop.permute.xlu1 %268  ;;  %v280_v54 = vpop.permute.xlu2 %279 }
 0x2b3   :  { %377 = vrot.lane.b32.xlu0 %v269_v52, %s2757_s5 }
 0x2bb   :  { %403 = vrot.lane.b32.xlu0 %v274_v48, %s2757_s5 }
 0x2bd   :  { %v276_v53 = vpop.permute.xlu0 %275 }
 0x2be   :  { %429 = vrot.lane.b32.xlu1 %v276_v53, %s2757_s5 }
 0x2c6   :  { %481 = vrot.lane.b32.xlu1 %v280_v54, %s2757_s5 }
 0x2f5   :  { %v326_v55 = vpop.permute.xlu2 %325 }
 0x2f6   :  { %2472 = vmatpush.xpose.msk.msrb.mxu2 %vm300_vm10, %v326_v55 }
 0x2f9   :  { %2473 = vmatmul.msk.f32.vlgmr.msrb.gmra.mxu2 %vm300_vm10, %v265_v49 }
 0x2fd   :  { %v299_v56 = vpop.permute.xlu2 %298 }
 0x2fe   :  { %2470 = vmatpush.xpose.msk.msrb.mxu1 %vm300_vm10, %v299_v56 }
 0x301   :  { %2471 = vmatmul.msk.f32.vlgmr.msrb.gmra.mxu1 %vm300_vm10, %v235_v42 }
 0x305   :  { %v456_v57 = vpop.permute.xlu2 %455 }
 0x306   :  { %2482 = vmatpush.xpose.msk.msrb.mxu0 %vm300_vm10, %v456_v57 }
 0x309   :  { %2483 = vmatmul.msk.f32.vlgmr.msrb.gmra.mxu0 %vm300_vm10, %v278_v51 }
 0x315   :  { %v352_v58 = vpop.permute.xlu0 %351 }
 0x316   :  { %2474 = vmatpush.xpose.msk.msrb.mxu3 %vm300_vm10, %v352_v58 }
 0x319   :  { %2475 = vmatmul.msk.f32.vlgmr.msrb.gmra.mxu3 %vm300_vm10, %v267_v50 }
 0x325   :  { %v378_v60 = vpop.permute.xlu0 %377 }
 0x326   :  { %2476 = vmatpush.xpose.msk.msra.mxu1 %vm300_vm10, %v378_v60 }
 0x329   :  { %2477 = vmatmul.msk.f32.vlgmr.msra.gmra.mxu1 %vm300_vm10, %v269_v52 }
 0x32d   :  { %v404_v2 = vpop.permute.xlu0 %403 }
 0x32e   :  { %2478 = vmatpush.xpose.msk.msra.mxu2 %vm300_vm10, %v404_v2 }
 0x330   :  { %v430_v4 = vpop.permute.xlu1 %429 }
 0x331   :  { %2479 = vmatmul.msk.f32.vlgmr.msra.gmra.mxu2 %vm300_vm10, %v274_v48  ;;  %2480 = vmatpush.xpose.msk.msra.mxu3 %vm300_vm10, %v430_v4 }
 0x332   :  { %2486 = vmatpush.msk.msrb.mxu2 %vm608_vm11, %v2860_v0 }
 0x334   :  { %2494 = vmatpush.msk.msra.mxu2 %vm608_vm11, %v2867_v5  ;;  %2481 = vmatmul.msk.f32.vlgmr.msra.gmra.mxu3 %vm300_vm10, %v276_v53 }
 0x338   :  { %v482_v6 = vpop.permute.xlu1 %481 }
 0x339   :  { %2484 = vmatpush.xpose.msk.msrb.mxu1 %vm300_vm10, %v482_v6 }
 0x33c   :  { %2485 = vmatmul.msk.f32.vlgmr.msrb.gmra.mxu1 %vm300_vm10, %v280_v54 }
 0x37c   :  { %v348_v10 = vpop.f32.mrf.mxu2 }
 0x37d   :  { %v508_v11 = vmul.f32 0.25, %v348_v10 }
 0x37e   :  { %v322_v7 = vpop.f32.mrf.mxu1 }
 0x37f   :  { %v2876_v8 = vmul.f32 0.25, %v322_v7  ;;  %v519_v12 = vsel %vm515_vm12, %v508_v11, -inf }
 0x381   :  { %v516_v9 = vsel %vm515_vm12, %v2876_v8, -inf }
 0x382   :  { %517 = vmax.xlane.f32.xlu2 %v516_v9 }
 0x386   :  { %v478_v16 = vpop.f32.mrf.mxu0 }
 0x387   :  { %v513_v17 = vmul.f32 0.25, %v478_v16 }
 0x389   :  { %v534_v20 = vsel %vm515_vm12, %v513_v17, -inf }
 0x38a   :  { %520 = vmax.xlane.f32.xlu2 %v519_v12 }
 0x39c   :  { %v374_v13 = vpop.f32.mrf.mxu3 }
 0x39d   :  { %v509_v14 = vmul.f32 0.25, %v374_v13 }
 0x39f   :  { %v522_v15 = vsel %vm515_vm12, %v509_v14, -inf }
 0x3a0   :  { %523 = vmax.xlane.f32.xlu1 %v522_v15 }
 0x3a6   :  { %v400_v18 = vpop.f32.mrf.mxu1 }
 0x3a7   :  { %v510_v19 = vmul.f32 0.25, %v400_v18 }
 0x3a8   :  { %535 = vmax.xlane.f32.xlu1 %v534_v20 }
 0x3a9   :  { %v525_v21 = vsel %vm515_vm12, %v510_v19, -inf }
 0x3aa   :  { %526 = vmax.xlane.f32.xlu0 %v525_v21 }
 0x3b4   :  { %v426_v22 = vpop.f32.mrf.mxu2 }
 0x3b5   :  { %v2884_v23 = vmul.f32 0.25, %v426_v22 }
 0x3b7   :  { %v452_v24 = vpop.f32.mrf.mxu3  ;;  %v528_v25 = vsel %vm515_vm12, %v2884_v23, -inf }
 0x3b8   :  { %v512_v26 = vmul.f32 0.25, %v452_v24  ;;  %529 = vmax.xlane.f32.xlu1 %v528_v25 }
 0x3b9   :  { %v504_v27 = vpop.f32.mrf.mxu1 }
 0x3ba   :  { %v514_v28 = vmul.f32 0.25, %v504_v27  ;;  %v531_v29 = vsel %vm515_vm12, %v512_v26, -inf }
 0x3bb   :  { %532 = vmax.xlane.f32.xlu2 %v531_v29 }
 0x3bc   :  { %v537_v30 = vsel %vm515_vm12, %v514_v28, -inf }
 0x3bd   :  { %538 = vmax.xlane.f32.xlu0 %v537_v30 }
 0x3d1   :  { %284 = vrot.lane.b32.xlu0 %v2860_v0, %s2756_s4 }
 0x3d3   :  { %282 = vrot.lane.b32.xlu2 %v2860_v0, %s2754_s0 }
 0x3f5   :  { %v518_v31 = vpop.xlane.xlu2 %517 }
 0x3f6   :  { %v540_v10 = vsub.f32 %v2876_v8, %v518_v31 }
 0x3f8   :  { %v548_v12 = vmul.f32 1.442695, %v540_v10 }
 0x3fd   :  { %v521_v33 = vpop.xlane.xlu2 %520 }
 0x3fe   :  { %v541_v34 = vsub.f32 %v508_v11, %v521_v33 }
 0x400   :  { %v550_v35 = vmul.f32 1.442695, %v541_v34 }
 0x402   :  { %2577 = vpow2.f32 %v550_v35 }
 0x408   :  { %v2894_v36 = vpop.eup %2577 }
 0x409   :  { %v567_v37 = vsel %vm515_vm12, %v2894_v36, 0.0 }
 0x40a   :  { %568 = vadd.xlane.f32.xlu0 %v567_v37 }
 0x413   :  { %v524_v39 = vpop.xlane.xlu1 %523 }
 0x414   :  { %v542_v40 = vsub.f32 %v509_v14, %v524_v39 }
 0x416   :  { %v552_v41 = vmul.f32 1.442695, %v542_v40 }
 0x418   :  { %2579 = vpow2.f32 %v552_v41 }
 0x41b   :  { %v536_v42 = vpop.xlane.xlu1 %535 }
 0x41c   :  { %v546_v48 = vsub.f32 %v513_v17, %v536_v42 }
 0x41d   :  { %v527_v43 = vpop.xlane.xlu0 %526 }
 0x41e   :  { %v2580_v44 = vpop.eup %2579  ;;  %v543_v45 = vsub.f32 %v510_v19, %v527_v43  ;;  %v560_v50 = vmul.f32 1.442695, %v546_v48 }
 0x41f   :  { %v570_v47 = vsel %vm515_vm12, %v2580_v44, 0.0 }
 0x420   :  { %v554_v49 = vmul.f32 1.442695, %v543_v45  ;;  %571 = vadd.xlane.f32.xlu2 %v570_v47 }
 0x422   :  { %2581 = vpow2.f32 %v554_v49  ;;  %v849_v49 = vld [vmem:[#allocation2 + $0xf0] sm:$0xff] }
 0x423   :  { %2583 = vpow2.f32 %v560_v50  ;;  %v848_v50 = vld [vmem:[#allocation2 + $0xe0] sm:$0xff] }
 0x428   :  { %v2899_v51 = vpop.eup %2581 }
 0x429   :  { %v573_v52 = vsel %vm515_vm12, %v2899_v51, 0.0  ;;  %v2584_v53 = vpop.eup %2583 }
 0x42a   :  { %574 = vadd.xlane.f32.xlu1 %v573_v52  ;;  %v582_v59 = vsel %vm515_vm12, %v2584_v53, 0.0  ;;  %v846_v52 = vld [vmem:[#allocation2 + $0xc0] sm:$0xff] }
 0x42b   :  { %v530_v4 = vpop.xlane.xlu1 %529 }
 0x42c   :  { %v544_v6 = vsub.f32 %v2884_v23, %v530_v4 }
 0x42e   :  { %v533_v54 = vpop.xlane.xlu2 %532  ;;  %v556_v7 = vmul.f32 1.442695, %v544_v6 }
 0x42f   :  { %v545_v55 = vsub.f32 %v512_v26, %v533_v54  ;;  %v844_v54 = vld [vmem:[#allocation2 + $0xa0] sm:$0xff] }
 0x430   :  { %v539_v56 = vpop.xlane.xlu0 %538 }
 0x431   :  { %v558_v57 = vmul.f32 1.442695, %v545_v55  ;;  %v547_v58 = vsub.f32 %v514_v28, %v539_v56  ;;  %v843_v55 = vld [vmem:[#allocation2 + $0x90] sm:$0xff] }
 0x432   :  { %583 = vadd.xlane.f32.xlu1 %v582_v59 }
 0x433   :  { %2585 = vpow2.f32 %v558_v57  ;;  %v562_v60 = vmul.f32 1.442695, %v547_v58  ;;  %v842_v57 = vld [vmem:[#allocation2 + $0x80] sm:$0xff] }
 0x435   :  { %2587 = vpow2.f32 %v562_v60 }
 0x436   :  { %v283_v61 = vpop.permute.xlu2 %282  ;;  %2589 = vpow2.f32 %v556_v7 }
 0x437   :  { %2488 = vmatpush.msk.msrb.mxu3 %vm608_vm11, %v283_v61  ;;  %2591 = vpow2.f32 %v548_v12 }
 0x438   :  { %292 = vrot.lane.b32.xlu2 %v2867_v5, %s2754_s0 }
 0x439   :  { %v2586_v62 = vpop.eup %2585 }
 0x43a   :  { %v579_v63 = vsel %vm515_vm12, %v2586_v62, 0.0 }
 0x43b   :  { %v2588_v1 = vpop.eup %2587  ;;  %580 = vadd.xlane.f32.xlu0 %v579_v63 }
 0x43c   :  { %v585_v2 = vsel %vm515_vm12, %v2588_v1, 0.0  ;;  %v2590_v9 = vpop.eup %2589 }
 0x43d   :  { %586 = vadd.xlane.f32.xlu1 %v585_v2  ;;  %v576_v11 = vsel %vm515_vm12, %v2590_v9, 0.0  ;;  %v2592_v13 = vpop.eup %2591 }
 0x43e   :  { %v564_v14 = vsel %vm515_vm12, %v2592_v13, 0.0 }
 0x440   :  { %296 = vrot.lane.b32.xlu2 %v2867_v5, %s2755_s30 }
 0x443   :  { %v285_v3 = vpop.permute.xlu0 %284 }
 0x444   :  { %2490 = vmatpush.msk.msra.mxu0 %vm608_vm11, %v285_v3 }
 0x44f   :  { %294 = vrot.lane.b32.xlu0 %v2867_v5, %s2756_s4 }
 0x456   :  { %286 = vrot.lane.b32.xlu1 %v2860_v0, %s2755_s30 }
 0x469   :  { %577 = vadd.xlane.f32.xlu2 %v576_v11 }
 0x479   :  { %565 = vadd.xlane.f32.xlu0 %v564_v14 }
 0x47d   :  { %v569_v5 = vpop.xlane.xlu0 %568 }
 0x47e   :  { %2593 = vrcp.f32 %v569_v5 }
 0x484   :  { %v2594_v15 = vpop.eup %2593 }
 0x485   :  { %v597_v0 = vmul.f32 %v2594_v15, %v2894_v36 }
 0x487   :  { %2489 = vmatmul.msk.f32.vlgmr.msrb.gmra.mxu3 %vm604_vm13, %v597_v0 }
 0x493   :  { %v572_v16 = vpop.xlane.xlu2 %571 }
 0x494   :  { %2595 = vrcp.f32 %v572_v16 }
 0x49a   :  { %v2596_v8 = vpop.eup %2595 }
 0x49b   :  { %v598_v17 = vmul.f32 %v2596_v8, %v2580_v44  ;;  %v293_v18 = vpop.permute.xlu2 %292 }
 0x49c   :  { %2496 = vmatpush.msk.msra.mxu3 %vm608_vm11, %v293_v18 }
 0x49d   :  { %2491 = vmatmul.msk.f32.vlgmr.msra.gmra.mxu0 %vm604_vm13, %v598_v17  ;;  %v575_v19 = vpop.xlane.xlu1 %574 }
 0x4a3   :  { %v297_v31 = vpop.permute.xlu2 %296 }
 0x4a5   :  { %v584_v22 = vpop.xlane.xlu1 %583 }
 0x4ae   :  { %v581_v20 = vpop.xlane.xlu0 %580 }
 0x4af   :  { %2597 = vrcp.f32 %v581_v20 }
 0x4b0   :  { %2599 = vrcp.f32 %v584_v22  ;;  %v587_v25 = vpop.xlane.xlu1 %586 }
 0x4b1   :  { %2601 = vrcp.f32 %v575_v19 }
 0x4b2   :  { %2603 = vrcp.f32 %v587_v25 }
 0x4b5   :  { %v2598_v21 = vpop.eup %2597 }
 0x4b6   :  { %v601_v23 = vmul.f32 %v2598_v21, %v2586_v62  ;;  %v2600_v24 = vpop.eup %2599 }
 0x4b7   :  { %v602_v26 = vmul.f32 %v2600_v24, %v2584_v53  ;;  %v2602_v28 = vpop.eup %2601  ;;  %v845_v53 = vld [vmem:[#allocation2 + $0xb0] sm:$0xff] }
 0x4b8   :  { %2497 = vmatmul.msk.f32.vlgmr.msra.gmra.mxu3 %vm604_vm13, %v601_v23  ;;  %v599_v29 = vmul.f32 %v2602_v28, %v2899_v51  ;;  %v2604_v33 = vpop.eup %2603  ;;  %v847_v51 = vld [vmem:[#allocation2 + $0xd0] sm:$0xff]  ;;  %v945_v28 = vld [vmem:[#allocation2 + $0x160] sm:$0xff] }
 0x4b9   :  { %v603_v34 = vmul.f32 %v2604_v33, %v2588_v1  ;;  %v941_v33 = vld [vmem:[#allocation2 + $0x140] sm:$0xff] }
 0x4c1   :  { %v295_v27 = vpop.permute.xlu0 %294 }
 0x4c2   :  { %2498 = vmatpush.msk.msrb.mxu0 %vm608_vm11, %v295_v27  ;;  %v948_v27 = vld [vmem:[#allocation2 + $0x178] sm:$0xff] }
 0x4c3   :  { %2499 = vmatmul.msk.f32.vlgmr.msrb.gmra.mxu0 %vm604_vm13, %v602_v26  ;;  %v947_v26 = vld [vmem:[#allocation2 + $0x170] sm:$0xff] }
 0x4c4   :  { %970 = vmatpush.msrb.mxu3 %v947_v26  ;;  %v1195_v26 = vld [vmem:[#allocation2 + $0x230] sm:$0xff] }
 0x4c6   :  { %971 = vmatpush.msrb.mxu3 %v945_v28 }
 0x4c8   :  { %v287_v30 = vpop.permute.xlu1 %286 }
 0x4c9   :  { %2492 = vmatpush.msk.msra.mxu1 %vm608_vm11, %v287_v30  ;;  %v943_v30 = vld [vmem:[#allocation2 + $0x150] sm:$0xff] }
 0x4ca   :  { %2493 = vmatmul.msk.f32.vlgmr.msra.gmra.mxu1 %vm604_vm13, %v599_v29  ;;  %v946_v29 = vld [vmem:[#allocation2 + $0x168] sm:$0xff]  ;;  %972 = vmatpush.msrb.mxu3 %v943_v30  ;;  %v1194_v30 = vld [vmem:[#allocation2 + $0x220] sm:$0xff] }
 0x4cb   :  { %2500 = vmatpush.msk.msrb.mxu1 %vm608_vm11, %v297_v31  ;;  %v944_v31 = vld [vmem:[#allocation2 + $0x158] sm:$0xff] }
 0x4cc   :  { %973 = vmatpush.msrb.mxu3 %v941_v33 }
 0x4d2   :  { %2501 = vmatmul.msk.f32.vlgmr.msrb.gmra.mxu1 %vm604_vm13, %v603_v34  ;;  %v942_v34 = vld [vmem:[#allocation2 + $0x148] sm:$0xff] }
 0x4dc   :  { %v578_v36 = vpop.xlane.xlu2 %577 }
 0x4ec   :  { %v566_v35 = vpop.xlane.xlu0 %565 }
 0x4ed   :  { %2605 = vrcp.f32 %v566_v35  ;;  %v939_v35 = vld [vmem:[#allocation2 + $0x130] sm:$0xff] }
 0x4ee   :  { %2607 = vrcp.f32 %v578_v36  ;;  %v940_v36 = vld [vmem:[#allocation2 + $0x138] sm:$0xff]  ;;  %974 = vmatpush.msrb.mxu3 %v939_v35  ;;  %v1193_v35 = vld [vmem:[#allocation2 + $0x210] sm:$0xff] }
 0x4f3   :  { %v2606_v37 = vpop.eup %2605 }
 0x4f4   :  { %v596_v39 = vmul.f32 %v2606_v37, %v2592_v13  ;;  %v2608_v40 = vpop.eup %2607  ;;  %v880_v13 = vld [vmem:[#allocation5 + $0x15] ss:$0 sm:$0xff]  ;;  %v937_v37 = vld [vmem:[#allocation2 + $0x120] sm:$0xff] }
 0x4f5   :  { %v600_v41 = vmul.f32 %v2608_v40, %v2590_v9  ;;  %975 = vmatpush.msrb.mxu3 %v937_v37  ;;  %v935_v40 = vld [vmem:[#allocation2 + $0x110] sm:$0xff] }
 0x4f6   :  { %2487 = vmatmul.msk.f32.vlgmr.msrb.gmra.mxu2 %vm604_vm13, %v596_v39  ;;  %v938_v39 = vld [vmem:[#allocation2 + $0x128] sm:$0xff] }
 0x4f7   :  { %863 = vmatpush.msrb.mxu2 %v849_v49  ;;  %976 = vmatpush.msrb.mxu3 %v935_v40 }
 0x4f9   :  { %864 = vmatpush.msrb.mxu2 %v848_v50 }
 0x4fb   :  { %865 = vmatpush.msrb.mxu2 %v847_v51 }
 0x4fd   :  { %866 = vmatpush.msrb.mxu2 %v846_v52 }
 0x4fe   :  { %2495 = vmatmul.msk.f32.vlgmr.msra.gmra.mxu2 %vm604_vm13, %v600_v41  ;;  %v936_v41 = vld [vmem:[#allocation2 + $0x118] sm:$0xff] }
 0x4ff   :  { %867 = vmatpush.msrb.mxu2 %v845_v53 }
 0x501   :  { %868 = vmatpush.msrb.mxu2 %v844_v54 }
 0x503   :  { %869 = vmatpush.msrb.mxu2 %v843_v55 }
 0x505   :  { %870 = vmatpush.msrb.mxu2 %v842_v57 }
 0x507   :  { %993 = vmatpush.msra.mxu2 %v948_v27  ;;  %v1211_v27 = vld [vmem:[#allocation2 + $0x330] sm:$0xff] }
 0x509   :  { %994 = vmatpush.msra.mxu2 %v946_v29 }
 0x50a   :  { %v653_v45 = vpop.f32.mrf.mxu3 }
 0x50b   :  { %995 = vmatpush.msra.mxu2 %v944_v31  ;;  %v1210_v31 = vld [vmem:[#allocation2 + $0x320] sm:$0xff] }
 0x50d   :  { %996 = vmatpush.msra.mxu2 %v942_v34 }
 0x50f   :  { %997 = vmatpush.msra.mxu2 %v940_v36  ;;  %v1209_v36 = vld [vmem:[#allocation2 + $0x310] sm:$0xff] }
 0x511   :  { %998 = vmatpush.msra.mxu2 %v938_v39 }
 0x513   :  { %999 = vmatpush.msra.mxu2 %v936_v41 }
 0x51a   :  { %v678_v42 = vpop.f32.mrf.mxu0 }
 0x51b   :  { %811 = vrot.lane.b32.xlu0 %v678_v42, %s2758_s6  ;;  %v933_v42 = vld [vmem:[#allocation2 + $0x100] sm:$0xff] }
 0x51c   :  { %977 = vmatpush.msrb.mxu3 %v933_v42 }
 0x53b   :  { %v753_v48 = vpop.f32.mrf.mxu3 }
 0x540   :  { %v778_v47 = vpop.f32.mrf.mxu0 }
 0x547   :  { %v703_v43 = vpop.f32.mrf.mxu1 }
 0x54f   :  { %v803_v44 = vpop.f32.mrf.mxu1 }
 0x550   :  { %832 = vrot.lane.b32.xlu1 %v803_v44, %s2759_s7 }
 0x558   :  { %807 = vrot.lane.b32.xlu1 %v653_v45, %s2751_s21 }
 0x560   :  { %828 = vrot.lane.b32.xlu1 %v778_v47, %s2758_s6 }
 0x568   :  { %824 = vrot.lane.b32.xlu1 %v753_v48, %s2751_s21 }
 0x570   :  { %815 = vrot.lane.b32.xlu1 %v703_v43, %s2759_s7  ;;  %v934_v43 = vld [vmem:[#allocation2 + $0x108] sm:$0xff] }
 0x571   :  { %1000 = vmatpush.msra.mxu2 %v934_v43 }
 0x579   :  { %v628_v59 = vpop.f32.mrf.mxu2 }
 0x581   :  { %v728_v61 = vpop.f32.mrf.mxu2 }
 0x58d   :  { %v812_v4 = vpop.permute.xlu0 %811 }
 0x5c2   :  { %v833_v56 = vpop.permute.xlu1 %832 }
 0x5ca   :  { %v808_v58 = vpop.permute.xlu1 %807 }
 0x5cb   :  { %v818_v2 = vsel %vm300_vm10, %v628_v59, %v808_v58  ;;  %v883_v59 = vld [vmem:[#allocation5 + $0x16] ss:$0 sm:$0xff] }
 0x5cc   :  { %v820_v6 = vsel %vm819_vm14, %v818_v2, %v812_v4 }
 0x5d2   :  { %v829_v60 = vpop.permute.xlu1 %828 }
 0x5da   :  { %v825_v62 = vpop.permute.xlu1 %824 }
 0x5db   :  { %v835_v63 = vsel %vm300_vm10, %v728_v61, %v825_v62 }
 0x5dc   :  { %v836_v1 = vsel %vm819_vm14, %v835_v63, %v829_v60 }
 0x5dd   :  { %v837_v3 = vsel %vm3338_vm15, %v836_v1, %v833_v56  ;;  %v884_v1 = vld [vmem:[#allocation5 + $0x17] ss:$0 sm:$0xff] }
 0x5de   :  { %v839_v7 = vrot.slane %v837_v3, 3 }
 0x5e2   :  { %v816_v9 = vpop.permute.xlu1 %815 }
 0x5e3   :  { %v822_v10 = vsel %vm3338_vm15, %v820_v6, %v816_v9 }
 0x5e4   :  { %v841_v11 = vsel %vm608_vm11, %v822_v10, %v839_v7 }
 0x5e5   :  { %2502 = vmatmul.msk.f32.vlgmr.msrb.gmra.mxu2 %vm77_vm0, %v841_v11 }
 0x5ed   :  { %2503 = vmatmul.msk.f32.gmra.mxu2 %vm77_vm0, %v839_v7 }
 0x668   :  { %v872_v12 = vpop.f32.mrf.mxu2 }
 0x669   :  { %v878_v14 = vadd.f32 %v872_v12, %v2803_v32  ;;  %v950_v12 = vld [vmem:[#allocation5 + $0x20] ss:$8 sm:$0x3] }
 0x66b   :  { %v2950_v5 = vadd.f32 %v880_v13, %v878_v14  ;;  %v1215_v14 = vld [vmem:[#allocation2 + $0x370] sm:$0xff] }
 0x66c   :  { %1240 = vmatpush.msrb.mxu2 %v1215_v14 }
 0x66d   :  { %v885_v15 = vsel %vm77_vm0, %v2950_v5, 0.0 }
 0x66e   :  { %886 = vadd.xlane.f32.xlu2 %v885_v15  ;;  %v952_v15 = vperm.slane %v950_v12, 0 }
 0x670   :  { %v875_v0 = vpop.f32.mrf.mxu2 }
 0x671   :  { %v879_v16 = vadd.f32 %v875_v0, %v2807_v38  ;;  %v953_v0 = vperm.slane %v950_v12, 1 }
 0x673   :  { %v2955_v8 = vadd.f32 %v880_v13, %v879_v16  ;;  %v1199_v13 = vld [vmem:[#allocation2 + $0x270] sm:$0xff]  ;;  %v1198_v16 = vld [vmem:[#allocation2 + $0x260] sm:$0xff] }
 0x674   :  { %1217 = vmatpush.msra.mxu1 %v1199_v13 }
 0x675   :  { %v888_v17 = vsel %vm135_vm1, %v2955_v8, 0.0 }
 0x676   :  { %889 = vadd.xlane.f32.xlu1 %v888_v17  ;;  %v1214_v17 = vld [vmem:[#allocation2 + $0x360] sm:$0xff]  ;;  %1218 = vmatpush.msra.mxu1 %v1198_v16 }
 0x677   :  { %1241 = vmatpush.msrb.mxu2 %v1214_v17 }
 0x6e1   :  { %v887_v18 = vpop.xlane.xlu2 %886 }
 0x6e2   :  { %v891_v19 = vmul.f32 %v887_v18, %v2811_v46  ;;  %v1197_v18 = vld [vmem:[#allocation2 + $0x250] sm:$0xff] }
 0x6e3   :  { %1219 = vmatpush.msra.mxu1 %v1197_v18 }
 0x6e4   :  { %v2961_v32 = vsub.f32 %v2950_v5, %v891_v19  ;;  %v1213_v19 = vld [vmem:[#allocation2 + $0x350] sm:$0xff] }
 0x6e5   :  { %1242 = vmatpush.msrb.mxu2 %v1213_v19 }
 0x6e6   :  { %v895_v20 = vmul.f32 %v2961_v32, %v2961_v32 }
 0x6e8   :  { %v897_v21 = vsel %vm77_vm0, %v895_v20, 0.0 }
 0x6e9   :  { %898 = vadd.xlane.f32.xlu2 %v897_v21  ;;  %v890_v22 = vpop.xlane.xlu1 %889 }
 0x6ea   :  { %v892_v38 = vmul.f32 %v890_v22, %v2811_v46 }
 0x6ec   :  { %v2968_v23 = vsub.f32 %v2955_v8, %v892_v38  ;;  %v1196_v38 = vld [vmem:[#allocation2 + $0x240] sm:$0xff] }
 0x6ed   :  { %1220 = vmatpush.msra.mxu1 %v1196_v38 }
 0x6ee   :  { %v896_v24 = vmul.f32 %v2968_v23, %v2968_v23 }
 0x6ef   :  { %1221 = vmatpush.msra.mxu1 %v1195_v26 }
 0x6f0   :  { %v900_v25 = vsel %vm135_vm1, %v896_v24, 0.0 }
 0x6f1   :  { %901 = vadd.xlane.f32.xlu0 %v900_v25  ;;  %1222 = vmatpush.msra.mxu1 %v1194_v30  ;;  %v1186_v30 = vld [vmem:[#allocation2 + $0x1a0] sm:$0xff] }
 0x6f3   :  { %1223 = vmatpush.msra.mxu1 %v1193_v35 }
 0x75c   :  { %v899_v44 = vpop.xlane.xlu2 %898 }
 0x75d   :  { %v903_v45 = vmul.f32 %v899_v44, %v2811_v46 }
 0x75f   :  { %v905_v47 = vadd.f32 1e-05, %v903_v45 }
 0x761   :  { %2609 = vrsqrt.f32 %v905_v47  ;;  %vm913_vm3 = vweird.f32 %v905_v47 }
 0x764   :  { %v902_v48 = vpop.xlane.xlu0 %901 }
 0x765   :  { %v904_v49 = vmul.f32 %v902_v48, %v2811_v46  ;;  %v1208_v48 = vld [vmem:[#allocation2 + $0x300] sm:$0xff] }
 0x767   :  { %v2610_v50 = vpop.eup %2609  ;;  %v906_v51 = vadd.f32 1e-05, %v904_v49 }
 0x768   :  { %v908_v52 = vmul.f32 %v2610_v50, %v905_v47  ;;  %vm914_vm2 = vweird.f32 %v2610_v50  ;;  %v1192_v47 = vld [vmem:[#allocation2 + $0x200] sm:$0xff] }
 0x769   :  { %2611 = vrsqrt.f32 %v906_v51  ;;  %vm915_vm4 = vmor %vm913_vm3, %vm914_vm2  ;;  %vm923_vm6 = vweird.f32 %v906_v51  ;;  %1224 = vmatpush.msra.mxu1 %v1192_v47 }
 0x76a   :  { %v909_v53 = vmul.f32 %v2610_v50, %v908_v52 }
 0x76c   :  { %v910_v54 = vmul.f32 0.5, %v909_v53 }
 0x76e   :  { %v911_v55 = vsub.f32 1.5, %v910_v54 }
 0x76f   :  { %v2612_v56 = vpop.eup %2611 }
 0x770   :  { %v912_v57 = vmul.f32 %v2610_v50, %v911_v55  ;;  %v918_v58 = vmul.f32 %v2612_v56, %v906_v51  ;;  %vm924_vm5 = vweird.f32 %v2612_v56 }
 0x771   :  { %vm925_vm7 = vmor %vm923_vm6, %vm924_vm5 }
 0x772   :  { %v916_v60 = vsel %vm915_vm4, %v2610_v50, %v912_v57  ;;  %v919_v61 = vmul.f32 %v2612_v56, %v918_v58  ;;  %v1191_v58 = vld [vmem:[#allocation2 + $0x1f0] sm:$0xff] }
 0x773   :  { %v927_v62 = vmul.f32 %v916_v60, %v2961_v32  ;;  %v1190_v60 = vld [vmem:[#allocation2 + $0x1e0] sm:$0xff]  ;;  %1225 = vmatpush.msra.mxu1 %v1191_v58 }
 0x774   :  { %v920_v63 = vmul.f32 0.5, %v919_v61 }
 0x775   :  { %v929_v2 = vmul.f32 %v927_v62, %v883_v59  ;;  %1226 = vmatpush.msra.mxu1 %v1190_v60 }
 0x776   :  { %v921_v3 = vsub.f32 1.5, %v920_v63  ;;  %v1206_v63 = vld [vmem:[#allocation2 + $0x2e0] sm:$0xff] }
 0x777   :  { %v931_v4 = vadd.f32 %v929_v2, %v884_v1 }
 0x778   :  { %v922_v6 = vmul.f32 %v2612_v56, %v921_v3 }
 0x779   :  { %2504 = vmatmul.msk.f32.vlgmr.msrb.gmra.mxu3 %vm77_vm0, %v931_v4  ;;  %2506 = vmatmul.msk.f32.vlgmr.msra.gmra.mxu2 %vm77_vm0, %v931_v4 }
 0x77a   :  { %v926_v7 = vsel %vm925_vm7, %v2612_v56, %v922_v6 }
 0x77b   :  { %v928_v9 = vmul.f32 %v926_v7, %v2968_v23  ;;  %v1212_v23 = vld [vmem:[#allocation2 + $0x340] sm:$0xff] }
 0x77c   :  { %1243 = vmatpush.msrb.mxu2 %v1212_v23 }
 0x77d   :  { %v930_v10 = vmul.f32 %v928_v9, %v883_v59  ;;  %v1207_v59 = vld [vmem:[#allocation2 + $0x2f0] sm:$0xff] }
 0x77e   :  { %1244 = vmatpush.msrb.mxu2 %v1211_v27  ;;  %v1189_v9 = vld [vmem:[#allocation2 + $0x1d0] sm:$0xff] }
 0x77f   :  { %v932_v11 = vadd.f32 %v930_v10, %v884_v1  ;;  %v1205_v10 = vld [vmem:[#allocation2 + $0x2d0] sm:$0xff]  ;;  %1227 = vmatpush.msra.mxu1 %v1189_v9 }
 0x780   :  { %1245 = vmatpush.msrb.mxu2 %v1210_v31 }
 0x781   :  { %2505 = vmatmul.msk.f32.gmra.mxu3 %vm77_vm0, %v932_v11  ;;  %2507 = vmatmul.msk.f32.gmra.mxu2 %vm77_vm0, %v932_v11 }
 0x782   :  { %1246 = vmatpush.msrb.mxu2 %v1209_v36 }
 0x784   :  { %1247 = vmatpush.msrb.mxu2 %v1208_v48 }
 0x786   :  { %1248 = vmatpush.msrb.mxu2 %v1207_v59 }
 0x788   :  { %1249 = vmatpush.msrb.mxu2 %v1206_v63 }
 0x78a   :  { %1250 = vmatpush.msrb.mxu2 %v1205_v10 }
 0x7fc   :  { %v979_v32 = vpop.f32.mrf.mxu3  ;;  %v1002_v20 = vpop.f32.mrf.mxu2 }
 0x7fd   :  { %v2981_v21 = vadd.f32 %v979_v32, %v952_v15  ;;  %v2983_v22 = vadd.f32 %v1002_v20, %v953_v0 }
 0x7ff   :  { %v2986_v24 = vmul.f32 0.70710677, %v2981_v21  ;;  %v2989_v25 = vmul.f32 0.70710677, %v2983_v22 }
 0x801   :  { %v1016_v28 = vmul.f32 %v2986_v24, %v2986_v24  ;;  %v1056_v29 = vmul.f32 %v2989_v25, %v2989_v25 }
 0x803   :  { %v2995_v33 = vmin.f32 %v1016_v28, 16.0  ;;  %v2997_v34 = vmin.f32 %v1056_v29, 16.0  ;;  %v1187_v28 = vld [vmem:[#allocation2 + $0x1b0] sm:$0xff] }
 0x804   :  { %v982_v37 = vpop.f32.mrf.mxu3  ;;  %v1005_v39 = vpop.f32.mrf.mxu2  ;;  %v1203_v29 = vld [vmem:[#allocation2 + $0x2b0] sm:$0xff] }
 0x805   :  { %v1018_v40 = vmul.f32 2.1237322e-06, %v2995_v33  ;;  %v1029_v41 = vmul.f32 3.8918573e-05, %v2995_v33  ;;  %v1058_v42 = vmul.f32 2.1237322e-06, %v2997_v34  ;;  %v3002_v43 = vadd.f32 %v982_v37, %v952_v15 }
 0x806   :  { %v1069_v44 = vmul.f32 3.8918573e-05, %v2997_v34  ;;  %v3005_v45 = vadd.f32 %v1005_v39, %v953_v0  ;;  %v1188_v15 = vld [vmem:[#allocation2 + $0x1c0] sm:$0xff] }
 0x807   :  { %v1019_v49 = vadd.f32 0.00028619796, %v1018_v40  ;;  %v1030_v50 = vadd.f32 0.001143296, %v1029_v41  ;;  %v1059_v51 = vadd.f32 0.00028619796, %v1058_v42  ;;  %1228 = vmatpush.msra.mxu1 %v1188_v15 }
 0x808   :  { %v1070_v52 = vadd.f32 0.001143296, %v1069_v44  ;;  %v3008_v53 = vmul.f32 0.70710677, %v3002_v43  ;;  %v3014_v57 = vmul.f32 0.70710677, %v3005_v45 }
 0x809   :  { %v1020_v54 = vmul.f32 %v1019_v49, %v2995_v33  ;;  %v1031_v55 = vmul.f32 %v1030_v50, %v2995_v33  ;;  %v1060_v56 = vmul.f32 %v1059_v51, %v2997_v34  ;;  %v1204_v0 = vld [vmem:[#allocation2 + $0x2c0] sm:$0xff]  ;;  %1229 = vmatpush.msra.mxu1 %v1187_v28  ;;  %v1185_v40 = vld [vmem:[#allocation2 + $0x190] sm:$0xff] }
 0x80a   :  { %v1071_v61 = vmul.f32 %v1070_v52, %v2997_v34  ;;  %v1096_v62 = vmul.f32 %v3008_v53, %v3008_v53  ;;  %v1136_v4 = vmul.f32 %v3014_v57, %v3014_v57  ;;  %1251 = vmatpush.msrb.mxu2 %v1204_v0  ;;  %v1202_v37 = vld [vmem:[#allocation2 + $0x2a0] sm:$0xff]  ;;  %v1201_v41 = vld [vmem:[#allocation2 + $0x290] sm:$0xff] }
 0x80b   :  { %v1021_v1 = vadd.f32 0.0036580483, %v1020_v54  ;;  %v1032_v2 = vadd.f32 0.014752088, %v1031_v55  ;;  %v1061_v3 = vadd.f32 0.0036580483, %v1060_v56  ;;  %1230 = vmatpush.msra.mxu1 %v1186_v30 }
 0x80c   :  { %v1072_v6 = vadd.f32 0.014752088, %v1071_v61  ;;  %v3021_v7 = vmin.f32 %v1096_v62, 16.0  ;;  %v3026_v14 = vmin.f32 %v1136_v4, 16.0  ;;  %1252 = vmatpush.msrb.mxu2 %v1203_v29  ;;  %v1184_v51 = vld [vmem:[#allocation2 + $0x180] sm:$0xff] }
 0x80d   :  { %v1022_v11 = vmul.f32 %v1021_v1, %v2995_v33  ;;  %v1033_v12 = vmul.f32 %v1032_v2, %v2995_v33  ;;  %v1062_v13 = vmul.f32 %v1061_v3, %v2997_v34  ;;  %v1200_v52 = vld [vmem:[#allocation2 + $0x280] sm:$0xff]  ;;  %1231 = vmatpush.msra.mxu1 %v1185_v40 }
 0x80e   :  { %v1073_v16 = vmul.f32 %v1072_v6, %v2997_v34  ;;  %v1098_v17 = vmul.f32 2.1237322e-06, %v3021_v7  ;;  %v1109_v18 = vmul.f32 3.8918573e-05, %v3021_v7  ;;  %v1138_v26 = vmul.f32 2.1237322e-06, %v3026_v14  ;;  %1253 = vmatpush.msrb.mxu2 %v1202_v37 }
 0x80f   :  { %v1023_v19 = vadd.f32 0.05243302, %v1022_v11  ;;  %v1034_v32 = vadd.f32 0.112945676, %v1033_v12  ;;  %v1063_v20 = vadd.f32 0.05243302, %v1062_v13  ;;  %1232 = vmatpush.msra.mxu1 %v1184_v51 }
 0x810   :  { %v1074_v38 = vadd.f32 0.112945676, %v1073_v16  ;;  %v1099_v23 = vadd.f32 0.00028619796, %v1098_v17  ;;  %v1110_v31 = vadd.f32 0.001143296, %v1109_v18  ;;  %1254 = vmatpush.msrb.mxu2 %v1201_v41 }
 0x811   :  { %v1035_v27 = vmul.f32 %v1034_v32, %v2995_v33  ;;  %v1024_v35 = vmul.f32 %v1023_v19, %v2995_v33  ;;  %v1064_v49 = vmul.f32 %v1063_v20, %v2997_v34  ;;  %v1139_v50 = vadd.f32 0.00028619796, %v1138_v26 }
 0x812   :  { %v1075_v36 = vmul.f32 %v1074_v38, %v2997_v34  ;;  %v1111_v42 = vmul.f32 %v1110_v31, %v3021_v7  ;;  %v1100_v47 = vmul.f32 %v1099_v23, %v3021_v7  ;;  %v1149_v58 = vmul.f32 3.8918573e-05, %v3026_v14  ;;  %1255 = vmatpush.msrb.mxu2 %v1200_v52 }
 0x813   :  { %v1036_v39 = vadd.f32 0.4994258, %v1035_v27  ;;  %v1025_v55 = vadd.f32 0.18741608, %v1024_v35  ;;  %v1065_v1 = vadd.f32 0.18741608, %v1064_v49  ;;  %v1140_v2 = vmul.f32 %v1139_v50, %v3026_v14 }
 0x814   :  { %v1076_v44 = vadd.f32 0.4994258, %v1075_v36  ;;  %v1112_v54 = vadd.f32 0.014752088, %v1111_v42  ;;  %v1101_v61 = vadd.f32 0.0036580483, %v1100_v47 }
 0x815   :  { %v1037_v48 = vmul.f32 %v1036_v39, %v2995_v33  ;;  %v1150_v63 = vadd.f32 0.001143296, %v1149_v58  ;;  %v1026_v3 = vmul.f32 %v1025_v55, %v2995_v33  ;;  %v1066_v10 = vmul.f32 %v1065_v1, %v2997_v34 }
 0x816   :  { %v1077_v56 = vmul.f32 %v1076_v44, %v2997_v34  ;;  %v1113_v62 = vmul.f32 %v1112_v54, %v3021_v7  ;;  %v1102_v4 = vmul.f32 %v1101_v61, %v3021_v7  ;;  %v1141_v11 = vadd.f32 0.0036580483, %v1140_v2 }
 0x817   :  { %v1038_v59 = vadd.f32 1.0, %v1037_v48  ;;  %v1151_v9 = vmul.f32 %v1150_v63, %v3026_v14  ;;  %v1027_v12 = vadd.f32 1.1283791, %v1026_v3  ;;  %v1067_v32 = vadd.f32 1.1283791, %v1066_v10 }
 0x818   :  { %v1078_v60 = vadd.f32 1.0, %v1077_v56  ;;  %v1114_v6 = vadd.f32 0.112945676, %v1113_v62  ;;  %v1103_v18 = vadd.f32 0.05243302, %v1102_v4  ;;  %v1142_v20 = vmul.f32 %v1141_v11, %v3026_v14 }
 0x819   :  { %2613 = vrcp.f32 %v1038_v59  ;;  %v1152_v15 = vadd.f32 0.014752088, %v1151_v9  ;;  %v1028_v23 = vmul.f32 %v1027_v12, %v2986_v24  ;;  %v1048_v34 = vand.u32 2147483647, %v1038_v59 }
 0x81a   :  { %2615 = vrcp.f32 %v1078_v60  ;;  %v1115_v13 = vmul.f32 %v1114_v6, %v3021_v7  ;;  %v1050_v28 = vand.u32 2147483648, %v1038_v59  ;;  %v1090_v30 = vand.u32 2147483648, %v1078_v60 }
 0x81b   :  { %v1153_v38 = vmul.f32 %v1152_v15, %v3026_v14  ;;  %v1104_v36 = vmul.f32 %v1103_v18, %v3021_v7  ;;  %v1088_v40 = vand.u32 2147483647, %v1078_v60  ;;  %vm1044_vm3 = vweird.f32 %v1038_v59 }
 0x81c   :  { %v1116_v19 = vadd.f32 0.4994258, %v1115_v13  ;;  %vm1084_vm4 = vweird.f32 %v1078_v60  ;;  %vm1049_vm6 = vcmp.eq.f32.partialorder %v1048_v34, 8.507059e+37  ;;  %v1051_v24 = vor.u32 1.1754944e-38, %v1050_v28 }
 0x81d   :  { %v1154_v31 = vadd.f32 0.112945676, %v1153_v38  ;;  %v1091_v49 = vor.u32 1.1754944e-38, %v1090_v30  ;;  %v1105_v50 = vadd.f32 0.18741608, %v1104_v36  ;;  %v1068_v54 = vmul.f32 %v1067_v32, %v2989_v25 }
 0x81e   :  { %v1117_v27 = vmul.f32 %v1116_v19, %v3021_v7  ;;  %v1143_v51 = vadd.f32 0.05243302, %v1142_v20  ;;  %vm1089_vm15 = vcmp.eq.f32.partialorder %v1088_v40, 8.507059e+37  ;;  %v1008_v6 = vmul.f32 0.5, %v2981_v21 }
 0x81f   :  { %v2614_v0 = vpop.eup %2613  ;;  %v1155_v41 = vmul.f32 %v1154_v31, %v3026_v14  ;;  %v1106_v63 = vmul.f32 %v1105_v50, %v3021_v7  ;;  %v1009_v25 = vmul.f32 0.5, %v2983_v22  ;;  %v1010_v31 = vmul.f32 0.5, %v3002_v43  ;;  %v1216_v43 = vld [vmem:[#allocation5 + $0x21] ss:$0 sm:$0xff] }
 0x820   :  { %v2616_v16 = vpop.eup %2615  ;;  %v1040_v17 = vmul.f32 %v2614_v0, %v1038_v59  ;;  %vm1045_vm8 = vweird.f32 %v2614_v0  ;;  %v1118_v37 = vadd.f32 1.0, %v1117_v27  ;;  %v1144_v1 = vmul.f32 %v1143_v51, %v3026_v14 }
 0x821   :  { %v1080_v33 = vmul.f32 %v2616_v16, %v1078_v60  ;;  %vm1085_vm2 = vweird.f32 %v2616_v16  ;;  %vm1046_vm5 = vmor %vm1044_vm3, %vm1045_vm8  ;;  %v1156_v47 = vadd.f32 0.4994258, %v1155_v41  ;;  %v1107_v13 = vadd.f32 1.1283791, %v1106_v63 }
 0x822   :  { %v1041_v26 = vsub.f32 1.0, %v1040_v17  ;;  %2617 = vrcp.f32 %v1118_v37  ;;  %vm1086_vm7 = vmor %vm1084_vm4, %vm1085_vm2  ;;  %v1145_v15 = vadd.f32 0.18741608, %v1144_v1  ;;  %v1128_v7 = vand.u32 2147483647, %v1118_v37 }
 0x823   :  { %v1081_v29 = vsub.f32 1.0, %v1080_v33  ;;  %v1157_v59 = vmul.f32 %v1156_v47, %v3026_v14  ;;  %vm1124_vm8 = vweird.f32 %v1118_v37  ;;  %v1108_v22 = vmul.f32 %v1107_v13, %v3008_v53 }
 0x824   :  { %v1042_v35 = vmul.f32 %v2614_v0, %v1041_v26  ;;  %v1146_v21 = vmul.f32 %v1145_v15, %v3026_v14  ;;  %vm1129_vm3 = vcmp.eq.f32.partialorder %v1128_v7, 8.507059e+37  ;;  %v1323_v15 = vld [vmem:[#allocation2 + $0x3c0] sm:$0xff]  ;;  %v1322_v7 = vld [vmem:[#allocation2 + $0x3b8] sm:$0xff] }
 0x825   :  { %v1082_v39 = vmul.f32 %v2616_v16, %v1081_v29  ;;  %v1158_v2 = vadd.f32 1.0, %v1157_v59 }
 0x826   :  { %v1043_v42 = vadd.f32 %v2614_v0, %v1042_v35  ;;  %v1147_v34 = vadd.f32 1.1283791, %v1146_v21  ;;  %v1320_v21 = vld [vmem:[#allocation2 + $0x3a8] sm:$0xff] }
 0x827   :  { %v1083_v44 = vadd.f32 %v2616_v16, %v1082_v39  ;;  %2619 = vrcp.f32 %v1158_v2  ;;  %v1170_v27 = vand.u32 2147483648, %v1158_v2  ;;  %v1168_v30 = vand.u32 2147483647, %v1158_v2 }
 0x828   :  { %v1047_v48 = vsel %vm1046_vm5, %v2614_v0, %v1043_v42  ;;  %v2618_v61 = vpop.eup %2617  ;;  %v1130_v0 = vand.u32 2147483648, %v1118_v37  ;;  %vm1164_vm5 = vweird.f32 %v1158_v2  ;;  %v1148_v53 = vmul.f32 %v1147_v34, %v3014_v57 }
 0x829   :  { %v1052_v52 = vsel %vm1049_vm6, %v1051_v24, %v1047_v48  ;;  %v1087_v55 = vsel %vm1086_vm7, %v2616_v16, %v1083_v44  ;;  %v1120_v4 = vmul.f32 %v2618_v61, %v1118_v37  ;;  %v1171_v36 = vor.u32 1.1754944e-38, %v1170_v27 }
 0x82a   :  { %v1053_v56 = vmul.f32 %v1052_v52, %v1028_v23  ;;  %v1092_v58 = vsel %vm1089_vm15, %v1091_v49, %v1087_v55  ;;  %vm1125_vm15 = vweird.f32 %v2618_v61  ;;  %v1131_v32 = vor.u32 1.1754944e-38, %v1130_v0  ;;  %v1324_v0 = vld [vmem:[#allocation2 + $0x3c8] sm:$0xff] }
 0x82b   :  { %v1093_v60 = vmul.f32 %v1092_v58, %v1068_v54  ;;  %v1121_v11 = vsub.f32 1.0, %v1120_v4  ;;  %vm1126_vm2 = vmor %vm1124_vm8, %vm1125_vm15  ;;  %vm1169_vm7 = vcmp.eq.f32.partialorder %v1168_v30, 8.507059e+37  ;;  %v1011_v24 = vmul.f32 0.5, %v3005_v45 }
 0x82c   :  { %v2508_v62 = vclamps-f32 %v1053_v56, 1.0 }
 0x82d   :  { %v2509_v3 = vclamps-f32 %v1093_v60, 1.0  ;;  %v1122_v17 = vmul.f32 %v2618_v61, %v1121_v11  ;;  %v2620_v19 = vpop.eup %2619  ;;  %v1325_v11 = vld [vmem:[#allocation2 + $0x3d0] sm:$0xff] }
 0x82e   :  { %v1176_v9 = vadd.f32 1.0, %v2508_v62  ;;  %v1160_v20 = vmul.f32 %v2620_v19, %v1158_v2  ;;  %vm1165_vm4 = vweird.f32 %v2620_v19 }
 0x82f   :  { %v1177_v10 = vadd.f32 1.0, %v2509_v3  ;;  %v1123_v18 = vadd.f32 %v2618_v61, %v1122_v17  ;;  %vm1166_vm6 = vmor %vm1164_vm5, %vm1165_vm4  ;;  %v1321_v17 = vld [vmem:[#allocation2 + $0x3b0] sm:$0xff] }
 0x830   :  { %v1180_v12 = vmul.f32 %v1176_v9, %v1008_v6  ;;  %v1161_v26 = vsub.f32 1.0, %v1160_v20  ;;  %v1329_v6 = vld [vmem:[#allocation2 + $0x3f0] sm:$0xff]  ;;  %v1330_v9 = vld [vmem:[#allocation2 + $0x3f8] sm:$0xff]  ;;  %v1316_v20 = vld [vmem:[#allocation2 + $0x388] sm:$0xff] }
 0x831   :  { %v1181_v16 = vmul.f32 %v1177_v10, %v1009_v25  ;;  %v1127_v33 = vsel %vm1126_vm2, %v2618_v61, %v1123_v18  ;;  %1352 = vmatpush.msra.mxu3 %v1329_v6  ;;  %1375 = vmatpush.msra.mxu0 %v1330_v9  ;;  %v1327_v25 = vld [vmem:[#allocation2 + $0x3e0] sm:$0xff]  ;;  %v1328_v10 = vld [vmem:[#allocation2 + $0x3e8] sm:$0xff] }
 0x832   :  { %1233 = vmatmul.f32.vlgmr.msra.gmra.mxu1 %v1180_v12  ;;  %v1132_v38 = vsel %vm1129_vm3, %v1131_v32, %v1127_v33  ;;  %v1162_v29 = vmul.f32 %v2620_v19, %v1161_v26  ;;  %v1326_v12 = vld [vmem:[#allocation2 + $0x3d8] sm:$0xff]  ;;  %v1317_v32 = vld [vmem:[#allocation2 + $0x390] sm:$0xff]  ;;  %v1315_v33 = vld [vmem:[#allocation2 + $0x380] sm:$0xff] }
 0x833   :  { %1256 = vmatmul.f32.vlgmr.msrb.gmra.mxu2 %v1181_v16  ;;  %v1133_v23 = vmul.f32 %v1132_v38, %v1108_v22  ;;  %1353 = vmatpush.msra.mxu3 %v1327_v25  ;;  %v1318_v22 = vld [vmem:[#allocation2 + $0x398] sm:$0xff] }
 0x834   :  { %v1163_v14 = vadd.f32 %v2620_v19, %v1162_v29  ;;  %1376 = vmatpush.msra.mxu0 %v1328_v10 }
 0x835   :  { %v2510_v28 = vclamps-f32 %v1133_v23, 1.0  ;;  %1354 = vmatpush.msra.mxu3 %v1325_v11 }
 0x836   :  { %v1167_v39 = vsel %vm1166_vm6, %v2620_v19, %v1163_v14  ;;  %1377 = vmatpush.msra.mxu0 %v1326_v12  ;;  %v1319_v19 = vld [vmem:[#allocation2 + $0x3a0] sm:$0xff] }
 0x837   :  { %v1178_v35 = vadd.f32 1.0, %v2510_v28  ;;  %v1172_v40 = vsel %vm1169_vm7, %v1171_v36, %v1167_v39  ;;  %1355 = vmatpush.msra.mxu3 %v1323_v15 }
 0x838   :  { %v1173_v41 = vmul.f32 %v1172_v40, %v1148_v53  ;;  %1378 = vmatpush.msra.mxu0 %v1324_v0  ;;  %v1266_v53 = vld [vmem:[#allocation5 + $0x23] ss:$0 sm:$0xff] }
 0x839   :  { %v1182_v37 = vmul.f32 %v1178_v35, %v1010_v31  ;;  %1356 = vmatpush.msra.mxu3 %v1321_v17  ;;  %v1265_v31 = vld [vmem:[#allocation5 + $0x22] ss:$0 sm:$0xff] }
 0x83a   :  { %v2511_v42 = vclamps-f32 %v1173_v41, 1.0  ;;  %1379 = vmatpush.msra.mxu0 %v1322_v7 }
 0x83b   :  { %1236 = vmatmul.f32.gmra.mxu1 %v1182_v37  ;;  %1357 = vmatpush.msra.mxu3 %v1319_v19 }
 0x83c   :  { %v1179_v44 = vadd.f32 1.0, %v2511_v42  ;;  %1380 = vmatpush.msra.mxu0 %v1320_v21 }
 0x83d   :  { %1358 = vmatpush.msra.mxu3 %v1317_v32 }
 0x83e   :  { %v1183_v47 = vmul.f32 %v1179_v44, %v1011_v24  ;;  %1381 = vmatpush.msra.mxu0 %v1318_v22 }
 0x83f   :  { %1359 = vmatpush.msra.mxu3 %v1315_v33 }
 0x840   :  { %1259 = vmatmul.f32.gmra.mxu2 %v1183_v47  ;;  %1382 = vmatpush.msra.mxu0 %v1316_v20 }
 0x8af   :  { %v1234_v48 = vpop.f32.mrf.mxu1 }
 0x8b0   :  { %v1235_v49 = vadd.f32 %v1234_v48, %v1216_v43 }
 0x8b6   :  { %v1257_v50 = vpop.f32.mrf.mxu2 }
 0x8b7   :  { %v1258_v51 = vadd.f32 %v1257_v50, %v1235_v49 }
 0x8b8   :  { %v1237_v54 = vpop.f32.mrf.mxu1 }
 0x8b9   :  { %v3066_v52 = vadd.f32 %v1258_v51, %v2950_v5  ;;  %v1238_v55 = vadd.f32 %v1237_v54, %v1216_v43  ;;  %v1332_v51 = vld [vmem:[#allocation5 + $0x24] ss:$8 sm:$0x3] }
 0x8ba   :  { %v1335_v12 = vperm.slane %v1332_v51, 1 }
 0x8bb   :  { %v1267_v57 = vsel %vm77_vm0, %v3066_v52, 0.0 }
 0x8bc   :  { %1268 = vadd.xlane.f32.xlu2 %v1267_v57  ;;  %v1334_v57 = vperm.slane %v1332_v51, 0 }
 0x8c3   :  { %v1260_v56 = vpop.f32.mrf.mxu2 }
 0x8c4   :  { %v1261_v58 = vadd.f32 %v1260_v56, %v1238_v55 }
 0x8c6   :  { %v3071_v45 = vadd.f32 %v1261_v58, %v2955_v8 }
 0x8c8   :  { %v1270_v59 = vsel %vm135_vm1, %v3071_v45, 0.0 }
 0x8c9   :  { %1271 = vadd.xlane.f32.xlu2 %v1270_v59 }
 0x92f   :  { %v1269_v60 = vpop.xlane.xlu2 %1268 }
 0x930   :  { %v1273_v61 = vmul.f32 %v1269_v60, %v2811_v46 }
 0x932   :  { %v1275_v5 = vsub.f32 %v3066_v52, %v1273_v61 }
 0x934   :  { %v1277_v62 = vmul.f32 %v1275_v5, %v1275_v5 }
 0x936   :  { %v1279_v63 = vsel %vm77_vm0, %v1277_v62, 0.0 }
 0x937   :  { %1280 = vadd.xlane.f32.xlu2 %v1279_v63 }
 0x93c   :  { %v1272_v1 = vpop.xlane.xlu2 %1271 }
 0x93d   :  { %v1274_v2 = vmul.f32 %v1272_v1, %v2811_v46 }
 0x93f   :  { %v3080_v3 = vsub.f32 %v3071_v45, %v1274_v2 }
 0x941   :  { %v1278_v8 = vmul.f32 %v3080_v3, %v3080_v3 }
 0x943   :  { %v1282_v4 = vsel %vm135_vm1, %v1278_v8, 0.0 }
 0x944   :  { %1283 = vadd.xlane.f32.xlu2 %v1282_v4 }
 0x9aa   :  { %v1281_v13 = vpop.xlane.xlu2 %1280 }
 0x9ab   :  { %v1285_v16 = vmul.f32 %v1281_v13, %v2811_v46 }
 0x9ad   :  { %v1287_v18 = vadd.f32 1e-05, %v1285_v16 }
 0x9af   :  { %2621 = vrsqrt.f32 %v1287_v18  ;;  %vm1295_vm8 = vweird.f32 %v1287_v18 }
 0x9b5   :  { %v2622_v38 = vpop.eup %2621 }
 0x9b6   :  { %v1290_v23 = vmul.f32 %v2622_v38, %v1287_v18  ;;  %vm1296_vm15 = vweird.f32 %v2622_v38 }
 0x9b7   :  { %v1284_v29 = vpop.xlane.xlu2 %1283  ;;  %vm1297_vm2 = vmor %vm1295_vm8, %vm1296_vm15 }
 0x9b8   :  { %v1291_v26 = vmul.f32 %v2622_v38, %v1290_v23  ;;  %v1286_v30 = vmul.f32 %v1284_v29, %v2811_v46 }
 0x9ba   :  { %v1292_v34 = vmul.f32 0.5, %v1291_v26  ;;  %v1288_v36 = vadd.f32 1e-05, %v1286_v30 }
 0x9bc   :  { %v1293_v27 = vsub.f32 1.5, %v1292_v34  ;;  %2623 = vrsqrt.f32 %v1288_v36  ;;  %vm1305_vm4 = vweird.f32 %v1288_v36 }
 0x9be   :  { %v1294_v28 = vmul.f32 %v2622_v38, %v1293_v27 }
 0x9c0   :  { %v1298_v35 = vsel %vm1297_vm2, %v2622_v38, %v1294_v28 }
 0x9c1   :  { %v1309_v14 = vmul.f32 %v1298_v35, %v1275_v5 }
 0x9c2   :  { %v2624_v40 = vpop.eup %2623 }
 0x9c3   :  { %v1311_v37 = vmul.f32 %v1309_v14, %v1265_v31  ;;  %v1300_v41 = vmul.f32 %v2624_v40, %v1288_v36  ;;  %vm1306_vm3 = vweird.f32 %v2624_v40 }
 0x9c4   :  { %vm1307_vm5 = vmor %vm1305_vm4, %vm1306_vm3 }
 0x9c5   :  { %v1313_v39 = vadd.f32 %v1311_v37, %v1266_v53  ;;  %v1301_v42 = vmul.f32 %v2624_v40, %v1300_v41 }
 0x9c7   :  { %2512 = vmatmul.msk.f32.vlgmr.msra.gmra.mxu3 %vm77_vm0, %v1313_v39  ;;  %2514 = vmatmul.msk.f32.vlgmr.msra.gmra.mxu0 %vm77_vm0, %v1313_v39  ;;  %v1302_v24 = vmul.f32 0.5, %v1301_v42 }
 0x9c9   :  { %v1303_v44 = vsub.f32 1.5, %v1302_v24 }
 0x9cb   :  { %v1304_v47 = vmul.f32 %v2624_v40, %v1303_v44 }
 0x9cd   :  { %v1308_v43 = vsel %vm1307_vm5, %v2624_v40, %v1304_v47 }
 0x9ce   :  { %v1310_v48 = vmul.f32 %v1308_v43, %v3080_v3 }
 0x9d0   :  { %v1312_v49 = vmul.f32 %v1310_v48, %v1265_v31 }
 0x9d2   :  { %v1314_v50 = vadd.f32 %v1312_v49, %v1266_v53 }
 0x9d4   :  { %2513 = vmatmul.msk.f32.gmra.mxu3 %vm77_vm0, %v1314_v50  ;;  %2515 = vmatmul.msk.f32.gmra.mxu0 %vm77_vm0, %v1314_v50 }
 0xa44   :  { %v1384_v25 = vpop.f32.mrf.mxu0 }
 0xa45   :  { %v3117_v15 = vadd.f32 %v1384_v25, %v1335_v12 }
 0xa47   :  { %v1415_v17 = vrot.slane %v3117_v15, 5 }
 0xa4a   :  { %v1361_v54 = vpop.f32.mrf.mxu3 }
 0xa4b   :  { %v1362_v55 = vadd.f32 %v1361_v54, %v1334_v57 }
 0xa4d   :  { %1393 = vrot.lane.b32.xlu2 %v1362_v55, %s2756_s4  ;;  %1395 = vrot.lane.b32.xlu1 %v1362_v55, %s2755_s30  ;;  %v1398_v59 = vrot.slane %v1362_v55, 5 }
 0xa51   :  { %v1387_v11 = vpop.f32.mrf.mxu0 }
 0xa52   :  { %v1388_v13 = vadd.f32 %v1387_v11, %v1335_v12 }
 0xa54   :  { %v1416_v0 = vrot.slane %v1388_v13, 5 }
 0xa55   :  { %1391 = vrot.lane.b32.xlu2 %v1362_v55, %s2754_s0 }
 0xa56   :  { %v3124_v7 = vsel %vm271_vm9, %v1415_v17, %v1416_v0 }
 0xa57   :  { %v1364_v56 = vpop.f32.mrf.mxu3 }
 0xa58   :  { %v1365_v58 = vadd.f32 %v1364_v56, %v1334_v57 }
 0xa5a   :  { %v1399_v60 = vrot.slane %v1365_v58, 5 }
 0xa5c   :  { %v1400_v61 = vsel %vm271_vm9, %v1398_v59, %v1399_v60  ;;  %vm3339_vm9 = vcmask 392192  }
 0xa5d   :  { %1405 = vrot.lane.b32.xlu1 %v1400_v61, %s2755_s30  ;;  %1403 = vrot.lane.b32.xlu0 %v1400_v61, %s2756_s4 }
 0xa65   :  { %1424 = vrot.lane.b32.xlu1 %v1362_v55, %s2757_s5  ;;  %1401 = vrot.lane.b32.xlu0 %v1400_v61, %s2754_s0 }
 0xaa7   :  { %v1394_v5 = vpop.permute.xlu2 %1393 }
 0xaa8   :  { %1476 = vrot.lane.b32.xlu0 %v1394_v5, %s2757_s5 }
 0xaaf   :  { %v1392_v62 = vpop.permute.xlu2 %1391 }
 0xab0   :  { %1450 = vrot.lane.b32.xlu0 %v1392_v62, %s2757_s5 }
 0xabf   :  { %v1396_v63 = vpop.permute.xlu1 %1395 }
 0xac0   :  { %1502 = vrot.lane.b32.xlu2 %v1396_v63, %s2757_s5 }
 0xacf   :  { %v1406_v1 = vpop.permute.xlu1 %1405  ;;  %v1404_v2 = vpop.permute.xlu0 %1403 }
 0xad0   :  { %1606 = vrot.lane.b32.xlu2 %v1406_v1, %s2757_s5  ;;  %1580 = vrot.lane.b32.xlu1 %v1404_v2, %s2757_s5 }
 0xad7   :  { %v1425_v3 = vpop.permute.xlu1 %1424  ;;  %v1402_v8 = vpop.permute.xlu0 %1401 }
 0xad8   :  { %1528 = vrot.lane.b32.xlu2 %v1400_v61, %s2757_s5  ;;  %2516 = vmatpush.xpose.msk.msrb.mxu3 %vm300_vm10, %v1425_v3 }
 0xad9   :  { %1554 = vrot.lane.b32.xlu1 %v1402_v8, %s2757_s5 }
 0xadb   :  { %2517 = vmatmul.msk.f32.vlgmr.msrb.gmra.mxu3 %vm300_vm10, %v1362_v55 }
 0xb1a   :  { %v1477_v4 = vpop.permute.xlu0 %1476  ;;  %v1503_v6 = vpop.permute.xlu2 %1502 }
 0xb1b   :  { %2520 = vmatpush.xpose.msk.msrb.mxu1 %vm300_vm10, %v1477_v4  ;;  %2522 = vmatpush.xpose.msk.msra.mxu3 %vm300_vm10, %v1503_v6 }
 0xb1e   :  { %2521 = vmatmul.msk.f32.vlgmr.msrb.gmra.mxu1 %vm300_vm10, %v1394_v5  ;;  %2523 = vmatmul.msk.f32.vlgmr.msra.gmra.mxu3 %vm300_vm10, %v1396_v63 }
 0xb22   :  { %v1451_v9 = vpop.permute.xlu0 %1450 }
 0xb23   :  { %2518 = vmatpush.xpose.msk.msrb.mxu0 %vm300_vm10, %v1451_v9 }
 0xb26   :  { %2519 = vmatmul.msk.f32.vlgmr.msrb.gmra.mxu0 %vm300_vm10, %v1392_v62 }
 0xb2a   :  { %v1607_v10 = vpop.permute.xlu2 %1606 }
 0xb2b   :  { %2530 = vmatpush.xpose.msk.msrb.mxu3 %vm300_vm10, %v1607_v10 }
 0xb2e   :  { %2531 = vmatmul.msk.f32.vlgmr.msrb.gmra.mxu3 %vm300_vm10, %v1406_v1 }
 0xb32   :  { %v1529_v16 = vpop.permute.xlu2 %1528 }
 0xb33   :  { %2524 = vmatpush.xpose.msk.msra.mxu0 %vm300_vm10, %v1529_v16 }
 0xb36   :  { %2525 = vmatmul.msk.f32.vlgmr.msra.gmra.mxu0 %vm300_vm10, %v1400_v61 }
 0xb37   :  { %2532 = vmatpush.msk.msrb.mxu0 %vm608_vm11, %v3117_v15 }
 0xb39   :  { %2540 = vmatpush.msk.msra.mxu0 %vm608_vm11, %v3124_v7 }
 0xb42   :  { %v1581_v18 = vpop.permute.xlu1 %1580 }
 0xb43   :  { %2528 = vmatpush.xpose.msk.msra.mxu2 %vm300_vm10, %v1581_v18 }
 0xb46   :  { %2529 = vmatmul.msk.f32.vlgmr.msra.gmra.mxu2 %vm300_vm10, %v1404_v2 }
 0xb4b   :  { %v1555_v19 = vpop.permute.xlu1 %1554 }
 0xb4c   :  { %2526 = vmatpush.xpose.msk.msra.mxu1 %vm300_vm10, %v1555_v19 }
 0xb4f   :  { %2527 = vmatmul.msk.f32.vlgmr.msra.gmra.mxu1 %vm300_vm10, %v1402_v8 }
 0xb5e   :  { %v1447_v21 = vpop.f32.mrf.mxu3 }
 0xb5f   :  { %v3133_v32 = vmul.f32 0.25, %v1447_v21 }
 0xb61   :  { %v1640_v22 = vsel %vm515_vm12, %v3133_v32, -inf }
 0xb62   :  { %1641 = vmax.xlane.f32.xlu0 %v1640_v22 }
 0xb9b   :  { %v1499_v33 = vpop.f32.mrf.mxu1 }
 0xb9c   :  { %v1634_v20 = vmul.f32 0.25, %v1499_v33 }
 0xb9e   :  { %v1646_v38 = vsel %vm515_vm12, %v1634_v20, -inf }
 0xb9f   :  { %1647 = vmax.xlane.f32.xlu0 %v1646_v38 }
 0xba1   :  { %v1525_v23 = vpop.f32.mrf.mxu3 }
 0xba2   :  { %v1635_v26 = vmul.f32 0.25, %v1525_v23 }
 0xba3   :  { %v1473_v34 = vpop.f32.mrf.mxu0 }
 0xba4   :  { %v1633_v27 = vmul.f32 0.25, %v1473_v34  ;;  %v1649_v28 = vsel %vm515_vm12, %v1635_v26, -inf }
 0xba5   :  { %1650 = vmax.xlane.f32.xlu1 %v1649_v28 }
 0xba6   :  { %v1643_v29 = vsel %vm515_vm12, %v1633_v27, -inf }
 0xba7   :  { %1644 = vmax.xlane.f32.xlu2 %v1643_v29 }
 0xbb1   :  { %v1629_v14 = vpop.f32.mrf.mxu3 }
 0xbb2   :  { %v1639_v36 = vmul.f32 0.25, %v1629_v14 }
 0xbb3   :  { %v1551_v30 = vpop.f32.mrf.mxu0 }
 0xbb4   :  { %v3140_v31 = vmul.f32 0.25, %v1551_v30  ;;  %v1661_v53 = vsel %vm515_vm12, %v1639_v36, -inf }
 0xbb6   :  { %v1652_v35 = vsel %vm515_vm12, %v3140_v31, -inf }
 0xbb7   :  { %1653 = vmax.xlane.f32.xlu1 %v1652_v35 }
 0xbbf   :  { %1662 = vmax.xlane.f32.xlu1 %v1661_v53 }
 0xbc9   :  { %v1603_v37 = vpop.f32.mrf.mxu2 }
 0xbca   :  { %v1638_v39 = vmul.f32 0.25, %v1603_v37 }
 0xbcc   :  { %v1577_v40 = vpop.f32.mrf.mxu1  ;;  %v1658_v41 = vsel %vm515_vm12, %v1638_v39, -inf }
 0xbcd   :  { %v1637_v42 = vmul.f32 0.25, %v1577_v40  ;;  %1659 = vmax.xlane.f32.xlu0 %v1658_v41 }
 0xbcf   :  { %v1655_v24 = vsel %vm515_vm12, %v1637_v42, -inf }
 0xbd0   :  { %1656 = vmax.xlane.f32.xlu2 %v1655_v24 }
 0xbd5   :  { %v1642_v44 = vpop.xlane.xlu0 %1641 }
 0xbe1   :  { %1410 = vrot.lane.b32.xlu0 %v3117_v15, %s2756_s4 }
 0xbe8   :  { %1412 = vrot.lane.b32.xlu2 %v3117_v15, %s2755_s30 }
 0xc12   :  { %v1648_v47 = vpop.xlane.xlu0 %1647 }
 0xc13   :  { %v1666_v43 = vsub.f32 %v1634_v20, %v1648_v47  ;;  %v1664_v20 = vsub.f32 %v3133_v32, %v1642_v44 }
 0xc15   :  { %v1676_v48 = vmul.f32 1.442695, %v1666_v43  ;;  %v1672_v38 = vmul.f32 1.442695, %v1664_v20 }
 0xc17   :  { %2625 = vpow2.f32 %v1676_v48 }
 0xc18   :  { %v1651_v49 = vpop.xlane.xlu1 %1650 }
 0xc19   :  { %v1667_v50 = vsub.f32 %v1635_v26, %v1651_v49 }
 0xc1a   :  { %v1645_v51 = vpop.xlane.xlu2 %1644 }
 0xc1b   :  { %v1678_v57 = vmul.f32 1.442695, %v1667_v50  ;;  %v1665_v54 = vsub.f32 %v1633_v27, %v1645_v51 }
 0xc1d   :  { %v2626_v55 = vpop.eup %2625  ;;  %2627 = vpow2.f32 %v1678_v57  ;;  %v1674_v56 = vmul.f32 1.442695, %v1665_v54 }
 0xc1e   :  { %v1694_v58 = vsel %vm515_vm12, %v2626_v55, 0.0 }
 0xc1f   :  { %2629 = vpow2.f32 %v1674_v56  ;;  %1695 = vadd.xlane.f32.xlu2 %v1694_v58 }
 0xc23   :  { %v2628_v59 = vpop.eup %2627 }
 0xc24   :  { %v1697_v60 = vsel %vm515_vm12, %v2628_v59, 0.0 }
 0xc25   :  { %v3153_v61 = vpop.eup %2629  ;;  %1698 = vadd.xlane.f32.xlu0 %v1697_v60 }
 0xc26   :  { %v1691_v5 = vsel %vm515_vm12, %v3153_v61, 0.0 }
 0xc27   :  { %1692 = vadd.xlane.f32.xlu1 %v1691_v5  ;;  %v1969_v5 = vld [vmem:[#allocation2 + $0x470] sm:$0xff] }
 0xc2a   :  { %v1654_v62 = vpop.xlane.xlu1 %1653 }
 0xc2b   :  { %v1668_v16 = vsub.f32 %v3140_v31, %v1654_v62  ;;  %v1968_v62 = vld [vmem:[#allocation2 + $0x460] sm:$0xff] }
 0xc2d   :  { %v1680_v19 = vmul.f32 1.442695, %v1668_v16 }
 0xc32   :  { %v1663_v2 = vpop.xlane.xlu1 %1662 }
 0xc33   :  { %v1671_v6 = vsub.f32 %v1639_v36, %v1663_v2  ;;  %v1965_v2 = vld [vmem:[#allocation2 + $0x430] sm:$0xff] }
 0xc35   :  { %v1686_v25 = vmul.f32 1.442695, %v1671_v6  ;;  %v1962_v6 = vld [vmem:[#allocation2 + $0x400] sm:$0xff] }
 0xc39   :  { %1420 = vrot.lane.b32.xlu0 %v3124_v7, %s2756_s4 }
 0xc40   :  { %v1660_v63 = vpop.xlane.xlu0 %1659 }
 0xc41   :  { %1418 = vrot.lane.b32.xlu0 %v3124_v7, %s2754_s0  ;;  %v1670_v1 = vsub.f32 %v1638_v39, %v1660_v63  ;;  %v1967_v63 = vld [vmem:[#allocation2 + $0x450] sm:$0xff] }
 0xc43   :  { %v1684_v3 = vmul.f32 1.442695, %v1670_v1  ;;  %v1657_v8 = vpop.xlane.xlu2 %1656  ;;  %v1966_v1 = vld [vmem:[#allocation2 + $0x440] sm:$0xff] }
 0xc44   :  { %v1669_v4 = vsub.f32 %v1637_v42, %v1657_v8 }
 0xc45   :  { %2631 = vpow2.f32 %v1684_v3  ;;  %v1964_v3 = vld [vmem:[#allocation2 + $0x420] sm:$0xff] }
 0xc46   :  { %v1682_v9 = vmul.f32 1.442695, %v1669_v4  ;;  %v1963_v4 = vld [vmem:[#allocation2 + $0x410] sm:$0xff] }
 0xc48   :  { %2633 = vpow2.f32 %v1682_v9 }
 0xc49   :  { %2635 = vpow2.f32 %v1686_v25 }
 0xc4a   :  { %2637 = vpow2.f32 %v1680_v19 }
 0xc4b   :  { %v2632_v10 = vpop.eup %2631  ;;  %v1413_v11 = vpop.permute.xlu2 %1412  ;;  %2639 = vpow2.f32 %v1672_v38 }
 0xc4c   :  { %2538 = vmatpush.msk.msra.mxu3 %vm608_vm11, %v1413_v11  ;;  %v1706_v12 = vsel %vm515_vm12, %v2632_v10, 0.0 }
 0xc4d   :  { %1707 = vadd.xlane.f32.xlu2 %v1706_v12 }
 0xc4e   :  { %v2634_v13 = vpop.eup %2633 }
 0xc4f   :  { %v1703_v0 = vsel %vm515_vm12, %v2634_v13, 0.0  ;;  %v2636_v18 = vpop.eup %2635 }
 0xc50   :  { %1704 = vadd.xlane.f32.xlu1 %v1703_v0  ;;  %v1709_v21 = vsel %vm515_vm12, %v2636_v18, 0.0  ;;  %v2638_v22 = vpop.eup %2637 }
 0xc51   :  { %v1700_v33 = vsel %vm515_vm12, %v2638_v22, 0.0  ;;  %v2640_v23 = vpop.eup %2639 }
 0xc52   :  { %v1688_v34 = vsel %vm515_vm12, %v2640_v23, 0.0  ;;  %vm3340_vm12 = vmmov %vm3339_vm9 }
 0xc53   :  { %v1411_v17 = vpop.permute.xlu0 %1410 }
 0xc54   :  { %2536 = vmatpush.msk.msrb.mxu2 %vm608_vm11, %v1411_v17 }
 0xc58   :  { %1710 = vadd.xlane.f32.xlu1 %v1709_v21 }
 0xc65   :  { %1422 = vrot.lane.b32.xlu2 %v3124_v7, %s2755_s30 }
 0xc6b   :  { %1701 = vadd.xlane.f32.xlu0 %v1700_v33 }
 0xc71   :  { %1408 = vrot.lane.b32.xlu1 %v3117_v15, %s2754_s0 }
 0xc8e   :  { %1689 = vadd.xlane.f32.xlu2 %v1688_v34 }
 0xc92   :  { %v1696_v26 = vpop.xlane.xlu2 %1695 }
 0xc93   :  { %2641 = vrcp.f32 %v1696_v26 }
 0xc98   :  { %v1699_v27 = vpop.xlane.xlu0 %1698 }
 0xc99   :  { %v2642_v28 = vpop.eup %2641  ;;  %2643 = vrcp.f32 %v1699_v27 }
 0xc9a   :  { %v1722_v29 = vmul.f32 %v2642_v28, %v2626_v55  ;;  %v1693_v32 = vpop.xlane.xlu1 %1692 }
 0xc9c   :  { %2537 = vmatmul.msk.f32.vlgmr.msrb.gmra.mxu2 %vm604_vm13, %v1722_v29 }
 0xc9f   :  { %v2644_v7 = vpop.eup %2643 }
 0xca0   :  { %v1723_v30 = vmul.f32 %v2644_v7, %v2628_v59 }
 0xca2   :  { %2539 = vmatmul.msk.f32.vlgmr.msra.gmra.mxu3 %vm604_vm13, %v1723_v30 }
 0xcab   :  { %v1421_v15 = vpop.permute.xlu0 %1420 }
 0xcac   :  { %2544 = vmatpush.msk.msra.mxu2 %vm608_vm11, %v1421_v15 }
 0xcb3   :  { %v1419_v44 = vpop.permute.xlu0 %1418 }
 0xcc0   :  { %v1708_v31 = vpop.xlane.xlu2 %1707 }
 0xcc1   :  { %2645 = vrcp.f32 %v1708_v31 }
 0xcc3   :  { %v1705_v35 = vpop.xlane.xlu1 %1704 }
 0xcc7   :  { %v2646_v14 = vpop.eup %2645 }
 0xcc8   :  { %v1726_v36 = vmul.f32 %v2646_v14, %v2632_v10  ;;  %v1423_v53 = vpop.permute.xlu2 %1422 }
 0xcc9   :  { %2546 = vmatpush.msk.msrb.mxu3 %vm608_vm11, %v1423_v53 }
 0xcca   :  { %2545 = vmatmul.msk.f32.vlgmr.msra.gmra.mxu2 %vm604_vm13, %v1726_v36 }
 0xccb   :  { %v1711_v37 = vpop.xlane.xlu1 %1710 }
 0xccc   :  { %2647 = vrcp.f32 %v1711_v37 }
 0xccd   :  { %2649 = vrcp.f32 %v1693_v32 }
 0xcce   :  { %2651 = vrcp.f32 %v1705_v35 }
 0xcd2   :  { %v2648_v39 = vpop.eup %2647 }
 0xcd3   :  { %v1727_v40 = vmul.f32 %v2648_v39, %v2636_v18  ;;  %v2650_v41 = vpop.eup %2649  ;;  %v2067_v39 = vld [vmem:[#allocation2 + $0x4f0] sm:$0xff] }
 0xcd4   :  { %v1721_v42 = vmul.f32 %v2650_v41, %v3153_v61  ;;  %v2652_v47 = vpop.eup %2651  ;;  %v2065_v41 = vld [vmem:[#allocation2 + $0x4e0] sm:$0xff] }
 0xcd5   :  { %2547 = vmatmul.msk.f32.vlgmr.msrb.gmra.mxu3 %vm604_vm13, %v1727_v40  ;;  %v1725_v43 = vmul.f32 %v2652_v47, %v2634_v13  ;;  %v2068_v40 = vld [vmem:[#allocation2 + $0x4f8] sm:$0xff]  ;;  %v2061_v47 = vld [vmem:[#allocation2 + $0x4c0] sm:$0xff] }
 0xcd6   :  { %2113 = vmatpush.msrb.mxu2 %v2068_v40 }
 0xcde   :  { %v1702_v49 = vpop.xlane.xlu0 %1701 }
 0xce3   :  { %v1409_v24 = vpop.permute.xlu1 %1408 }
 0xce4   :  { %2534 = vmatpush.msk.msrb.mxu1 %vm608_vm11, %v1409_v24  ;;  %v2063_v24 = vld [vmem:[#allocation2 + $0x4d0] sm:$0xff] }
 0xce5   :  { %2535 = vmatmul.msk.f32.vlgmr.msrb.gmra.mxu1 %vm604_vm13, %v1721_v42  ;;  %v2066_v42 = vld [vmem:[#allocation2 + $0x4e8] sm:$0xff] }
 0xce6   :  { %2542 = vmatpush.msk.msra.mxu1 %vm608_vm11, %v1419_v44  ;;  %2114 = vmatpush.msrb.mxu2 %v2066_v42  ;;  %v2064_v44 = vld [vmem:[#allocation2 + $0x4d8] sm:$0xff]  ;;  %v2312_v42 = vld [vmem:[#allocation2 + $0x580] sm:$0xff] }
 0xce8   :  { %2090 = vmatpush.msrb.mxu1 %v2067_v39  ;;  %2115 = vmatpush.msrb.mxu2 %v2064_v44 }
 0xcea   :  { %2091 = vmatpush.msrb.mxu1 %v2065_v41 }
 0xcec   :  { %2092 = vmatpush.msrb.mxu1 %v2063_v24  ;;  %v2331_v24 = vld [vmem:[#allocation2 + $0x6b0] sm:$0xff] }
 0xced   :  { %2543 = vmatmul.msk.f32.vlgmr.msra.gmra.mxu1 %vm604_vm13, %v1725_v43  ;;  %v2062_v43 = vld [vmem:[#allocation2 + $0x4c8] sm:$0xff] }
 0xcee   :  { %2093 = vmatpush.msrb.mxu1 %v2061_v47  ;;  %2116 = vmatpush.msrb.mxu2 %v2062_v43 }
 0xd01   :  { %v1690_v48 = vpop.xlane.xlu2 %1689 }
 0xd02   :  { %2653 = vrcp.f32 %v1690_v48  ;;  %v2059_v48 = vld [vmem:[#allocation2 + $0x4b0] sm:$0xff] }
 0xd03   :  { %2655 = vrcp.f32 %v1702_v49  ;;  %v2060_v49 = vld [vmem:[#allocation2 + $0x4b8] sm:$0xff]  ;;  %2094 = vmatpush.msrb.mxu1 %v2059_v48 }
 0xd04   :  { %2117 = vmatpush.msrb.mxu2 %v2060_v49  ;;  %v2311_v49 = vld [vmem:[#allocation2 + $0x570] sm:$0xff] }
 0xd08   :  { %v2654_v50 = vpop.eup %2653 }
 0xd09   :  { %v1720_v51 = vmul.f32 %v2654_v50, %v2640_v23  ;;  %v2656_v57 = vpop.eup %2655  ;;  %v2000_v23 = vld [vmem:[#allocation5 + $0x25] ss:$0 sm:$0xff] }
 0xd0a   :  { %v1724_v54 = vmul.f32 %v2656_v57, %v2638_v22  ;;  %v2057_v50 = vld [vmem:[#allocation2 + $0x4a0] sm:$0xff]  ;;  %v2055_v57 = vld [vmem:[#allocation2 + $0x490] sm:$0xff] }
 0xd0b   :  { %2533 = vmatmul.msk.f32.vlgmr.msrb.gmra.mxu0 %vm604_vm13, %v1720_v51  ;;  %v2058_v51 = vld [vmem:[#allocation2 + $0x4a8] sm:$0xff]  ;;  %2095 = vmatpush.msrb.mxu1 %v2057_v50 }
 0xd0c   :  { %1983 = vmatpush.msrb.mxu0 %v1969_v5  ;;  %2118 = vmatpush.msrb.mxu2 %v2058_v51  ;;  %v2330_v51 = vld [vmem:[#allocation2 + $0x6a0] sm:$0xff] }
 0xd0d   :  { %2096 = vmatpush.msrb.mxu1 %v2055_v57 }
 0xd0e   :  { %1984 = vmatpush.msrb.mxu0 %v1968_v62 }
 0xd10   :  { %1985 = vmatpush.msrb.mxu0 %v1967_v63 }
 0xd12   :  { %1986 = vmatpush.msrb.mxu0 %v1966_v1 }
 0xd13   :  { %2541 = vmatmul.msk.f32.vlgmr.msra.gmra.mxu0 %vm604_vm13, %v1724_v54  ;;  %v2056_v54 = vld [vmem:[#allocation2 + $0x498] sm:$0xff] }
 0xd14   :  { %1987 = vmatpush.msrb.mxu0 %v1965_v2  ;;  %2119 = vmatpush.msrb.mxu2 %v2056_v54 }
 0xd16   :  { %1988 = vmatpush.msrb.mxu0 %v1964_v3 }
 0xd18   :  { %1989 = vmatpush.msrb.mxu0 %v1963_v4 }
 0xd1a   :  { %1990 = vmatpush.msrb.mxu0 %v1962_v6 }
 0xd1f   :  { %v1800_v58 = vpop.f32.mrf.mxu2 }
 0xd25   :  { %v1825_v55 = vpop.f32.mrf.mxu3 }
 0xd26   :  { %1937 = vrot.lane.b32.xlu2 %v1825_v55, %s2759_s7  ;;  %v2053_v55 = vld [vmem:[#allocation2 + $0x480] sm:$0xff] }
 0xd27   :  { %2097 = vmatpush.msrb.mxu1 %v2053_v55  ;;  %v2310_v55 = vld [vmem:[#allocation2 + $0x560] sm:$0xff] }
 0xd4d   :  { %v1900_v60 = vpop.f32.mrf.mxu2 }
 0xd58   :  { %v1925_v61 = vpop.f32.mrf.mxu3 }
 0xd62   :  { %v1775_v56 = vpop.f32.mrf.mxu1 }
 0xd63   :  { %1929 = vrot.lane.b32.xlu1 %v1775_v56, %s2751_s21  ;;  %v2054_v56 = vld [vmem:[#allocation2 + $0x488] sm:$0xff] }
 0xd64   :  { %2120 = vmatpush.msrb.mxu2 %v2054_v56 }
 0xd6a   :  { %v1875_v59 = vpop.f32.mrf.mxu1 }
 0xd6b   :  { %1944 = vrot.lane.b32.xlu1 %v1875_v59, %s2751_s21 }
 0xd73   :  { %1948 = vrot.lane.b32.xlu1 %v1900_v60, %s2758_s6 }
 0xd7b   :  { %1952 = vrot.lane.b32.xlu1 %v1925_v61, %s2759_s7 }
 0xd80   :  { %v1938_v19 = vpop.permute.xlu2 %1937 }
 0xd83   :  { %1933 = vrot.lane.b32.xlu1 %v1800_v58, %s2758_s6 }
 0xd88   :  { %v1750_v10 = vpop.f32.mrf.mxu0 }
 0xd90   :  { %v1850_v12 = vpop.f32.mrf.mxu0 }
 0xdd5   :  { %v1930_v8 = vpop.permute.xlu1 %1929 }
 0xdd6   :  { %v1940_v17 = vsel %vm300_vm10, %v1750_v10, %v1930_v8 }
 0xddd   :  { %v1945_v9 = vpop.permute.xlu1 %1944 }
 0xdde   :  { %v1955_v13 = vsel %vm300_vm10, %v1850_v12, %v1945_v9 }
 0xde5   :  { %v1949_v25 = vpop.permute.xlu1 %1948 }
 0xde6   :  { %v1956_v0 = vsel %vm819_vm14, %v1955_v13, %v1949_v25  ;;  %v2003_v25 = vld [vmem:[#allocation5 + $0x26] ss:$0 sm:$0xff] }
 0xded   :  { %v1953_v11 = vpop.permute.xlu1 %1952 }
 0xdee   :  { %v1957_v16 = vsel %vm3339_vm9, %v1956_v0, %v1953_v11  ;;  %v2004_v0 = vld [vmem:[#allocation5 + $0x27] ss:$0 sm:$0xff] }
 0xdef   :  { %v1959_v21 = vrot.slane %v1957_v16, 3 }
 0xdf5   :  { %v1934_v18 = vpop.permute.xlu1 %1933 }
 0xdf6   :  { %v1941_v22 = vsel %vm819_vm14, %v1940_v17, %v1934_v18 }
 0xdf7   :  { %v1942_v33 = vsel %vm3340_vm12, %v1941_v22, %v1938_v19 }
 0xdf8   :  { %v1961_v20 = vsel %vm608_vm11, %v1942_v33, %v1959_v21 }
 0xdf9   :  { %2548 = vmatmul.msk.f32.vlgmr.msrb.gmra.mxu0 %vm77_vm0, %v1961_v20 }
 0xe01   :  { %2549 = vmatmul.msk.f32.gmra.mxu0 %vm77_vm0, %v1959_v21 }
 0xe76   :  { %v1992_v38 = vpop.f32.mrf.mxu0 }
 0xe77   :  { %v1998_v26 = vadd.f32 %v1992_v38, %v3066_v52  ;;  %v2319_v38 = vld [vmem:[#allocation2 + $0x5f0] sm:$0xff] }
 0xe78   :  { %2337 = vmatpush.msra.mxu3 %v2319_v38  ;;  %v2325_v38 = vld [vmem:[#allocation2 + $0x650] sm:$0xff] }
 0xe79   :  { %v3203_v34 = vadd.f32 %v2000_v23, %v1998_v26  ;;  %v2318_v26 = vld [vmem:[#allocation2 + $0x5e0] sm:$0xff] }
 0xe7a   :  { %2338 = vmatpush.msra.mxu3 %v2318_v26 }
 0xe7b   :  { %v2005_v27 = vsel %vm77_vm0, %v3203_v34, 0.0 }
 0xe7c   :  { %2006 = vadd.xlane.f32.xlu0 %v2005_v27 }
 0xe7e   :  { %v1995_v28 = vpop.f32.mrf.mxu0 }
 0xe7f   :  { %v1999_v29 = vadd.f32 %v1995_v28, %v3071_v45  ;;  %v2317_v28 = vld [vmem:[#allocation2 + $0x5d0] sm:$0xff] }
 0xe80   :  { %2339 = vmatpush.msra.mxu3 %v2317_v28 }
 0xe81   :  { %v2002_v7 = vadd.f32 %v2000_v23, %v1999_v29  ;;  %v3230_v23 = vld [vmem:[#allocation5 + $0x30] ss:$8 sm:$0x3]  ;;  %v2316_v29 = vld [vmem:[#allocation2 + $0x5c0] sm:$0xff] }
 0xe82   :  { %v2072_v27 = vperm.slane %v3230_v23, 0  ;;  %2340 = vmatpush.msra.mxu3 %v2316_v29 }
 0xe83   :  { %v2008_v30 = vsel %vm135_vm1, %v2002_v7, 0.0 }
 0xe84   :  { %2009 = vadd.xlane.f32.xlu0 %v2008_v30 }
 0xeef   :  { %v2007_v15 = vpop.xlane.xlu0 %2006 }
 0xef0   :  { %v2011_v32 = vmul.f32 %v2007_v15, %v2811_v46 }
 0xef2   :  { %v3211_v31 = vsub.f32 %v3203_v34, %v2011_v32  ;;  %v2315_v32 = vld [vmem:[#allocation2 + $0x5b0] sm:$0xff] }
 0xef3   :  { %2341 = vmatpush.msra.mxu3 %v2315_v32  ;;  %v2324_v32 = vld [vmem:[#allocation2 + $0x640] sm:$0xff] }
 0xef4   :  { %v2015_v52 = vmul.f32 %v3211_v31, %v3211_v31 }
 0xef6   :  { %v2017_v35 = vsel %vm77_vm0, %v2015_v52, 0.0 }
 0xef7   :  { %2018 = vadd.xlane.f32.xlu1 %v2017_v35  ;;  %v2010_v14 = vpop.xlane.xlu0 %2009  ;;  %v2073_v35 = vperm.slane %v3230_v23, 1 }
 0xef8   :  { %v2012_v36 = vmul.f32 %v2010_v14, %v2811_v46  ;;  %v2314_v14 = vld [vmem:[#allocation2 + $0x5a0] sm:$0xff] }
 0xef9   :  { %2342 = vmatpush.msra.mxu3 %v2314_v14 }
 0xefa   :  { %v3217_v45 = vsub.f32 %v2002_v7, %v2012_v36  ;;  %v2335_v7 = vld [vmem:[#allocation2 + $0x6f0] sm:$0xff] }
 0xefb   :  { %2359 = vmatpush.msra.mxu0 %v2335_v7  ;;  %v2333_v36 = vld [vmem:[#allocation2 + $0x6d0] sm:$0xff] }
 0xefc   :  { %v2016_v53 = vmul.f32 %v3217_v45, %v3217_v45 }
 0xefe   :  { %v2020_v37 = vsel %vm135_vm1, %v2016_v53, 0.0  ;;  %v2313_v53 = vld [vmem:[#allocation2 + $0x590] sm:$0xff] }
 0xeff   :  { %2021 = vadd.xlane.f32.xlu0 %v2020_v37  ;;  %v2332_v37 = vld [vmem:[#allocation2 + $0x6c0] sm:$0xff]  ;;  %2343 = vmatpush.msra.mxu3 %v2313_v53 }
 0xf01   :  { %2344 = vmatpush.msra.mxu3 %v2312_v42  ;;  %v2323_v42 = vld [vmem:[#allocation2 + $0x630] sm:$0xff] }
 0xf03   :  { %2345 = vmatpush.msra.mxu3 %v2311_v49  ;;  %v2322_v49 = vld [vmem:[#allocation2 + $0x620] sm:$0xff] }
 0xf05   :  { %2346 = vmatpush.msra.mxu3 %v2310_v55 }
 0xf6a   :  { %v2019_v58 = vpop.xlane.xlu1 %2018 }
 0xf6b   :  { %v2023_v59 = vmul.f32 %v2019_v58, %v2811_v46 }
 0xf6d   :  { %v2025_v60 = vadd.f32 1e-05, %v2023_v59  ;;  %v2329_v59 = vld [vmem:[#allocation2 + $0x690] sm:$0xff] }
 0xf6f   :  { %2657 = vrsqrt.f32 %v2025_v60  ;;  %vm2033_vm11 = vweird.f32 %v2025_v60 }
 0xf72   :  { %v2022_v61 = vpop.xlane.xlu0 %2021 }
 0xf73   :  { %v2024_v5 = vmul.f32 %v2022_v61, %v2811_v46 }
 0xf75   :  { %v2658_v62 = vpop.eup %2657  ;;  %v2026_v63 = vadd.f32 1e-05, %v2024_v5  ;;  %v2309_v5 = vld [vmem:[#allocation2 + $0x550] sm:$0xff] }
 0xf76   :  { %v2028_v1 = vmul.f32 %v2658_v62, %v2025_v60  ;;  %vm2034_vm10 = vweird.f32 %v2658_v62  ;;  %2347 = vmatpush.msra.mxu3 %v2309_v5 }
 0xf77   :  { %2659 = vrsqrt.f32 %v2026_v63  ;;  %vm2035_vm13 = vmor %vm2033_vm11, %vm2034_vm10  ;;  %vm2043_vm6 = vweird.f32 %v2026_v63 }
 0xf78   :  { %v2029_v2 = vmul.f32 %v2658_v62, %v2028_v1 }
 0xf7a   :  { %v2030_v3 = vmul.f32 0.5, %v2029_v2 }
 0xf7c   :  { %v2031_v8 = vsub.f32 1.5, %v2030_v3 }
 0xf7d   :  { %v2660_v4 = vpop.eup %2659 }
 0xf7e   :  { %v2032_v6 = vmul.f32 %v2658_v62, %v2031_v8  ;;  %v2038_v9 = vmul.f32 %v2660_v4, %v2026_v63  ;;  %vm2044_vm14 = vweird.f32 %v2660_v4 }
 0xf7f   :  { %vm2045_vm7 = vmor %vm2043_vm6, %vm2044_vm14 }
 0xf80   :  { %v2036_v10 = vsel %vm2035_vm13, %v2658_v62, %v2032_v6  ;;  %v2039_v11 = vmul.f32 %v2660_v4, %v2038_v9  ;;  %v2328_v62 = vld [vmem:[#allocation2 + $0x680] sm:$0xff]  ;;  %v2327_v9 = vld [vmem:[#allocation2 + $0x670] sm:$0xff] }
 0xf81   :  { %v2047_v12 = vmul.f32 %v2036_v10, %v3211_v31  ;;  %v2334_v31 = vld [vmem:[#allocation2 + $0x6e0] sm:$0xff] }
 0xf82   :  { %v2040_v13 = vmul.f32 0.5, %v2039_v11  ;;  %2360 = vmatpush.msra.mxu0 %v2334_v31  ;;  %v2308_v6 = vld [vmem:[#allocation2 + $0x540] sm:$0xff] }
 0xf83   :  { %v2049_v16 = vmul.f32 %v2047_v12, %v2003_v25  ;;  %2348 = vmatpush.msra.mxu3 %v2308_v6 }
 0xf84   :  { %v2041_v17 = vsub.f32 1.5, %v2040_v13  ;;  %2361 = vmatpush.msra.mxu0 %v2333_v36 }
 0xf85   :  { %v2051_v18 = vadd.f32 %v2049_v16, %v2004_v0  ;;  %v2307_v16 = vld [vmem:[#allocation2 + $0x530] sm:$0xff] }
 0xf86   :  { %v2042_v19 = vmul.f32 %v2660_v4, %v2041_v17  ;;  %2362 = vmatpush.msra.mxu0 %v2332_v37  ;;  %v2326_v17 = vld [vmem:[#allocation2 + $0x660] sm:$0xff]  ;;  %2349 = vmatpush.msra.mxu3 %v2307_v16 }
 0xf87   :  { %2550 = vmatmul.msk.f32.vlgmr.msrb.gmra.mxu1 %vm77_vm0, %v2051_v18  ;;  %2552 = vmatmul.msk.f32.vlgmr.msrb.gmra.mxu2 %vm77_vm0, %v2051_v18 }
 0xf88   :  { %v2046_v21 = vsel %vm2045_vm7, %v2660_v4, %v2042_v19  ;;  %2363 = vmatpush.msra.mxu0 %v2331_v24 }
 0xf89   :  { %v2048_v22 = vmul.f32 %v2046_v21, %v3217_v45 }
 0xf8a   :  { %2364 = vmatpush.msra.mxu0 %v2330_v51 }
 0xf8b   :  { %v2050_v33 = vmul.f32 %v2048_v22, %v2003_v25 }
 0xf8c   :  { %2365 = vmatpush.msra.mxu0 %v2329_v59  ;;  %v2321_v59 = vld [vmem:[#allocation2 + $0x610] sm:$0xff] }
 0xf8d   :  { %v2052_v20 = vadd.f32 %v2050_v33, %v2004_v0 }
 0xf8e   :  { %2366 = vmatpush.msra.mxu0 %v2328_v62 }
 0xf8f   :  { %2551 = vmatmul.msk.f32.gmra.mxu1 %vm77_vm0, %v2052_v20  ;;  %2553 = vmatmul.msk.f32.gmra.mxu2 %vm77_vm0, %v2052_v20  ;;  %v2306_v20 = vld [vmem:[#allocation2 + $0x520] sm:$0xff] }
 0xf90   :  { %2367 = vmatpush.msra.mxu0 %v2327_v9  ;;  %2350 = vmatpush.msra.mxu3 %v2306_v20 }
 0xf92   :  { %2368 = vmatpush.msra.mxu0 %v2326_v17 }
 0xf94   :  { %2369 = vmatpush.msra.mxu0 %v2325_v38 }
 0xf96   :  { %2370 = vmatpush.msra.mxu0 %v2324_v32 }
 0xf98   :  { %2371 = vmatpush.msra.mxu0 %v2323_v42 }
 0xf9a   :  { %2372 = vmatpush.msra.mxu0 %v2322_v49 }
 0xf9c   :  { %2373 = vmatpush.msra.mxu0 %v2321_v59 }
0x1004   :  { %v2099_v30 = vpop.f32.mrf.mxu1 }
0x1005   :  { %v3233_v15 = vadd.f32 %v2099_v30, %v2072_v27  ;;  %v2305_v30 = vld [vmem:[#allocation2 + $0x510] sm:$0xff] }
0x1006   :  { %2351 = vmatpush.msra.mxu3 %v2305_v30 }
0x1007   :  { %v3236_v52 = vmul.f32 0.70710677, %v3233_v15 }
0x1009   :  { %v2136_v45 = vmul.f32 %v3236_v52, %v3236_v52 }
0x100a   :  { %v2122_v39 = vpop.f32.mrf.mxu2 }
0x100b   :  { %v3241_v40 = vmin.f32 %v2136_v45, 16.0  ;;  %v3243_v41 = vadd.f32 %v2122_v39, %v2073_v35  ;;  %v2304_v39 = vld [vmem:[#allocation2 + $0x500] sm:$0xff] }
0x100c   :  { %v2102_v44 = vpop.f32.mrf.mxu1  ;;  %2352 = vmatpush.msra.mxu3 %v2304_v39 }
0x100d   :  { %v2138_v47 = vmul.f32 2.1237322e-06, %v3241_v40  ;;  %v2149_v43 = vmul.f32 3.8918573e-05, %v3241_v40  ;;  %v3247_v48 = vadd.f32 %v2102_v44, %v2072_v27  ;;  %v3250_v50 = vmul.f32 0.70710677, %v3243_v41 }
0x100f   :  { %v2139_v57 = vadd.f32 0.00028619796, %v2138_v47  ;;  %v2150_v54 = vadd.f32 0.001143296, %v2149_v43  ;;  %v2176_v56 = vmul.f32 %v3250_v50, %v3250_v50  ;;  %v3255_v58 = vmul.f32 0.70710677, %v3247_v48 }
0x1011   :  { %v2140_v60 = vmul.f32 %v2139_v57, %v3241_v40  ;;  %v2151_v61 = vmul.f32 %v2150_v54, %v3241_v40  ;;  %v3259_v63 = vmin.f32 %v2176_v56, 16.0  ;;  %v2216_v1 = vmul.f32 %v3255_v58, %v3255_v58 }
0x1012   :  { %v2125_v2 = vpop.f32.mrf.mxu2 }
0x1013   :  { %v2141_v3 = vadd.f32 0.0036580483, %v2140_v60  ;;  %v2152_v8 = vadd.f32 0.014752088, %v2151_v61  ;;  %v3263_v4 = vadd.f32 %v2125_v2, %v2073_v35  ;;  %v2178_v25 = vmul.f32 2.1237322e-06, %v3259_v63 }
0x1014   :  { %v2189_v10 = vmul.f32 3.8918573e-05, %v3259_v63  ;;  %v3267_v11 = vmin.f32 %v2216_v1, 16.0  ;;  %v2320_v61 = vld [vmem:[#allocation2 + $0x600] sm:$0xff] }
0x1015   :  { %v2142_v12 = vmul.f32 %v2141_v3, %v3241_v40  ;;  %v2153_v13 = vmul.f32 %v2152_v8, %v3241_v40  ;;  %v3272_v0 = vmul.f32 0.70710677, %v3263_v4  ;;  %v2179_v18 = vadd.f32 0.00028619796, %v2178_v25  ;;  %2374 = vmatpush.msra.mxu0 %v2320_v61 }
0x1016   :  { %v2190_v19 = vadd.f32 0.001143296, %v2189_v10  ;;  %v2218_v21 = vmul.f32 2.1237322e-06, %v3267_v11  ;;  %v2229_v28 = vmul.f32 3.8918573e-05, %v3267_v11 }
0x1017   :  { %v2154_v22 = vadd.f32 0.112945676, %v2153_v13  ;;  %v2256_v33 = vmul.f32 %v3272_v0, %v3272_v0  ;;  %v2180_v23 = vmul.f32 %v2179_v18, %v3259_v63  ;;  %v2143_v29 = vadd.f32 0.05243302, %v2142_v12 }
0x1018   :  { %v2191_v26 = vmul.f32 %v2190_v19, %v3259_v63  ;;  %v2219_v27 = vadd.f32 0.00028619796, %v2218_v21  ;;  %v2230_v36 = vadd.f32 0.001143296, %v2229_v28 }
0x1019   :  { %v2155_v7 = vmul.f32 %v2154_v22, %v3241_v40  ;;  %v2181_v31 = vadd.f32 0.0036580483, %v2180_v23  ;;  %v3282_v53 = vmin.f32 %v2256_v33, 16.0  ;;  %v2144_v44 = vmul.f32 %v2143_v29, %v3241_v40 }
0x101a   :  { %v2192_v35 = vadd.f32 0.014752088, %v2191_v26  ;;  %v2220_v14 = vmul.f32 %v2219_v27, %v3267_v11  ;;  %v2231_v24 = vmul.f32 %v2230_v36, %v3267_v11 }
0x101b   :  { %v2156_v45 = vadd.f32 0.4994258, %v2155_v7  ;;  %v2182_v43 = vmul.f32 %v2181_v31, %v3259_v63  ;;  %v2258_v56 = vmul.f32 2.1237322e-06, %v3282_v53  ;;  %v2145_v62 = vadd.f32 0.18741608, %v2144_v44 }
0x101c   :  { %v2193_v37 = vmul.f32 %v2192_v35, %v3259_v63  ;;  %v2221_v57 = vadd.f32 0.0036580483, %v2220_v14  ;;  %v2232_v54 = vadd.f32 0.014752088, %v2231_v24  ;;  %v2269_v2 = vmul.f32 3.8918573e-05, %v3282_v53 }
0x101d   :  { %v2157_v47 = vmul.f32 %v2156_v45, %v3241_v40  ;;  %v2183_v1 = vadd.f32 0.05243302, %v2182_v43  ;;  %v2259_v6 = vadd.f32 0.00028619796, %v2258_v56  ;;  %v2146_v10 = vmul.f32 %v2145_v62, %v3241_v40 }
0x101e   :  { %v2194_v51 = vadd.f32 0.112945676, %v2193_v37  ;;  %v2233_v5 = vmul.f32 %v2232_v54, %v3267_v11  ;;  %v2222_v8 = vmul.f32 %v2221_v57, %v3267_v11  ;;  %v2270_v16 = vadd.f32 0.001143296, %v2269_v2 }
0x101f   :  { %v2158_v55 = vadd.f32 1.0, %v2157_v47  ;;  %v2184_v12 = vmul.f32 %v2183_v1, %v3259_v63  ;;  %v2260_v21 = vmul.f32 %v2259_v6, %v3282_v53  ;;  %v2147_v38 = vadd.f32 1.1283791, %v2146_v10 }
0x1020   :  { %v2195_v60 = vmul.f32 %v2194_v51, %v3259_v63  ;;  %v2234_v9 = vadd.f32 0.112945676, %v2233_v5  ;;  %v2223_v18 = vadd.f32 0.05243302, %v2222_v8  ;;  %v2271_v33 = vmul.f32 %v2270_v16, %v3282_v53 }
0x1021   :  { %2661 = vrcp.f32 %v2158_v55  ;;  %v2185_v23 = vadd.f32 0.18741608, %v2184_v12  ;;  %v2168_v29 = vand.u32 2147483647, %v2158_v55  ;;  %v2170_v7 = vand.u32 2147483648, %v2158_v55 }
0x1022   :  { %v2196_v3 = vadd.f32 0.4994258, %v2195_v60  ;;  %v2235_v13 = vmul.f32 %v2234_v9, %v3267_v11  ;;  %v2224_v40 = vmul.f32 %v2223_v18, %v3267_v11  ;;  %v2272_v28 = vadd.f32 0.014752088, %v2271_v33 }
0x1023   :  { %v2261_v30 = vadd.f32 0.0036580483, %v2260_v21  ;;  %v2186_v14 = vmul.f32 %v2185_v23, %v3259_v63  ;;  %vm2164_vm8 = vweird.f32 %v2158_v55  ;;  %v2171_v39 = vor.u32 1.1754944e-38, %v2170_v7 }
0x1024   :  { %v2197_v25 = vmul.f32 %v2196_v3, %v3259_v63  ;;  %v2236_v22 = vadd.f32 0.4994258, %v2235_v13  ;;  %v2273_v35 = vmul.f32 %v2272_v28, %v3282_v53  ;;  %v2225_v37 = vadd.f32 0.18741608, %v2224_v40 }
0x1025   :  { %v2262_v24 = vmul.f32 %v2261_v30, %v3282_v53  ;;  %v2148_v44 = vmul.f32 %v2147_v38, %v3236_v52  ;;  %vm2169_vm3 = vcmp.eq.f32.partialorder %v2168_v29, 8.507059e+37  ;;  %v2187_v51 = vadd.f32 1.1283791, %v2186_v14 }
0x1026   :  { %v2198_v17 = vadd.f32 1.0, %v2197_v25  ;;  %v2237_v27 = vmul.f32 %v2236_v22, %v3267_v11  ;;  %v2274_v43 = vadd.f32 0.112945676, %v2273_v35  ;;  %v2128_v62 = vmul.f32 0.5, %v3233_v15 }
0x1027   :  { %v2662_v19 = vpop.eup %2661  ;;  %v2263_v61 = vadd.f32 0.05243302, %v2262_v24  ;;  %v2188_v2 = vmul.f32 %v2187_v51, %v3250_v50  ;;  %v2131_v51 = vmul.f32 0.5, %v3263_v4 }
0x1028   :  { %v2160_v20 = vmul.f32 %v2662_v19, %v2158_v55  ;;  %2663 = vrcp.f32 %v2198_v17  ;;  %vm2165_vm15 = vweird.f32 %v2662_v19  ;;  %v3302_v31 = vadd.f32 1.0, %v2237_v27 }
0x1029   :  { %vm2166_vm2 = vmor %vm2164_vm8, %vm2165_vm15  ;;  %v2210_v54 = vand.u32 2147483648, %v2198_v17  ;;  %v2226_v55 = vmul.f32 %v2225_v37, %v3267_v11  ;;  %v2275_v56 = vmul.f32 %v2274_v43, %v3282_v53  ;;  %v2208_v60 = vand.u32 2147483647, %v2198_v17 }
0x102a   :  { %v2161_v26 = vsub.f32 1.0, %v2160_v20  ;;  %2665 = vrcp.f32 %v3302_v31  ;;  %vm2204_vm5 = vweird.f32 %v2198_v17  ;;  %v2264_v12 = vmul.f32 %v2263_v61, %v3282_v53 }
0x102b   :  { %v2276_v1 = vadd.f32 0.4994258, %v2275_v56  ;;  %v2211_v11 = vor.u32 1.1754944e-38, %v2210_v54  ;;  %v2227_v9 = vadd.f32 1.1283791, %v2226_v55  ;;  %vm2209_vm12 = vcmp.eq.f32.partialorder %v2208_v60, 8.507059e+37 }
0x102c   :  { %v2162_v32 = vmul.f32 %v2662_v19, %v2161_v26  ;;  %v2250_v18 = vand.u32 2147483648, %v3302_v31  ;;  %v2248_v21 = vand.u32 2147483647, %v3302_v31  ;;  %vm2244_vm11 = vweird.f32 %v3302_v31  ;;  %v2336_v54 = vld [vmem:[#allocation5 + $0x31] ss:$0 sm:$0xff] }
0x102d   :  { %v2277_v25 = vmul.f32 %v2276_v1, %v3282_v53  ;;  %v2129_v20 = vmul.f32 0.5, %v3243_v41  ;;  %v2265_v38 = vadd.f32 0.18741608, %v2264_v12  ;;  %v2228_v40 = vmul.f32 %v2227_v9, %v3255_v58  ;;  %v2419_v9 = vld [vmem:[#allocation2 + $0x8e0] sm:$0xff] }
0x102e   :  { %v2664_v36 = vpop.eup %2663  ;;  %v2163_v45 = vadd.f32 %v2662_v19, %v2162_v32  ;;  %v2251_v23 = vor.u32 1.1754944e-38, %v2250_v18  ;;  %vm2249_vm14 = vcmp.eq.f32.partialorder %v2248_v21, 8.507059e+37 }
0x102f   :  { %v2200_v42 = vmul.f32 %v2664_v36, %v2198_v17  ;;  %vm2205_vm4 = vweird.f32 %v2664_v36  ;;  %v2278_v50 = vadd.f32 1.0, %v2277_v25  ;;  %v2266_v32 = vmul.f32 %v2265_v38, %v3282_v53  ;;  %v2417_v25 = vld [vmem:[#allocation2 + $0x8c0] sm:$0xff]  ;;  %v2387_v38 = vld [vmem:[#allocation5 + $0x32] ss:$0 sm:$0xff] }
0x1030   :  { %v2167_v47 = vsel %vm2166_vm2, %v2662_v19, %v2163_v45  ;;  %v2666_v5 = vpop.eup %2665  ;;  %vm2206_vm9 = vmor %vm2204_vm5, %vm2205_vm4  ;;  %vm2385_vm2 = vcmask 1040384  }
0x1031   :  { %v2172_v49 = vsel %vm2169_vm3, %v2171_v39, %v2167_v47  ;;  %v2201_v57 = vsub.f32 1.0, %v2200_v42  ;;  %v2240_v8 = vmul.f32 %v2666_v5, %v3302_v31  ;;  %vm2245_vm10 = vweird.f32 %v2666_v5 }
0x1032   :  { %v2173_v63 = vmul.f32 %v2172_v49, %v2148_v44  ;;  %2667 = vrcp.f32 %v2278_v50  ;;  %vm2246_vm13 = vmor %vm2244_vm11, %vm2245_vm10  ;;  %v2130_v31 = vmul.f32 0.5, %v3247_v48  ;;  %v2267_v45 = vadd.f32 1.1283791, %v2266_v32 }
0x1033   :  { %v2202_v59 = vmul.f32 %v2664_v36, %v2201_v57  ;;  %v2241_v13 = vsub.f32 1.0, %v2240_v8  ;;  %v2290_v37 = vand.u32 2147483648, %v2278_v50  ;;  %v2288_v58 = vand.u32 2147483647, %v2278_v50 }
0x1034   :  { %v2554_v52 = vclamps-f32 %v2173_v63, 1.0  ;;  %vm2284_vm7 = vweird.f32 %v2278_v50  ;;  %v2268_v53 = vmul.f32 %v2267_v45, %v3272_v0 }
0x1035   :  { %v2203_v3 = vadd.f32 %v2664_v36, %v2202_v59  ;;  %v2242_v17 = vmul.f32 %v2666_v5, %v2241_v13  ;;  %v2291_v44 = vor.u32 1.1754944e-38, %v2290_v37  ;;  %vm2289_vm8 = vcmp.eq.f32.partialorder %v2288_v58, 8.507059e+37  ;;  %v2415_v13 = vld [vmem:[#allocation2 + $0x8a0] sm:$0xff] }
0x1036   :  { %v2296_v6 = vadd.f32 1.0, %v2554_v52 }
0x1037   :  { %v2207_v10 = vsel %vm2206_vm9, %v2664_v36, %v2203_v3  ;;  %v2243_v33 = vadd.f32 %v2666_v5, %v2242_v17 }
0x1038   :  { %v2300_v15 = vmul.f32 %v2296_v6, %v2128_v62  ;;  %v2212_v16 = vsel %vm2209_vm12, %v2211_v11, %v2207_v10  ;;  %v2668_v30 = vpop.eup %2667  ;;  %v2420_v11 = vld [vmem:[#allocation2 + $0x8f0] sm:$0xff] }
0x1039   :  { %v2213_v19 = vmul.f32 %v2212_v16, %v2188_v2  ;;  %v2247_v27 = vsel %vm2246_vm13, %v2666_v5, %v2243_v33  ;;  %v2280_v14 = vmul.f32 %v2668_v30, %v2278_v50  ;;  %vm2285_vm6 = vweird.f32 %v2668_v30  ;;  %2433 = vmatpush.msra.mxu1 %v2420_v11  ;;  %v2416_v10 = vld [vmem:[#allocation2 + $0x8b0] sm:$0xff]  ;;  %v2413_v50 = vld [vmem:[#allocation2 + $0x880] sm:$0xff] }
0x103a   :  { %2353 = vmatmul.f32.vlgmr.msra.gmra.mxu3 %v2300_v15  ;;  %v2252_v28 = vsel %vm2249_vm14, %v2251_v23, %v2247_v27  ;;  %vm2286_vm15 = vmor %vm2284_vm7, %vm2285_vm6  ;;  %v2414_v16 = vld [vmem:[#allocation2 + $0x890] sm:$0xff] }
0x103b   :  { %v2555_v22 = vclamps-f32 %v2213_v19, 1.0  ;;  %v2253_v7 = vmul.f32 %v2252_v28, %v2228_v40  ;;  %v2281_v36 = vsub.f32 1.0, %v2280_v14  ;;  %2434 = vmatpush.msra.mxu1 %v2419_v9  ;;  %v2421_v28 = vld [vmem:[#allocation5 + $0x34] ss:$0 sm:$0xff] }
0x103d   :  { %v2297_v26 = vadd.f32 1.0, %v2555_v22  ;;  %v2556_v35 = vclamps-f32 %v2253_v7, 1.0  ;;  %v2282_v42 = vmul.f32 %v2668_v30, %v2281_v36 }
0x103f   :  { %v2301_v29 = vmul.f32 %v2297_v26, %v2129_v20  ;;  %v2298_v41 = vadd.f32 1.0, %v2556_v35  ;;  %v2283_v24 = vadd.f32 %v2668_v30, %v2282_v42  ;;  %v2388_v26 = vld [vmem:[#allocation5 + $0x33] ss:$0 sm:$0xff] }
0x1041   :  { %2375 = vmatmul.f32.vlgmr.msra.gmra.mxu0 %v2301_v29  ;;  %v2302_v39 = vmul.f32 %v2298_v41, %v2130_v31  ;;  %v2287_v47 = vsel %vm2286_vm15, %v2668_v30, %v2283_v24 }
0x1042   :  { %v2292_v43 = vsel %vm2289_vm8, %v2291_v44, %v2287_v47 }
0x1043   :  { %2356 = vmatmul.f32.gmra.mxu3 %v2302_v39  ;;  %v2293_v49 = vmul.f32 %v2292_v43, %v2268_v53 }
0x1045   :  { %v2557_v48 = vclamps-f32 %v2293_v49, 1.0 }
0x1047   :  { %v2299_v57 = vadd.f32 1.0, %v2557_v48 }
0x1049   :  { %v2303_v63 = vmul.f32 %v2299_v57, %v2131_v51 }
0x104b   :  { %2378 = vmatmul.f32.gmra.mxu0 %v2303_v63 }
0x10bd   :  { %v2354_v55 = vpop.f32.mrf.mxu3 }
0x10be   :  { %v2355_v56 = vadd.f32 %v2354_v55, %v2336_v54  ;;  %v2376_v59 = vpop.f32.mrf.mxu0 }
0x10c0   :  { %v2377_v60 = vadd.f32 %v2376_v59, %v2355_v56 }
0x10c2   :  { %v2381_v61 = vadd.f32 %v2377_v60, %v3203_v34  ;;  %v2418_v34 = vld [vmem:[#allocation2 + $0x8d0] sm:$0xff] }
0x10c3   :  { %2435 = vmatpush.msra.mxu1 %v2418_v34 }
0x10c4   :  { %v2383_v5 = vrot.slane %v2381_v61, 4 }
0x10c5   :  { %2436 = vmatpush.msra.mxu1 %v2417_v25 }
0x10c6   :  { %v2386_v0 = vsel %vm2385_vm2, %v2381_v61, %v2383_v5  ;;  %v2357_v52 = vpop.f32.mrf.mxu3 }
0x10c7   :  { %v2389_v62 = vsel %vm135_vm1, %v2386_v0, 0.0  ;;  %2437 = vmatpush.msra.mxu1 %v2416_v10 }
0x10c8   :  { %2390 = vadd.xlane.f32.xlu2 %v2389_v62  ;;  %v2379_v1 = vpop.f32.mrf.mxu0 }
0x10c9   :  { %2438 = vmatpush.msra.mxu1 %v2415_v13 }
0x10cb   :  { %2439 = vmatpush.msra.mxu1 %v2414_v16 }
0x10cd   :  { %2440 = vmatpush.msra.mxu1 %v2413_v50 }
0x113b   :  { %v2391_v2 = vpop.xlane.xlu2 %2390 }
0x113c   :  { %v2392_v4 = vmul.f32 %v2391_v2, %v2811_v46 }
0x113e   :  { %v2393_v3 = vsub.f32 %v2386_v0, %v2392_v4 }
0x1140   :  { %v2394_v8 = vmul.f32 %v2393_v3, %v2393_v3 }
0x1142   :  { %v2395_v6 = vsel %vm135_vm1, %v2394_v8, 0.0 }
0x1143   :  { %2396 = vadd.xlane.f32.xlu0 %v2395_v6 }
0x11b6   :  { %v2397_v12 = vpop.xlane.xlu0 %2396 }
0x11b7   :  { %v2398_v15 = vmul.f32 %v2397_v12, %v2811_v46 }
0x11b9   :  { %v2399_v18 = vadd.f32 1e-05, %v2398_v15 }
0x11bb   :  { %2669 = vrsqrt.f32 %v2399_v18  ;;  %vm2406_vm3 = vweird.f32 %v2399_v18 }
0x11c1   :  { %v2670_v19 = vpop.eup %2669 }
0x11c2   :  { %v2401_v17 = vmul.f32 %v2670_v19, %v2399_v18  ;;  %vm2407_vm1 = vweird.f32 %v2670_v19 }
0x11c3   :  { %vm2408_vm4 = vmor %vm2406_vm3, %vm2407_vm1 }
0x11c4   :  { %v2402_v21 = vmul.f32 %v2670_v19, %v2401_v17 }
0x11c6   :  { %v2403_v22 = vmul.f32 0.5, %v2402_v21 }
0x11c8   :  { %v2404_v33 = vsub.f32 1.5, %v2403_v22 }
0x11ca   :  { %v2405_v20 = vmul.f32 %v2670_v19, %v2404_v33 }
0x11cc   :  { %v2409_v23 = vsel %vm2408_vm4, %v2670_v19, %v2405_v20 }
0x11cd   :  { %v2410_v46 = vmul.f32 %v2409_v23, %v2393_v3 }
0x11cf   :  { %v2411_v40 = vmul.f32 %v2410_v46, %v2387_v38 }
0x11d1   :  { %v2412_v27 = vadd.f32 %v2411_v40, %v2388_v26 }
0x11d3   :  { %2558 = vmatmul.msk.f32.vlgmr.msra.gmra.mxu1 %vm77_vm0, %v2412_v27 }
0x1250   :  { %v2442_v29 = vpop.f32.mrf.mxu1 }
0x1251   :  { %v2443_v7 = vadd.f32 %v2442_v29, %v2421_v28 }
0x1253   :  { %2445 = vst [vmem:[#allocation7] sm:$0x3] %v2443_v7 }
0x1254   :  { %2456 = dma.vmem_to_hbm [thread:$0]  %s2452_s9, 32, %s2454_s12, [#allocation4]  }
0x1255   :  { %2747 = dma.done.wait [#allocation4], 32  }
0x1256   :  { %2748 = vsyncadd [#allocation4], 4294967264 }
0x1257   :  { %2461 = vsyncpa [#allocation3], 1 }
0x1258   :  { %2462 = vsyncpa [#allocation6], 1 }
0x1259   :  { %2463 = vsyncpa [#allocation4], 1 }

</bundles_post_ra>
